<compile_context>
chip_gen: v7x
topology: tpu7x:2x2x1
jax: 0.10.0
libtpu: 0.0.40
codegen_flags: <defaults>
</compile_context>

<pallas_src>
import jax
import jax.numpy as jnp
from jax.experimental import pallas as pl
from jax.experimental.pallas import tpu as pltpu


def _round_up(x, m):
    return ((x + m - 1) // m) * m


# ----------------------------------------------------------------------------
# Pallas kernel: full fused MLP chain for one tile of nodes.
# ----------------------------------------------------------------------------
def _make_kernel(n_layers, gated):
    def kernel(h_ref, we_ref, be_ref, wf_ref, bf_ref, wg_ref, bg_ref,
               wr_ref, br_ref, out_ref):
        mxu_dtype = we_ref.dtype

        # embedding_h: Linear(in_dim_node, hidden). h is already bf16 (HBM-side cast).
        x = (jnp.dot(h_ref[...], we_ref[...],
                     preferred_element_type=jnp.float32) + be_ref[...])
        # in_feat_dropout: identity in eval mode.
        # TODO(synk): training-mode dropout would use pltpu.prng_random_bits here.

        # feat_mlp: n_layers x (Linear -> ReLU -> Dropout[identity]); f32 VPU math.
        for l in range(n_layers):
            z = (jnp.dot(x.astype(mxu_dtype), wf_ref[l],
                         preferred_element_type=jnp.float32) + bf_ref[l])
            x = jnp.maximum(z, 0.0)

        # gated branch: h = sigmoid(gates(h)) * h
        if gated:
            z = (jnp.dot(x.astype(mxu_dtype), wg_ref[...],
                         preferred_element_type=jnp.float32) + bg_ref[...])
            # Clamp so exp(-z) stays finite for the approx reciprocal (EUP path).
            z = jnp.clip(z, -30.0, 30.0)
            g = pl.reciprocal(1.0 + jnp.exp(-z), approx=True)
            x = g * x

        # readout_mlp: Linear(hidden, n_classes) — stored at native width
        # (block last dim == full array dim, so no 128-lane padding needed).
        y = (jnp.dot(x.astype(mxu_dtype), wr_ref[...],
                     preferred_element_type=jnp.float32) + br_ref[...])
        out_ref[...] = y.astype(out_ref.dtype)

    return kernel


# ----------------------------------------------------------------------------
# Wrapper: padding / dtype plumbing + pallas_call.
# ----------------------------------------------------------------------------
def mlp_net_forward(h, params, *, gated=True, tile_n=2048, mxu_dtype=jnp.bfloat16):
    """Runs the MLPNet_pyg forward pass (eval mode). `h` is [N, in_dim_node]
    node features; graph structure (edge_index, e) is unused by this model."""
    N, in_dim = h.shape
    L = params["wf"].shape[0]
    hidden = params["we"].shape[1]
    n_classes = params["wr"].shape[1]

    # Node tile: as large as practical (amortize ~0.35 us/step) while keeping
    # >= 2 grid steps when N allows (v7x has 2 TCs).
    tn = max(8, min(int(tile_n), _round_up(pl.cdiv(N, 2), 8)))

    # Explicit VMEM budget (v7x has 64 MiB physical, 32 MiB scoped default):
    # double-buffered bf16 input + f32 output streams, a few live f32
    # (tn, hidden) intermediates, plus the (tiny, double-buffered) parameters.
    def vmem_est(t):
        stream = 2 * (t * in_dim * 2) + 2 * (t * n_classes * 4)
        interm = 3 * t * hidden * 4
        w = 2 * 2 * (in_dim * hidden + (L + 1) * hidden * hidden + hidden * n_classes)
        b = 2 * 4 * ((L + 2) * hidden + n_classes)
        return stream + interm + w + b

    while tn > 8 and vmem_est(tn) > 24 * 1024 * 1024:
        tn = max(8, _round_up(tn // 2, 8))

    # Even grid length (>= 2): no odd-tile tail imbalance across v7x's two TCs.
    n_pad = _round_up(N, 2 * tn)
    grid = (n_pad // tn,)

    # One-time HBM-side layout/dtype plumbing:
    #  * node features -> bf16 (halves the dominant HBM read; numerically
    #    identical since the kernel fed bf16 to the first dot anyway)
    #  * weights -> bf16 (MXU-native); biases stay f32 (f32 accumulate)
    #  * readout kept at n_classes columns (no 128-lane padding of the output)
    h = jnp.asarray(h, mxu_dtype)
    if n_pad != N:
        h = jnp.pad(h, ((0, n_pad - N), (0, 0)))

    we = params["we"].astype(mxu_dtype)
    wf = params["wf"].astype(mxu_dtype)
    wg = params["wg"].astype(mxu_dtype)
    wr = params["wr"].astype(mxu_dtype)
    be, bf, bg, br = params["be"], params["bf"], params["bg"], params["br"]
    weight_args = [we, be, wf, bf, wg, bg, wr, br]

    kernel = _make_kernel(L, gated)

    def run(buffered_weights):
        def const_spec(arr):
            nd = arr.ndim
            kw = {}
            if buffered_weights:
                # Grid-invariant parameters: single buffer, no per-step re-DMA.
                kw["pipeline_mode"] = pl.Buffered(1)
            return pl.BlockSpec(arr.shape, lambda i, _nd=nd: (0,) * _nd, **kw)

        return pl.pallas_call(
            kernel,
            out_shape=jax.ShapeDtypeStruct((n_pad, n_classes), jnp.float32),
            grid_spec=pltpu.PrefetchScalarGridSpec(
                num_scalar_prefetch=0,
                grid=grid,
                in_specs=[pl.BlockSpec((tn, in_dim), lambda i: (i, 0))]
                         + [const_spec(a) for a in weight_args],
                out_specs=pl.BlockSpec((tn, n_classes), lambda i: (i, 0)),
            ),
            compiler_params=pltpu.CompilerParams(
                dimension_semantics=("parallel",)),
        )(h, *weight_args)

    try:
        out = jax.block_until_ready(run(buffered_weights=True))
    except Exception:
        # Fallback if pl.Buffered(1) is not accepted by this jax/Mosaic build.
        out = jax.block_until_ready(run(buffered_weights=False))

    return out[:N, :]


# ----------------------------------------------------------------------------
# Deterministic parameter initialization (shapes from MLPNet_pyg.__init__).
# ----------------------------------------------------------------------------
def init_params(key, in_dim_node, hidden, n_classes, n_layers):
    keys = iter(jax.random.split(key, 2 * (n_layers + 3)))

    def lin(din, dout, scale=0.05):
        w = scale * jax.random.normal(next(keys), (din, dout), jnp.float32)
        b = scale * jax.random.normal(next(keys), (1, dout), jnp.float32)
        return w, b

    p = {}
    p["we"], p["be"] = lin(in_dim_node, hidden)                       # embedding_h
    wfs, bfs = zip(*[lin(hidden, hidden) for _ in range(n_layers)])   # feat_mlp
    p["wf"] = jnp.stack(wfs)                                          # [L, H, H]
    p["bf"] = jnp.stack(bfs)                                          # [L, 1, H]
    p["wg"], p["bg"] = lin(hidden, hidden)                            # gates
    p["wr"], p["br"] = lin(hidden, n_classes)                         # readout_mlp
    return p


# Pure-JAX (f32) reference for verification.
def _reference(h, p, gated=True):
    x = h @ p["we"] + p["be"]
    for l in range(p["wf"].shape[0]):
        x = jnp.maximum(x @ p["wf"][l] + p["bf"][l], 0.0)
    if gated:
        x = jax.nn.sigmoid(x @ p["wg"] + p["bg"]) * x
    return x @ p["wr"] + p["br"]


if __name__ == "__main__":
    # Small shapes consistent with the module:
    #   net_params ~ {in_dim: 100, hidden_dim: 64, n_classes: 8, L: 2,
    #                 gated: True, pos_enc: False}
    in_dim_node = 100
    hidden = 64
    n_classes = 8
    n_layers = 2
    num_nodes = 512

    key = jax.random.PRNGKey(0)
    k_param, k_feat = jax.random.split(key)
    params = init_params(k_param, in_dim_node, hidden, n_classes, n_layers)
    h = jax.random.normal(k_feat, (num_nodes, in_dim_node), jnp.float32)
    # edge_index / e are unused by this model's forward (pure MLP baseline).

    out = jax.block_until_ready(mlp_net_forward(h, params, gated=True))
    ref = jax.block_until_ready(_reference(h, params, gated=True))

    assert out.shape == (num_nodes, n_classes)
    # bf16 MXU inputs + approx reciprocal => relaxed (but tight in absolute
    # terms for these magnitudes) tolerance vs the pure-f32 reference.
    assert jnp.allclose(out, ref, atol=3e-2, rtol=3e-2), (
        "mismatch vs JAX reference: max abs diff = %e"
        % float(jnp.max(jnp.abs(out - ref))))

    print("KERNEL_OK")
</pallas_src>

<mosaic_0001>
module attributes {stable_mosaic.version = 11 : i64} {
  func.func @kernel(%arg0: i32, %arg1: memref<256x100xbf16, #tpu.memory_space<vmem>>, %arg2: memref<100x64xbf16, #tpu.memory_space<vmem>>, %arg3: memref<1x64xf32, #tpu.memory_space<vmem>>, %arg4: memref<2x64x64xbf16, #tpu.memory_space<vmem>>, %arg5: memref<2x1x64xf32, #tpu.memory_space<vmem>>, %arg6: memref<64x64xbf16, #tpu.memory_space<vmem>>, %arg7: memref<1x64xf32, #tpu.memory_space<vmem>>, %arg8: memref<64x8xbf16, #tpu.memory_space<vmem>>, %arg9: memref<1x8xf32, #tpu.memory_space<vmem>>, %arg10: memref<256x8xf32, #tpu.memory_space<vmem>>) attributes {dimension_semantics = [#tpu.dimension_semantics<parallel>], iteration_bounds = array<i64: 2>, scalar_prefetch = 0 : i64, scratch_operands = 0 : i64, tpu.core_type = #tpu.core_type<tc>, window_params = [{transform_indices = @transform_0, window_bounds = array<i64: 256, 100>}, {pipeline_mode = #tpu.pipeline_mode<synchronous>, transform_indices = @transform_1, window_bounds = array<i64: 100, 64>}, {pipeline_mode = #tpu.pipeline_mode<synchronous>, transform_indices = @transform_2, window_bounds = array<i64: 1, 64>}, {pipeline_mode = #tpu.pipeline_mode<synchronous>, transform_indices = @transform_3, window_bounds = array<i64: 2, 64, 64>}, {pipeline_mode = #tpu.pipeline_mode<synchronous>, transform_indices = @transform_4, window_bounds = array<i64: 2, 1, 64>}, {pipeline_mode = #tpu.pipeline_mode<synchronous>, transform_indices = @transform_5, window_bounds = array<i64: 64, 64>}, {pipeline_mode = #tpu.pipeline_mode<synchronous>, transform_indices = @transform_6, window_bounds = array<i64: 1, 64>}, {pipeline_mode = #tpu.pipeline_mode<synchronous>, transform_indices = @transform_7, window_bounds = array<i64: 64, 8>}, {pipeline_mode = #tpu.pipeline_mode<synchronous>, transform_indices = @transform_8, window_bounds = array<i64: 1, 8>}, {transform_indices = @transform_9, window_bounds = array<i64: 256, 8>}]} {
    %c0 = arith.constant 0 : index
    %c0_0 = arith.constant 0 : index
    %0 = vector.load %arg1[%c0, %c0_0] : memref<256x100xbf16, #tpu.memory_space<vmem>>, vector<256x100xbf16>
    %c0_1 = arith.constant 0 : index
    %c0_2 = arith.constant 0 : index
    %1 = vector.load %arg2[%c0_1, %c0_2] : memref<100x64xbf16, #tpu.memory_space<vmem>>, vector<100x64xbf16>
    %cst = arith.constant dense<0.000000e+00> : vector<256x64xf32>
    %2 = tpu.matmul %0, %1, %cst {dimension_numbers = #tpu.dot_dimension_numbers<[1], [0], [0], [1], [0, 0, 1, 1], [], []>} : vector<256x100xbf16>, vector<100x64xbf16>, vector<256x64xf32> -> vector<256x64xf32>
    %c0_3 = arith.constant 0 : index
    %c0_4 = arith.constant 0 : index
    %3 = vector.load %arg3[%c0_3, %c0_4] : memref<1x64xf32, #tpu.memory_space<vmem>>, vector<1x64xf32>
    %4 = vector.broadcast %3 : vector<1x64xf32> to vector<256x64xf32>
    %5 = arith.addf %2, %4 : vector<256x64xf32>
    %6 = arith.truncf %5 : vector<256x64xf32> to vector<256x64xbf16>
    %c0_5 = arith.constant 0 : index
    %c0_6 = arith.constant 0 : index
    %c0_7 = arith.constant 0 : index
    %7 = vector.load %arg4[%c0_5, %c0_6, %c0_7] : memref<2x64x64xbf16, #tpu.memory_space<vmem>>, vector<1x64x64xbf16>
    %8 = vector.shape_cast %7 : vector<1x64x64xbf16> to vector<64x64xbf16>
    %cst_8 = arith.constant dense<0.000000e+00> : vector<256x64xf32>
    %9 = tpu.matmul %6, %8, %cst_8 {dimension_numbers = #tpu.dot_dimension_numbers<[1], [0], [0], [1], [0, 0, 1, 1], [], []>} : vector<256x64xbf16>, vector<64x64xbf16>, vector<256x64xf32> -> vector<256x64xf32>
    %c0_9 = arith.constant 0 : index
    %c0_10 = arith.constant 0 : index
    %c0_11 = arith.constant 0 : index
    %10 = vector.load %arg5[%c0_9, %c0_10, %c0_11] : memref<2x1x64xf32, #tpu.memory_space<vmem>>, vector<1x1x64xf32>
    %11 = vector.shape_cast %10 : vector<1x1x64xf32> to vector<1x64xf32>
    %12 = vector.broadcast %11 : vector<1x64xf32> to vector<256x64xf32>
    %13 = arith.addf %9, %12 : vector<256x64xf32>
    %cst_12 = arith.constant 0.000000e+00 : f32
    %14 = vector.broadcast %cst_12 : f32 to vector<256x64xf32>
    %15 = arith.maximumf %13, %14 : vector<256x64xf32>
    %16 = arith.truncf %15 : vector<256x64xf32> to vector<256x64xbf16>
    %c1 = arith.constant 1 : index
    %c0_13 = arith.constant 0 : index
    %c0_14 = arith.constant 0 : index
    %17 = vector.load %arg4[%c1, %c0_13, %c0_14] : memref<2x64x64xbf16, #tpu.memory_space<vmem>>, vector<1x64x64xbf16>
    %18 = vector.shape_cast %17 : vector<1x64x64xbf16> to vector<64x64xbf16>
    %cst_15 = arith.constant dense<0.000000e+00> : vector<256x64xf32>
    %19 = tpu.matmul %16, %18, %cst_15 {dimension_numbers = #tpu.dot_dimension_numbers<[1], [0], [0], [1], [0, 0, 1, 1], [], []>} : vector<256x64xbf16>, vector<64x64xbf16>, vector<256x64xf32> -> vector<256x64xf32>
    %c1_16 = arith.constant 1 : index
    %c0_17 = arith.constant 0 : index
    %c0_18 = arith.constant 0 : index
    %20 = vector.load %arg5[%c1_16, %c0_17, %c0_18] : memref<2x1x64xf32, #tpu.memory_space<vmem>>, vector<1x1x64xf32>
    %21 = vector.shape_cast %20 : vector<1x1x64xf32> to vector<1x64xf32>
    %22 = vector.broadcast %21 : vector<1x64xf32> to vector<256x64xf32>
    %23 = arith.addf %19, %22 : vector<256x64xf32>
    %cst_19 = arith.constant 0.000000e+00 : f32
    %24 = vector.broadcast %cst_19 : f32 to vector<256x64xf32>
    %25 = arith.maximumf %23, %24 : vector<256x64xf32>
    %26 = arith.truncf %25 : vector<256x64xf32> to vector<256x64xbf16>
    %c0_20 = arith.constant 0 : index
    %c0_21 = arith.constant 0 : index
    %27 = vector.load %arg6[%c0_20, %c0_21] : memref<64x64xbf16, #tpu.memory_space<vmem>>, vector<64x64xbf16>
    %cst_22 = arith.constant dense<0.000000e+00> : vector<256x64xf32>
    %28 = tpu.matmul %26, %27, %cst_22 {dimension_numbers = #tpu.dot_dimension_numbers<[1], [0], [0], [1], [0, 0, 1, 1], [], []>} : vector<256x64xbf16>, vector<64x64xbf16>, vector<256x64xf32> -> vector<256x64xf32>
    %c0_23 = arith.constant 0 : index
    %c0_24 = arith.constant 0 : index
    %29 = vector.load %arg7[%c0_23, %c0_24] : memref<1x64xf32, #tpu.memory_space<vmem>>, vector<1x64xf32>
    %30 = vector.broadcast %29 : vector<1x64xf32> to vector<256x64xf32>
    %31 = arith.addf %28, %30 : vector<256x64xf32>
    %cst_25 = arith.constant -3.000000e+01 : f32
    %cst_26 = arith.constant 3.000000e+01 : f32
    %32 = vector.broadcast %cst_25 : f32 to vector<256x64xf32>
    %33 = arith.maximumf %32, %31 : vector<256x64xf32>
    %34 = vector.broadcast %cst_26 : f32 to vector<256x64xf32>
    %35 = arith.minimumf %34, %33 : vector<256x64xf32>
    %cst_27 = arith.constant 0.000000e+00 : f32
    %36 = vector.broadcast %cst_27 : f32 to vector<256x64xf32>
    %37 = arith.subf %36, %35 : vector<256x64xf32>
    %38 = math.exp %37 : vector<256x64xf32>
    %cst_28 = arith.constant 1.000000e+00 : f32
    %39 = vector.broadcast %cst_28 : f32 to vector<256x64xf32>
    %40 = arith.addf %39, %38 : vector<256x64xf32>
    %41 = tpu.reciprocal %40 {approx = true} : vector<256x64xf32> -> vector<256x64xf32>
    %42 = arith.mulf %41, %25 : vector<256x64xf32>
    %43 = arith.truncf %42 : vector<256x64xf32> to vector<256x64xbf16>
    %c0_29 = arith.constant 0 : index
    %c0_30 = arith.constant 0 : index
    %44 = vector.load %arg8[%c0_29, %c0_30] : memref<64x8xbf16, #tpu.memory_space<vmem>>, vector<64x8xbf16>
    %cst_31 = arith.constant dense<0.000000e+00> : vector<256x8xf32>
    %45 = tpu.matmul %43, %44, %cst_31 {dimension_numbers = #tpu.dot_dimension_numbers<[1], [0], [0], [1], [0, 0, 1, 1], [], []>} : vector<256x64xbf16>, vector<64x8xbf16>, vector<256x8xf32> -> vector<256x8xf32>
    %c0_32 = arith.constant 0 : index
    %c0_33 = arith.constant 0 : index
    %46 = vector.load %arg9[%c0_32, %c0_33] : memref<1x8xf32, #tpu.memory_space<vmem>>, vector<1x8xf32>
    %47 = vector.broadcast %46 : vector<1x8xf32> to vector<256x8xf32>
    %48 = arith.addf %45, %47 : vector<256x8xf32>
    %c0_34 = arith.constant 0 : index
    %c0_35 = arith.constant 0 : index
    %49 = vector.load %arg10[%c0_34, %c0_35] : memref<256x8xf32, #tpu.memory_space<vmem>>, vector<256x8xf32>
    tpu.vector_store %arg10[%c0_34, %c0_35], %48 {strides = array<i32>} : memref<256x8xf32, #tpu.memory_space<vmem>>, vector<256x8xf32>,
    return
  }
  func.func @transform_0(%arg0: i32) -> (i32, i32) {
    %c0_i32 = arith.constant 0 : i32
    %c0_i32_0 = arith.constant 0 : i32
    return %arg0, %c0_i32 : i32, i32
  }
  func.func @transform_1(%arg0: i32) -> (i32, i32) {
    %c0_i32 = arith.constant 0 : i32
    %c0_i32_0 = arith.constant 0 : i32
    %c0_i32_1 = arith.constant 0 : i32
    return %c0_i32, %c0_i32_0 : i32, i32
  }
  func.func @transform_2(%arg0: i32) -> (i32, i32) {
    %c0_i32 = arith.constant 0 : i32
    %c0_i32_0 = arith.constant 0 : i32
    %c0_i32_1 = arith.constant 0 : i32
    return %c0_i32, %c0_i32_0 : i32, i32
  }
  func.func @transform_3(%arg0: i32) -> (i32, i32, i32) {
    %c0_i32 = arith.constant 0 : i32
    %c0_i32_0 = arith.constant 0 : i32
    %c0_i32_1 = arith.constant 0 : i32
    %c0_i32_2 = arith.constant 0 : i32
    return %c0_i32, %c0_i32_0, %c0_i32_1 : i32, i32, i32
  }
  func.func @transform_4(%arg0: i32) -> (i32, i32, i32) {
    %c0_i32 = arith.constant 0 : i32
    %c0_i32_0 = arith.constant 0 : i32
    %c0_i32_1 = arith.constant 0 : i32
    %c0_i32_2 = arith.constant 0 : i32
    return %c0_i32, %c0_i32_0, %c0_i32_1 : i32, i32, i32
  }
  func.func @transform_5(%arg0: i32) -> (i32, i32) {
    %c0_i32 = arith.constant 0 : i32
    %c0_i32_0 = arith.constant 0 : i32
    %c0_i32_1 = arith.constant 0 : i32
    return %c0_i32, %c0_i32_0 : i32, i32
  }
  func.func @transform_6(%arg0: i32) -> (i32, i32) {
    %c0_i32 = arith.constant 0 : i32
    %c0_i32_0 = arith.constant 0 : i32
    %c0_i32_1 = arith.constant 0 : i32
    return %c0_i32, %c0_i32_0 : i32, i32
  }
  func.func @transform_7(%arg0: i32) -> (i32, i32) {
    %c0_i32 = arith.constant 0 : i32
    %c0_i32_0 = arith.constant 0 : i32
    %c0_i32_1 = arith.constant 0 : i32
    return %c0_i32, %c0_i32_0 : i32, i32
  }
  func.func @transform_8(%arg0: i32) -> (i32, i32) {
    %c0_i32 = arith.constant 0 : i32
    %c0_i32_0 = arith.constant 0 : i32
    %c0_i32_1 = arith.constant 0 : i32
    return %c0_i32, %c0_i32_0 : i32, i32
  }
  func.func @transform_9(%arg0: i32) -> (i32, i32) {
    %c0_i32 = arith.constant 0 : i32
    %c0_i32_0 = arith.constant 0 : i32
    return %arg0, %c0_i32 : i32, i32
  }
}

module attributes {stable_mosaic.version = 11 : i64} {
  func.func @kernel(%arg0: i32, %arg1: memref<256x100xbf16, #tpu.memory_space<vmem>>, %arg2: memref<100x64xbf16, #tpu.memory_space<vmem>>, %arg3: memref<1x64xf32, #tpu.memory_space<vmem>>, %arg4: memref<2x64x64xbf16, #tpu.memory_space<vmem>>, %arg5: memref<2x1x64xf32, #tpu.memory_space<vmem>>, %arg6: memref<64x64xbf16, #tpu.memory_space<vmem>>, %arg7: memref<1x64xf32, #tpu.memory_space<vmem>>, %arg8: memref<64x8xbf16, #tpu.memory_space<vmem>>, %arg9: memref<1x8xf32, #tpu.memory_space<vmem>>, %arg10: memref<256x8xf32, #tpu.memory_space<vmem>>) attributes {dimension_semantics = [#tpu.dimension_semantics<parallel>], iteration_bounds = array<i64: 2>, scalar_prefetch = 0 : i64, scratch_operands = 0 : i64, tpu.core_type = #tpu.core_type<tc>, window_params = [{transform_indices = @transform_0, window_bounds = array<i64: 256, 100>}, {pipeline_mode = #tpu.pipeline_mode<synchronous>, transform_indices = @transform_1, window_bounds = array<i64: 100, 64>}, {pipeline_mode = #tpu.pipeline_mode<synchronous>, transform_indices = @transform_2, window_bounds = array<i64: 1, 64>}, {pipeline_mode = #tpu.pipeline_mode<synchronous>, transform_indices = @transform_3, window_bounds = array<i64: 2, 64, 64>}, {pipeline_mode = #tpu.pipeline_mode<synchronous>, transform_indices = @transform_4, window_bounds = array<i64: 2, 1, 64>}, {pipeline_mode = #tpu.pipeline_mode<synchronous>, transform_indices = @transform_5, window_bounds = array<i64: 64, 64>}, {pipeline_mode = #tpu.pipeline_mode<synchronous>, transform_indices = @transform_6, window_bounds = array<i64: 1, 64>}, {pipeline_mode = #tpu.pipeline_mode<synchronous>, transform_indices = @transform_7, window_bounds = array<i64: 64, 8>}, {pipeline_mode = #tpu.pipeline_mode<synchronous>, transform_indices = @transform_8, window_bounds = array<i64: 1, 8>}, {transform_indices = @transform_9, window_bounds = array<i64: 256, 8>}]} {
    %c0 = arith.constant 0 : index
    %c0_0 = arith.constant 0 : index
    %0 = vector.load %arg1[%c0, %c0_0] : memref<256x100xbf16, #tpu.memory_space<vmem>>, vector<256x100xbf16>
    %c0_1 = arith.constant 0 : index
    %c0_2 = arith.constant 0 : index
    %1 = vector.load %arg2[%c0_1, %c0_2] : memref<100x64xbf16, #tpu.memory_space<vmem>>, vector<100x64xbf16>
    %cst = arith.constant dense<0.000000e+00> : vector<256x64xf32>
    %2 = tpu.matmul %0, %1, %cst {dimension_numbers = #tpu.dot_dimension_numbers<[1], [0], [0], [1], [0, 0, 1, 1], [], []>} : vector<256x100xbf16>, vector<100x64xbf16>, vector<256x64xf32> -> vector<256x64xf32>
    %c0_3 = arith.constant 0 : index
    %c0_4 = arith.constant 0 : index
    %3 = vector.load %arg3[%c0_3, %c0_4] : memref<1x64xf32, #tpu.memory_space<vmem>>, vector<1x64xf32>
    %4 = vector.broadcast %3 : vector<1x64xf32> to vector<256x64xf32>
    %5 = arith.addf %2, %4 : vector<256x64xf32>
    %6 = arith.truncf %5 : vector<256x64xf32> to vector<256x64xbf16>
    %c0_5 = arith.constant 0 : index
    %c0_6 = arith.constant 0 : index
    %c0_7 = arith.constant 0 : index
    %7 = vector.load %arg4[%c0_5, %c0_6, %c0_7] : memref<2x64x64xbf16, #tpu.memory_space<vmem>>, vector<1x64x64xbf16>
    %8 = vector.shape_cast %7 : vector<1x64x64xbf16> to vector<64x64xbf16>
    %cst_8 = arith.constant dense<0.000000e+00> : vector<256x64xf32>
    %9 = tpu.matmul %6, %8, %cst_8 {dimension_numbers = #tpu.dot_dimension_numbers<[1], [0], [0], [1], [0, 0, 1, 1], [], []>} : vector<256x64xbf16>, vector<64x64xbf16>, vector<256x64xf32> -> vector<256x64xf32>
    %c0_9 = arith.constant 0 : index
    %c0_10 = arith.constant 0 : index
    %c0_11 = arith.constant 0 : index
    %10 = vector.load %arg5[%c0_9, %c0_10, %c0_11] : memref<2x1x64xf32, #tpu.memory_space<vmem>>, vector<1x1x64xf32>
    %11 = vector.shape_cast %10 : vector<1x1x64xf32> to vector<1x64xf32>
    %12 = vector.broadcast %11 : vector<1x64xf32> to vector<256x64xf32>
    %13 = arith.addf %9, %12 : vector<256x64xf32>
    %cst_12 = arith.constant 0.000000e+00 : f32
    %14 = vector.broadcast %cst_12 : f32 to vector<256x64xf32>
    %15 = arith.maximumf %13, %14 : vector<256x64xf32>
    %16 = arith.truncf %15 : vector<256x64xf32> to vector<256x64xbf16>
    %c1 = arith.constant 1 : index
    %c0_13 = arith.constant 0 : index
    %c0_14 = arith.constant 0 : index
    %17 = vector.load %arg4[%c1, %c0_13, %c0_14] : memref<2x64x64xbf16, #tpu.memory_space<vmem>>, vector<1x64x64xbf16>
    %18 = vector.shape_cast %17 : vector<1x64x64xbf16> to vector<64x64xbf16>
    %cst_15 = arith.constant dense<0.000000e+00> : vector<256x64xf32>
    %19 = tpu.matmul %16, %18, %cst_15 {dimension_numbers = #tpu.dot_dimension_numbers<[1], [0], [0], [1], [0, 0, 1, 1], [], []>} : vector<256x64xbf16>, vector<64x64xbf16>, vector<256x64xf32> -> vector<256x64xf32>
    %c1_16 = arith.constant 1 : index
    %c0_17 = arith.constant 0 : index
    %c0_18 = arith.constant 0 : index
    %20 = vector.load %arg5[%c1_16, %c0_17, %c0_18] : memref<2x1x64xf32, #tpu.memory_space<vmem>>, vector<1x1x64xf32>
    %21 = vector.shape_cast %20 : vector<1x1x64xf32> to vector<1x64xf32>
    %22 = vector.broadcast %21 : vector<1x64xf32> to vector<256x64xf32>
    %23 = arith.addf %19, %22 : vector<256x64xf32>
    %cst_19 = arith.constant 0.000000e+00 : f32
    %24 = vector.broadcast %cst_19 : f32 to vector<256x64xf32>
    %25 = arith.maximumf %23, %24 : vector<256x64xf32>
    %26 = arith.truncf %25 : vector<256x64xf32> to vector<256x64xbf16>
    %c0_20 = arith.constant 0 : index
    %c0_21 = arith.constant 0 : index
    %27 = vector.load %arg6[%c0_20, %c0_21] : memref<64x64xbf16, #tpu.memory_space<vmem>>, vector<64x64xbf16>
    %cst_22 = arith.constant dense<0.000000e+00> : vector<256x64xf32>
    %28 = tpu.matmul %26, %27, %cst_22 {dimension_numbers = #tpu.dot_dimension_numbers<[1], [0], [0], [1], [0, 0, 1, 1], [], []>} : vector<256x64xbf16>, vector<64x64xbf16>, vector<256x64xf32> -> vector<256x64xf32>
    %c0_23 = arith.constant 0 : index
    %c0_24 = arith.constant 0 : index
    %29 = vector.load %arg7[%c0_23, %c0_24] : memref<1x64xf32, #tpu.memory_space<vmem>>, vector<1x64xf32>
    %30 = vector.broadcast %29 : vector<1x64xf32> to vector<256x64xf32>
    %31 = arith.addf %28, %30 : vector<256x64xf32>
    %cst_25 = arith.constant -3.000000e+01 : f32
    %cst_26 = arith.constant 3.000000e+01 : f32
    %32 = vector.broadcast %cst_25 : f32 to vector<256x64xf32>
    %33 = arith.maximumf %32, %31 : vector<256x64xf32>
    %34 = vector.broadcast %cst_26 : f32 to vector<256x64xf32>
    %35 = arith.minimumf %34, %33 : vector<256x64xf32>
    %cst_27 = arith.constant 0.000000e+00 : f32
    %36 = vector.broadcast %cst_27 : f32 to vector<256x64xf32>
    %37 = arith.subf %36, %35 : vector<256x64xf32>
    %38 = math.exp %37 : vector<256x64xf32>
    %cst_28 = arith.constant 1.000000e+00 : f32
    %39 = vector.broadcast %cst_28 : f32 to vector<256x64xf32>
    %40 = arith.addf %39, %38 : vector<256x64xf32>
    %41 = tpu.reciprocal %40 {approx = true} : vector<256x64xf32> -> vector<256x64xf32>
    %42 = arith.mulf %41, %25 : vector<256x64xf32>
    %43 = arith.truncf %42 : vector<256x64xf32> to vector<256x64xbf16>
    %c0_29 = arith.constant 0 : index
    %c0_30 = arith.constant 0 : index
    %44 = vector.load %arg8[%c0_29, %c0_30] : memref<64x8xbf16, #tpu.memory_space<vmem>>, vector<64x8xbf16>
    %cst_31 = arith.constant dense<0.000000e+00> : vector<256x8xf32>
    %45 = tpu.matmul %43, %44, %cst_31 {dimension_numbers = #tpu.dot_dimension_numbers<[1], [0], [0], [1], [0, 0, 1, 1], [], []>} : vector<256x64xbf16>, vector<64x8xbf16>, vector<256x8xf32> -> vector<256x8xf32>
    %c0_32 = arith.constant 0 : index
    %c0_33 = arith.constant 0 : index
    %46 = vector.load %arg9[%c0_32, %c0_33] : memref<1x8xf32, #tpu.memory_space<vmem>>, vector<1x8xf32>
    %47 = vector.broadcast %46 : vector<1x8xf32> to vector<256x8xf32>
    %48 = arith.addf %45, %47 : vector<256x8xf32>
    %c0_34 = arith.constant 0 : index
    %c0_35 = arith.constant 0 : index
    %49 = vector.load %arg10[%c0_34, %c0_35] : memref<256x8xf32, #tpu.memory_space<vmem>>, vector<256x8xf32>
    tpu.vector_store %arg10[%c0_34, %c0_35], %48 {strides = array<i32>} : memref<256x8xf32, #tpu.memory_space<vmem>>, vector<256x8xf32>,
    return
  }
  func.func @transform_0(%arg0: i32) -> (i32, i32) {
    %c0_i32 = arith.constant 0 : i32
    %c0_i32_0 = arith.constant 0 : i32
    return %arg0, %c0_i32 : i32, i32
  }
  func.func @transform_1(%arg0: i32) -> (i32, i32) {
    %c0_i32 = arith.constant 0 : i32
    %c0_i32_0 = arith.constant 0 : i32
    %c0_i32_1 = arith.constant 0 : i32
    return %c0_i32, %c0_i32_0 : i32, i32
  }
  func.func @transform_2(%arg0: i32) -> (i32, i32) {
    %c0_i32 = arith.constant 0 : i32
    %c0_i32_0 = arith.constant 0 : i32
    %c0_i32_1 = arith.constant 0 : i32
    return %c0_i32, %c0_i32_0 : i32, i32
  }
  func.func @transform_3(%arg0: i32) -> (i32, i32, i32) {
    %c0_i32 = arith.constant 0 : i32
    %c0_i32_0 = arith.constant 0 : i32
    %c0_i32_1 = arith.constant 0 : i32
    %c0_i32_2 = arith.constant 0 : i32
    return %c0_i32, %c0_i32_0, %c0_i32_1 : i32, i32, i32
  }
  func.func @transform_4(%arg0: i32) -> (i32, i32, i32) {
    %c0_i32 = arith.constant 0 : i32
    %c0_i32_0 = arith.constant 0 : i32
    %c0_i32_1 = arith.constant 0 : i32
    %c0_i32_2 = arith.constant 0 : i32
    return %c0_i32, %c0_i32_0, %c0_i32_1 : i32, i32, i32
  }
  func.func @transform_5(%arg0: i32) -> (i32, i32) {
    %c0_i32 = arith.constant 0 : i32
    %c0_i32_0 = arith.constant 0 : i32
    %c0_i32_1 = arith.constant 0 : i32
    return %c0_i32, %c0_i32_0 : i32, i32
  }
  func.func @transform_6(%arg0: i32) -> (i32, i32) {
    %c0_i32 = arith.constant 0 : i32
    %c0_i32_0 = arith.constant 0 : i32
    %c0_i32_1 = arith.constant 0 : i32
    return %c0_i32, %c0_i32_0 : i32, i32
  }
  func.func @transform_7(%arg0: i32) -> (i32, i32) {
    %c0_i32 = arith.constant 0 : i32
    %c0_i32_0 = arith.constant 0 : i32
    %c0_i32_1 = arith.constant 0 : i32
    return %c0_i32, %c0_i32_0 : i32, i32
  }
  func.func @transform_8(%arg0: i32) -> (i32, i32) {
    %c0_i32 = arith.constant 0 : i32
    %c0_i32_0 = arith.constant 0 : i32
    %c0_i32_1 = arith.constant 0 : i32
    return %c0_i32, %c0_i32_0 : i32, i32
  }
  func.func @transform_9(%arg0: i32) -> (i32, i32) {
    %c0_i32 = arith.constant 0 : i32
    %c0_i32_0 = arith.constant 0 : i32
    return %arg0, %c0_i32 : i32, i32
  }
}

</mosaic_0001>

<bundles_post_ra>
// kernel: tpu_custom_call.1
= control target key start
LH: loop header
LB: loop body
LE: loop exit
PB: predicated region body
PF: predicated region fallthrough
CT: control target
= control target key end

     0   :  { %s2917_s30 = smov 0   ;;  %s3580_s0 = inlined_call_operand.vmem [shape: bf16[512,100], index: 0, kind: input, shape index: {}]   ;;  %s3581_s1 = inlined_call_operand.vmem [shape: bf16[100,64], index: 1, kind: input, shape index: {}]   ;;  %s3582_s2 = inlined_call_operand.vmem [shape: f32[1,64], index: 2, kind: input, shape index: {}]   ;;  %s3583_s3 = inlined_call_operand.vmem [shape: bf16[2,64,64], index: 3, kind: input, shape index: {}]   ;;  %s3584_s4 = inlined_call_operand.vmem [shape: f32[2,1,64], index: 4, kind: input, shape index: {}]   ;;  %s3585_s5 = inlined_call_operand.vmem [shape: bf16[64,64], index: 5, kind: input, shape index: {}]   ;;  %s3586_s6 = inlined_call_operand.vmem [shape: f32[1,64], index: 6, kind: input, shape index: {}]   ;;  %s3587_s7 = inlined_call_operand.vmem [shape: bf16[64,8], index: 7, kind: input, shape index: {}]   ;;  %s3588_s8 = inlined_call_operand.vmem [shape: f32[1,8], index: 8, kind: input, shape index: {}]   ;;  %s3589_s9 = inlined_call_operand.vmem [shape: f32[512,8], index: 9, kind: output, shape index: {}]  }
   0x1 LB: > { %s2190_s10 = sadd.s32 4294967295, %s2865_s30   ;;  %p2194_p0 = scmp.ge.s32.totalorder %s2865_s30, 1  ;;  %s2865_s30 = sphi %s2917_s30, %s19_s30  }
   0x2   : > { %p288_p1 = scmp.lt.s32.totalorder %s2865_s30, 3 }
   0x4   : > { %p289_p2 = pnand %p2194_p0, %p288_p1 }
   0x5   : > { %v2692_v0 = vld [vmem:[%s3581_s1] sm:$0xff] (!%p289_p2)   ;;  %v2693_v1 = vld [vmem:[%s3581_s1 + $0x8] sm:$0xff] (!%p289_p2)   ;;  %s2195_s15 = sshll.u32 (!%p289_p2), %s2190_s10, 5  ;;  %v2694_v2 = vld [vmem:[%s3581_s1 + $0x10] sm:$0xff] (!%p289_p2)   ;;  %vm508_vm0 = vcmask (!%p289_p2), 818176   ;;  %vm557_vm1 = vcmask (!%p289_p2), 1041408  }
   0x6   : > { %292 = sbr.rel (%p289_p2) target bundleno = 1232 (0x4d0), region = 56  ;;  %2469 = vmatprep.subr.bf16.mxu0 (!%p289_p2), %v2692_v0  ;;  %p325_p3 = scmp.lt.s32.totalorder (!%p289_p2), %s2195_s15, 63  ;;  %v2695_v3 = vld [vmem:[%s3581_s1 + $0x18] sm:$0xff] (!%p289_p2)   ;;  %v2715_v4 = vld [vmem:[%s3583_s3] sm:$0xff] (!%p289_p2)   ;;  %v2697_v7 = vld [vmem:[%s3581_s1 + $0x28] sm:$0xff] (!%p289_p2)   ;;  %vm777_vm2 = vcmask (!%p289_p2), 523264  }
   0x7   : > { %2470 = vmatpush3.bf16.msra.mxu0 (!%p289_p2), %v2692_v0  ;;  %2675 = vmatprep.subr.bf16.mxu1 (!%p289_p2), %v2715_v4  ;;  %v2696_v6 = vld [vmem:[%s3581_s1 + $0x20] sm:$0xff] (!%p289_p2)   ;;  %v2698_v8 = vld [vmem:[%s3581_s1 + $0x30] ss:$0 sps:$4 sm:$0x33] (!%p289_p2)   ;;  %v2716_v11 = vld [vmem:[%s3583_s3 + $0x8] sm:$0xff] (!%p289_p2)   ;;  %vm2101_vm3 = vcmask (!%p289_p2), 64512  }
   0x8   : > { %2471 = vmatprep.subr.bf16.mxu0 (!%p289_p2), %v2693_v1  ;;  %2679 = vmatpush3.bf16.msra.mxu1 (!%p289_p2), %v2715_v4  ;;  %v559_v9 = vsel (!%p289_p2), %vm557_vm1, %v2698_v8, 0  ;;  %v2717_v13 = vld [vmem:[%s3583_s3 + $0x10] sm:$0xff] (!%p289_p2)   ;;  %v2718_v14 = vld [vmem:[%s3583_s3 + $0x18] sm:$0xff] (!%p289_p2)   ;;  %v2719_v28 = vld [vmem:[%s3583_s3 + $0x20] sm:$0xff] (!%p289_p2)  }
   0x9   : > { %2676 = vmatprep.subr.bf16.mxu1 (!%p289_p2), %v2716_v11  ;;  %v3004_v30 = vld [vmem:[%s3582_s2] ss:$0 sm:$0xff] (!%p289_p2) }
   0xb   : > { %2472 = vmatpush3.bf16.msra.mxu0 (!%p289_p2), %v2693_v1 }
   0xc   : > { %2473 = vmatprep.subr.bf16.mxu0 (!%p289_p2), %v2694_v2  ;;  %2680 = vmatpush3.bf16.msra.mxu1 (!%p289_p2), %v2716_v11 }
   0xd   : > { %s3639_s15 = smov (!%p325_p3, %s2195_s15), 63  ;;  %2677 = vmatprep.subr.bf16.mxu1 %v2717_v13 }
   0xe   : > { %s2196_s20 = sshll.u32 %s3639_s15, 2  ;;  %s2198_s12 = sshll.u32 %s3639_s15, 3 }
   0xf   : > { %s2943_s23 = scalar_lea.vmem %s3580_s0, %s2196_s20  ;;  %2474 = vmatpush3.bf16.msra.mxu0 %v2694_v2  ;;  %s3479_s18 = scalar_lea.vmem %s3589_s9, %s2198_s12 }
  0x10   : > { %v2699_v5 = vld [vmem:[%s2943_s23] sm:$0xff]   ;;  %2475 = vmatprep.subr.bf16.mxu0 %v2695_v3  ;;  %v2700_v10 = vld [vmem:[%s2943_s23 + $0x8] sm:$0xff]   ;;  %v2701_v12 = vld [vmem:[%s2943_s23 + $0x10] sm:$0xff]   ;;  %2681 = vmatpush3.bf16.msra.mxu1 %v2717_v13 }
  0x11   : > { %2483 = vmatprep.mubr.msk.bf16.mxu0 %vm508_vm0, %v2699_v5  ;;  %v2702_v15 = vld [vmem:[%s2943_s23 + $0x18] sm:$0xff]   ;;  %2678 = vmatprep.subr.bf16.mxu1 %v2718_v14  ;;  %v2703_v16 = vld [vmem:[%s2943_s23 + $0x20] sm:$0xff]   ;;  %v2704_v17 = vld [vmem:[%s2943_s23 + $0x28] sm:$0xff]  }
  0x12   : > { %v2705_v18 = vld [vmem:[%s2943_s23 + $0x30] sm:$0xff]   ;;  %v2706_v19 = vld [vmem:[%s2943_s23 + $0x38] sm:$0xff]   ;;  %v2707_v20 = vld [vmem:[%s2943_s23 + $0x40] sm:$0xff]  }
  0x13   : > { %2476 = vmatpush3.bf16.msra.mxu0 %v2695_v3  ;;  %v2708_v21 = vld [vmem:[%s2943_s23 + $0x48] sm:$0xff]   ;;  %v2709_v22 = vld [vmem:[%s2943_s23 + $0x50] sm:$0xff]   ;;  %v2710_v23 = vld [vmem:[%s2943_s23 + $0x58] sm:$0xff]  }
  0x14   : > { %2477 = vmatprep.subr.bf16.mxu0 %v2696_v6  ;;  %2682 = vmatpush3.bf16.msra.mxu1 %v2718_v14  ;;  %v2711_v24 = vld [vmem:[%s2943_s23 + $0x60] sm:$0xff]   ;;  %v2712_v25 = vld [vmem:[%s2943_s23 + $0x68] sm:$0xff]   ;;  %v2713_v26 = vld [vmem:[%s2943_s23 + $0x70] sm:$0xff]  }
  0x15   : > { %v2714_v27 = vld [vmem:[%s2943_s23 + $0x78] sm:$0xff]   ;;  %2555 = vmatprep.subr.bf16.mxu1 %v2719_v28 }
  0x17   : > { %2478 = vmatpush3.bf16.msra.mxu0 %v2696_v6  ;;  %v2720_v6 = vld [vmem:[%s3583_s3 + $0x28] sm:$0xff]  }
  0x18   : > { %2479 = vmatprep.subr.bf16.mxu0 %v2697_v7 }
  0x1b   : > { %2480 = vmatpush3.bf16.msra.mxu0 %v2697_v7 }
  0x1c   : > { %2683 = vmatprep.subr.msk.bf16.mxu0 %vm557_vm1, %v2698_v8 }
  0x1f   : > { %2482 = vmatpush3.bf16.msra.mxu0 %v559_v9 }
  0x20   : > { %2515 = vmatprep.subr.bf16.mxu0 %v2715_v4 }
  0x22   : > { %2484 = vmatmul.mubr.msk.bf16.vlgmr.msra.gmra.mrb[0].mxu0 %vm508_vm0, %v2700_v10 }
  0x23   : > { %2487 = vmatprep.mubr.msk.bf16.mxu0 %vm508_vm0, %v2701_v12  ;;  %2516 = vmatpush3.bf16.msra.mxu0 %v2715_v4 }
  0x24   : > { %2517 = vmatprep.subr.bf16.mxu0 %v2716_v11 }
  0x27   : > { %2518 = vmatpush3.bf16.msra.mxu0 %v2716_v11 }
  0x28   : > { %2519 = vmatprep.subr.bf16.mxu0 %v2717_v13 }
  0x2a   : > { %2488 = vmatmul.mubr.msk.bf16.gmra.mrb[4].mxu0 %vm508_vm0, %v2702_v15 }
  0x2b   : > { %2491 = vmatprep.mubr.msk.bf16.mxu0 %vm508_vm0, %v2703_v16  ;;  %2520 = vmatpush3.bf16.msra.mxu0 %v2717_v13  ;;  %v2721_v13 = vld [vmem:[%s3583_s3 + $0x30] sm:$0xff]  }
  0x2c   : > { %2521 = vmatprep.subr.bf16.mxu0 %v2718_v14 }
  0x2f   : > { %2522 = vmatpush3.bf16.msra.mxu0 %v2718_v14 }
  0x32   : > { %2492 = vmatmul.mubr.msk.bf16.gmra.mrb[8].mxu0 %vm508_vm0, %v2704_v17 }
  0x33   : > { %2495 = vmatprep.mubr.msk.bf16.mxu0 %vm508_vm0, %v2705_v18 }
  0x3a   : > { %2496 = vmatmul.mubr.msk.bf16.gmra.mrb[12].mxu0 %vm508_vm0, %v2706_v19 }
  0x3b   : > { %2499 = vmatprep.mubr.msk.bf16.mxu0 %vm508_vm0, %v2707_v20 }
  0x42   : > { %2500 = vmatmul.mubr.msk.bf16.gmra.mrb[16].mxu0 %vm508_vm0, %v2708_v21 }
  0x43   : > { %2503 = vmatprep.mubr.msk.bf16.mxu0 %vm508_vm0, %v2709_v22 }
  0x4a   : > { %2504 = vmatmul.mubr.msk.bf16.gmra.mrb[20].mxu0 %vm508_vm0, %v2710_v23 }
  0x4b   : > { %2507 = vmatprep.mubr.msk.bf16.mxu0 %vm508_vm0, %v2711_v24 }
  0x52   : > { %2508 = vmatmul.mubr.msk.bf16.gmra.mrb[24].mxu0 %vm508_vm0, %v2712_v25 }
  0x53   : > { %2511 = vmatprep.mubr.msk.bf16.mxu0 %vm508_vm0, %v2713_v26 }
  0x5a   : > { %2512 = vmatmul.mubr.msk.bf16.gmra.mrb[28].mxu0 %vm508_vm0, %v2714_v27 }
  0xf5   : > { %v2485_v29 = vpop.f32.mrb[0].mxu0 }
  0xf6   : > { %v595_v31 = vpop.f32.mrb[1].mxu0  ;;  %v604_v33 = vadd.f32 %v2485_v29, %v3004_v30 }
  0xf7   : > { %v2486_v32 = vpop.f32.mrb[2].mxu0  ;;  %v596_v36 = vadd.f32 %v3004_v30, %v595_v31 }
  0xf8   : > { %v607_v34 = vadd.f32 %v2486_v32, %v3004_v30  ;;  %v598_v35 = vpop.f32.mrb[3].mxu0 }
  0xf9   : > { %v599_v37 = vadd.f32 %v3004_v30, %v598_v35 }
  0xfa   : > { %v723_v38 = vpack.c.bf16 %v607_v34, %v604_v33 }
  0xfb   : > { %v722_v39 = vpack.c.bf16 %v599_v37, %v596_v36 }
  0xfd   : > { %v2489_v40 = vpop.f32.mrb[4].mxu0  ;;  %2523 = vmatprep.mubr.msk.bf16.mxu0 %vm777_vm2, %v722_v39 }
  0xfe   : > { %v611_v41 = vpop.f32.mrb[5].mxu0  ;;  %2524 = vmatmul.mubr.msk.bf16.vlgmr.msra.gmra.mrb[32].mxu0 %vm777_vm2, %v723_v38  ;;  %v620_v43 = vadd.f32 %v2489_v40, %v3004_v30 }
  0xff   : > { %v2490_v42 = vpop.f32.mrb[6].mxu0  ;;  %v612_v46 = vadd.f32 %v3004_v30, %v611_v41 }
 0x100   : > { %v623_v44 = vadd.f32 %v2490_v42, %v3004_v30  ;;  %v614_v45 = vpop.f32.mrb[7].mxu0 }
 0x101   : > { %v615_v47 = vadd.f32 %v3004_v30, %v614_v45 }
 0x102   : > { %v725_v48 = vpack.c.bf16 %v623_v44, %v620_v43 }
 0x103   : > { %v724_v49 = vpack.c.bf16 %v615_v47, %v612_v46 }
 0x105   : > { %v2493_v50 = vpop.f32.mrb[8].mxu0  ;;  %2527 = vmatprep.mubr.msk.bf16.mxu0 %vm777_vm2, %v724_v49  ;;  %v2722_v49 = vld [vmem:[%s3583_s3 + $0x38] sm:$0xff]  }
 0x106   : > { %v627_v51 = vpop.f32.mrb[9].mxu0  ;;  %2528 = vmatmul.mubr.msk.bf16.gmra.mrb[36].mxu0 %vm777_vm2, %v725_v48  ;;  %v636_v53 = vadd.f32 %v2493_v50, %v3004_v30  ;;  %v2723_v50 = vld [vmem:[%s3585_s5] sm:$0xff]  }
 0x107   : > { %v2494_v52 = vpop.f32.mrb[10].mxu0  ;;  %v628_v56 = vadd.f32 %v3004_v30, %v627_v51  ;;  %2595 = vmatprep.subr.bf16.mxu0 %v2723_v50  ;;  %v2725_v51 = vld [vmem:[%s3585_s5 + $0x10] sm:$0xff]  }
 0x108   : > { %v639_v54 = vadd.f32 %v2494_v52, %v3004_v30  ;;  %v630_v55 = vpop.f32.mrb[11].mxu0  ;;  %2596 = vmatpush3.bf16.msra.mxu0 %v2723_v50  ;;  %v3075_v52 = vld [vmem:[%s3584_s4] ss:$0 sm:$0xff] }
 0x109   : > { %v631_v57 = vadd.f32 %v3004_v30, %v630_v55 }
 0x10a   : > { %v727_v58 = vpack.c.bf16 %v639_v54, %v636_v53 }
 0x10b   : > { %v726_v59 = vpack.c.bf16 %v631_v57, %v628_v56 }
 0x10d   : > { %v2497_v60 = vpop.f32.mrb[12].mxu0  ;;  %2531 = vmatprep.mubr.msk.bf16.mxu0 %vm777_vm2, %v726_v59 }
 0x10e   : > { %v643_v61 = vpop.f32.mrb[13].mxu0  ;;  %2532 = vmatmul.mubr.msk.bf16.gmra.mrb[40].mxu0 %vm777_vm2, %v727_v58  ;;  %v652_v63 = vadd.f32 %v2497_v60, %v3004_v30 }
 0x10f   : > { %v2498_v62 = vpop.f32.mrb[14].mxu0  ;;  %v644_v2 = vadd.f32 %v3004_v30, %v643_v61 }
 0x110   : > { %v655_v0 = vadd.f32 %v2498_v62, %v3004_v30  ;;  %v646_v1 = vpop.f32.mrb[15].mxu0 }
 0x111   : > { %v647_v3 = vadd.f32 %v3004_v30, %v646_v1 }
 0x112   : > { %v729_v4 = vpack.c.bf16 %v655_v0, %v652_v63 }
 0x113   : > { %v728_v5 = vpack.c.bf16 %v647_v3, %v644_v2 }
 0x115   : > { %v2501_v7 = vpop.f32.mrb[16].mxu0  ;;  %2535 = vmatprep.mubr.msk.bf16.mxu1 %vm777_vm2, %v728_v5 }
 0x116   : > { %v659_v8 = vpop.f32.mrb[17].mxu0  ;;  %2536 = vmatmul.mubr.msk.bf16.vlgmr.msra.gmra.mrb[0].mxu1 %vm777_vm2, %v729_v4  ;;  %v668_v10 = vadd.f32 %v2501_v7, %v3004_v30 }
 0x117   : > { %v2502_v9 = vpop.f32.mrb[18].mxu0  ;;  %2556 = vmatpush3.bf16.msra.mxu1 %v2719_v28  ;;  %v660_v14 = vadd.f32 %v3004_v30, %v659_v8 }
 0x118   : > { %v671_v11 = vadd.f32 %v2502_v9, %v3004_v30  ;;  %v662_v12 = vpop.f32.mrb[19].mxu0  ;;  %2557 = vmatprep.subr.bf16.mxu1 %v2720_v6 }
 0x119   : > { %v663_v15 = vadd.f32 %v3004_v30, %v662_v12 }
 0x11a   : > { %v731_v16 = vpack.c.bf16 %v671_v11, %v668_v10 }
 0x11b   : > { %v730_v17 = vpack.c.bf16 %v663_v15, %v660_v14  ;;  %2558 = vmatpush3.bf16.msra.mxu1 %v2720_v6 }
 0x11c   : > { %2559 = vmatprep.subr.bf16.mxu1 %v2721_v13 }
 0x11d   : > { %v2505_v18 = vpop.f32.mrb[20].mxu0  ;;  %2539 = vmatprep.mubr.msk.bf16.mxu1 %vm777_vm2, %v730_v17 }
 0x11e   : > { %v675_v19 = vpop.f32.mrb[21].mxu0  ;;  %2540 = vmatmul.mubr.msk.bf16.gmra.mrb[4].mxu1 %vm777_vm2, %v731_v16  ;;  %v684_v21 = vadd.f32 %v2505_v18, %v3004_v30 }
 0x11f   : > { %v2506_v20 = vpop.f32.mrb[22].mxu0  ;;  %2560 = vmatpush3.bf16.msra.mxu1 %v2721_v13  ;;  %v676_v24 = vadd.f32 %v3004_v30, %v675_v19 }
 0x120   : > { %v687_v22 = vadd.f32 %v2506_v20, %v3004_v30  ;;  %v678_v23 = vpop.f32.mrb[23].mxu0  ;;  %2561 = vmatprep.subr.bf16.mxu1 %v2722_v49 }
 0x121   : > { %v679_v25 = vadd.f32 %v3004_v30, %v678_v23 }
 0x122   : > { %v733_v26 = vpack.c.bf16 %v687_v22, %v684_v21 }
 0x123   : > { %v732_v27 = vpack.c.bf16 %v679_v25, %v676_v24  ;;  %2562 = vmatpush3.bf16.msra.mxu1 %v2722_v49 }
 0x125   : > { %v2509_v28 = vpop.f32.mrb[24].mxu0  ;;  %2543 = vmatprep.mubr.msk.bf16.mxu1 %vm777_vm2, %v732_v27 }
 0x126   : > { %v691_v29 = vpop.f32.mrb[25].mxu0  ;;  %2544 = vmatmul.mubr.msk.bf16.gmra.mrb[8].mxu1 %vm777_vm2, %v733_v26  ;;  %v700_v32 = vadd.f32 %v2509_v28, %v3004_v30 }
 0x127   : > { %v2510_v31 = vpop.f32.mrb[26].mxu0  ;;  %v692_v35 = vadd.f32 %v3004_v30, %v691_v29 }
 0x128   : > { %v703_v33 = vadd.f32 %v2510_v31, %v3004_v30  ;;  %v694_v34 = vpop.f32.mrb[27].mxu0 }
 0x129   : > { %v695_v36 = vadd.f32 %v3004_v30, %v694_v34 }
 0x12a   : > { %v735_v37 = vpack.c.bf16 %v703_v33, %v700_v32 }
 0x12b   : > { %v734_v38 = vpack.c.bf16 %v695_v36, %v692_v35 }
 0x12d   : > { %v2513_v39 = vpop.f32.mrb[28].mxu0  ;;  %2547 = vmatprep.mubr.msk.bf16.mxu1 %vm777_vm2, %v734_v38 }
 0x12e   : > { %v707_v40 = vpop.f32.mrb[29].mxu0  ;;  %2548 = vmatmul.mubr.msk.bf16.gmra.mrb[12].mxu1 %vm777_vm2, %v735_v37  ;;  %v716_v42 = vadd.f32 %v2513_v39, %v3004_v30 }
 0x12f   : > { %v2514_v41 = vpop.f32.mrb[30].mxu0  ;;  %v708_v45 = vadd.f32 %v3004_v30, %v707_v40 }
 0x130   : > { %v719_v43 = vadd.f32 %v2514_v41, %v3004_v30  ;;  %v710_v44 = vpop.f32.mrb[31].mxu0 }
 0x131   : > { %v711_v46 = vadd.f32 %v3004_v30, %v710_v44  ;;  %v2724_v30 = vld [vmem:[%s3585_s5 + $0x8] sm:$0xff]  }
 0x132   : > { %v737_v47 = vpack.c.bf16 %v719_v43, %v716_v42  ;;  %2597 = vmatprep.subr.bf16.mxu0 %v2724_v30 }
 0x133   : > { %v736_v48 = vpack.c.bf16 %v711_v46, %v708_v45  ;;  %2598 = vmatpush3.bf16.msra.mxu0 %v2724_v30 }
 0x134   : > { %2599 = vmatprep.subr.bf16.mxu0 %v2725_v51 }
 0x135   : > { %2551 = vmatprep.mubr.msk.bf16.mxu1 %vm777_vm2, %v736_v48 }
 0x136   : > { %2552 = vmatmul.mubr.msk.bf16.gmra.mrb[16].mxu1 %vm777_vm2, %v737_v47 }
 0x137   : > { %2600 = vmatpush3.bf16.msra.mxu0 %v2725_v51 }
 0x1d1   : > { %v2525_v53 = vpop.f32.mrb[32].mxu0 }
 0x1d2   : > { %v869_v54 = vadd.f32 %v2525_v53, %v3075_v52  ;;  %v860_v55 = vpop.f32.mrb[33].mxu0 }
 0x1d3   : > { %v861_v56 = vadd.f32 %v3075_v52, %v860_v55  ;;  %v2526_v57 = vpop.f32.mrb[34].mxu0 }
 0x1d4   : > { %v872_v58 = vadd.f32 %v2526_v57, %v3075_v52  ;;  %v863_v59 = vpop.f32.mrb[35].mxu0  ;;  %v989_v61 = vmax.f32 %v869_v54, 0.0 }
 0x1d5   : > { %v864_v60 = vadd.f32 %v3075_v52, %v863_v59  ;;  %v987_v63 = vmax.f32 %v861_v56, 0.0 }
 0x1d6   : > { %v990_v62 = vmax.f32 %v872_v58, 0.0 }
 0x1d7   : > { %v988_v0 = vmax.f32 %v864_v60, 0.0 }
 0x1d8   : > { %v1020_v1 = vpack.c.bf16 %v990_v62, %v989_v61 }
 0x1d9   : > { %v1019_v2 = vpack.c.bf16 %v988_v0, %v987_v63  ;;  %v2529_v3 = vpop.f32.mrb[36].mxu0 }
 0x1da   : > { %v885_v4 = vadd.f32 %v2529_v3, %v3075_v52  ;;  %v876_v5 = vpop.f32.mrb[37].mxu0 }
 0x1db   : > { %v877_v6 = vadd.f32 %v3075_v52, %v876_v5  ;;  %v2530_v7 = vpop.f32.mrb[38].mxu0  ;;  %2563 = vmatprep.mubr.msk.bf16.mxu1 %vm777_vm2, %v1019_v2 }
 0x1dc   : > { %v888_v8 = vadd.f32 %v2530_v7, %v3075_v52  ;;  %v879_v9 = vpop.f32.mrb[39].mxu0  ;;  %2564 = vmatmul.mubr.msk.bf16.vlgmr.msra.gmra.mrb[20].mxu1 %vm777_vm2, %v1020_v1  ;;  %v993_v11 = vmax.f32 %v885_v4, 0.0 }
 0x1dd   : > { %v880_v10 = vadd.f32 %v3075_v52, %v879_v9  ;;  %v991_v13 = vmax.f32 %v877_v6, 0.0 }
 0x1de   : > { %v994_v12 = vmax.f32 %v888_v8, 0.0 }
 0x1df   : > { %v992_v14 = vmax.f32 %v880_v10, 0.0 }
 0x1e0   : > { %v1022_v15 = vpack.c.bf16 %v994_v12, %v993_v11 }
 0x1e1   : > { %v1021_v16 = vpack.c.bf16 %v992_v14, %v991_v13  ;;  %v2533_v17 = vpop.f32.mrb[40].mxu0 }
 0x1e2   : > { %v901_v18 = vadd.f32 %v2533_v17, %v3075_v52  ;;  %v892_v19 = vpop.f32.mrb[41].mxu0 }
 0x1e3   : > { %v893_v20 = vadd.f32 %v3075_v52, %v892_v19  ;;  %v2534_v21 = vpop.f32.mrb[42].mxu0  ;;  %2567 = vmatprep.mubr.msk.bf16.mxu1 %vm777_vm2, %v1021_v16 }
 0x1e4   : > { %v904_v22 = vadd.f32 %v2534_v21, %v3075_v52  ;;  %v895_v23 = vpop.f32.mrb[43].mxu0  ;;  %2568 = vmatmul.mubr.msk.bf16.gmra.mrb[24].mxu1 %vm777_vm2, %v1022_v15  ;;  %v997_v25 = vmax.f32 %v901_v18, 0.0 }
 0x1e5   : > { %v896_v24 = vadd.f32 %v3075_v52, %v895_v23  ;;  %v995_v27 = vmax.f32 %v893_v20, 0.0 }
 0x1e6   : > { %v998_v26 = vmax.f32 %v904_v22, 0.0 }
 0x1e7   : > { %v996_v28 = vmax.f32 %v896_v24, 0.0 }
 0x1e8   : > { %v1024_v29 = vpack.c.bf16 %v998_v26, %v997_v25 }
 0x1e9   : > { %v1023_v31 = vpack.c.bf16 %v996_v28, %v995_v27  ;;  %v2537_v32 = vpop.f32.mrb[0].mxu1 }
 0x1ea   : > { %v917_v33 = vadd.f32 %v2537_v32, %v3075_v52  ;;  %v908_v34 = vpop.f32.mrb[1].mxu1 }
 0x1eb   : > { %v909_v35 = vadd.f32 %v3075_v52, %v908_v34  ;;  %v2538_v36 = vpop.f32.mrb[2].mxu1  ;;  %2571 = vmatprep.mubr.msk.bf16.mxu1 %vm777_vm2, %v1023_v31 }
 0x1ec   : > { %v920_v37 = vadd.f32 %v2538_v36, %v3075_v52  ;;  %v911_v38 = vpop.f32.mrb[3].mxu1  ;;  %2572 = vmatmul.mubr.msk.bf16.gmra.mrb[28].mxu1 %vm777_vm2, %v1024_v29  ;;  %v1001_v40 = vmax.f32 %v917_v33, 0.0 }
 0x1ed   : > { %v912_v39 = vadd.f32 %v3075_v52, %v911_v38  ;;  %v999_v42 = vmax.f32 %v909_v35, 0.0 }
 0x1ee   : > { %v1002_v41 = vmax.f32 %v920_v37, 0.0 }
 0x1ef   : > { %v1000_v43 = vmax.f32 %v912_v39, 0.0  ;;  %v2726_v39 = vld [vmem:[%s3585_s5 + $0x18] sm:$0xff]  }
 0x1f0   : > { %v1026_v44 = vpack.c.bf16 %v1002_v41, %v1001_v40  ;;  %2601 = vmatprep.subr.bf16.mxu0 %v2726_v39  ;;  %v2728_v40 = vld [vmem:[%s3587_s7 + $0x8] sm:$0xff]   ;;  %v3137_v41 = vld [vmem:[%s3584_s4 + $0x1] ss:$0 sm:$0xff] }
 0x1f1   : > { %v1025_v45 = vpack.c.bf16 %v1000_v43, %v999_v42  ;;  %v2541_v46 = vpop.f32.mrb[4].mxu1  ;;  %2602 = vmatpush3.bf16.msra.mxu0 %v2726_v39 }
 0x1f2   : > { %v933_v47 = vadd.f32 %v2541_v46, %v3075_v52  ;;  %v924_v48 = vpop.f32.mrb[5].mxu1 }
 0x1f3   : > { %v925_v49 = vadd.f32 %v3075_v52, %v924_v48  ;;  %v2542_v50 = vpop.f32.mrb[6].mxu1  ;;  %2575 = vmatprep.mubr.msk.bf16.mxu1 %vm777_vm2, %v1025_v45 }
 0x1f4   : > { %v936_v30 = vadd.f32 %v2542_v50, %v3075_v52  ;;  %v927_v51 = vpop.f32.mrb[7].mxu1  ;;  %2576 = vmatmul.mubr.msk.bf16.gmra.mrb[32].mxu1 %vm777_vm2, %v1026_v44  ;;  %v1005_v54 = vmax.f32 %v933_v47, 0.0 }
 0x1f5   : > { %v928_v53 = vadd.f32 %v3075_v52, %v927_v51  ;;  %v1003_v56 = vmax.f32 %v925_v49, 0.0 }
 0x1f6   : > { %v1006_v55 = vmax.f32 %v936_v30, 0.0 }
 0x1f7   : > { %v1004_v57 = vmax.f32 %v928_v53, 0.0 }
 0x1f8   : > { %v1028_v58 = vpack.c.bf16 %v1006_v55, %v1005_v54 }
 0x1f9   : > { %v1027_v59 = vpack.c.bf16 %v1004_v57, %v1003_v56  ;;  %v2545_v60 = vpop.f32.mrb[8].mxu1 }
 0x1fa   : > { %v949_v61 = vadd.f32 %v2545_v60, %v3075_v52  ;;  %v940_v62 = vpop.f32.mrb[9].mxu1 }
 0x1fb   : > { %v941_v63 = vadd.f32 %v3075_v52, %v940_v62  ;;  %v2546_v0 = vpop.f32.mrb[10].mxu1  ;;  %2579 = vmatprep.mubr.msk.bf16.mxu1 %vm777_vm2, %v1027_v59 }
 0x1fc   : > { %v952_v1 = vadd.f32 %v2546_v0, %v3075_v52  ;;  %v943_v2 = vpop.f32.mrb[11].mxu1  ;;  %2580 = vmatmul.mubr.msk.bf16.gmra.mrb[36].mxu1 %vm777_vm2, %v1028_v58  ;;  %v1009_v4 = vmax.f32 %v949_v61, 0.0 }
 0x1fd   : > { %v944_v3 = vadd.f32 %v3075_v52, %v943_v2  ;;  %v1007_v6 = vmax.f32 %v941_v63, 0.0 }
 0x1fe   : > { %v1010_v5 = vmax.f32 %v952_v1, 0.0 }
 0x1ff   : > { %v1008_v7 = vmax.f32 %v944_v3, 0.0 }
 0x200   : > { %v1030_v8 = vpack.c.bf16 %v1010_v5, %v1009_v4 }
 0x201   : > { %v1029_v9 = vpack.c.bf16 %v1008_v7, %v1007_v6  ;;  %v2549_v10 = vpop.f32.mrb[12].mxu1 }
 0x202   : > { %v965_v11 = vadd.f32 %v2549_v10, %v3075_v52  ;;  %v956_v12 = vpop.f32.mrb[13].mxu1 }
 0x203   : > { %v957_v13 = vadd.f32 %v3075_v52, %v956_v12  ;;  %v2550_v14 = vpop.f32.mrb[14].mxu1  ;;  %2583 = vmatprep.mubr.msk.bf16.mxu1 %vm777_vm2, %v1029_v9 }
 0x204   : > { %v968_v15 = vadd.f32 %v2550_v14, %v3075_v52  ;;  %v959_v16 = vpop.f32.mrb[15].mxu1  ;;  %2584 = vmatmul.mubr.msk.bf16.gmra.mrb[40].mxu1 %vm777_vm2, %v1030_v8  ;;  %v1013_v18 = vmax.f32 %v965_v11, 0.0 }
 0x205   : > { %v960_v17 = vadd.f32 %v3075_v52, %v959_v16  ;;  %v1011_v20 = vmax.f32 %v957_v13, 0.0 }
 0x206   : > { %v1014_v19 = vmax.f32 %v968_v15, 0.0 }
 0x207   : > { %v1012_v21 = vmax.f32 %v960_v17, 0.0 }
 0x208   : > { %v1032_v22 = vpack.c.bf16 %v1014_v19, %v1013_v18 }
 0x209   : > { %v1031_v23 = vpack.c.bf16 %v1012_v21, %v1011_v20  ;;  %v2553_v24 = vpop.f32.mrb[16].mxu1 }
 0x20a   : > { %v981_v25 = vadd.f32 %v2553_v24, %v3075_v52  ;;  %v972_v26 = vpop.f32.mrb[17].mxu1 }
 0x20b   : > { %v973_v27 = vadd.f32 %v3075_v52, %v972_v26  ;;  %v2554_v28 = vpop.f32.mrb[18].mxu1  ;;  %2587 = vmatprep.mubr.msk.bf16.mxu1 %vm777_vm2, %v1031_v23 }
 0x20c   : > { %v984_v29 = vadd.f32 %v2554_v28, %v3075_v52  ;;  %v975_v31 = vpop.f32.mrb[19].mxu1  ;;  %2588 = vmatmul.mubr.msk.bf16.gmra.mrb[44].mxu1 %vm777_vm2, %v1032_v22  ;;  %v1017_v33 = vmax.f32 %v981_v25, 0.0 }
 0x20d   : > { %v976_v32 = vadd.f32 %v3075_v52, %v975_v31  ;;  %v1015_v35 = vmax.f32 %v973_v27, 0.0  ;;  %v2727_v52 = vld [vmem:[%s3587_s7] sm:$0xff]  }
 0x20e   : > { %v1018_v34 = vmax.f32 %v984_v29, 0.0  ;;  %2635 = vmatprep.subr.bf16.mxu1 %v2727_v52 }
 0x20f   : > { %v1016_v36 = vmax.f32 %v976_v32, 0.0  ;;  %2636 = vmatpush3.bf16.msra.mxu1 %v2727_v52 }
 0x210   : > { %v1034_v37 = vpack.c.bf16 %v1018_v34, %v1017_v33  ;;  %2637 = vmatprep.subr.bf16.mxu1 %v2728_v40 }
 0x211   : > { %v1033_v38 = vpack.c.bf16 %v1016_v36, %v1015_v35 }
 0x213   : > { %2591 = vmatprep.mubr.msk.bf16.mxu1 %vm777_vm2, %v1033_v38  ;;  %2638 = vmatpush3.bf16.msra.mxu1 %v2728_v40 }
 0x214   : > { %2592 = vmatmul.mubr.msk.bf16.gmra.mrb[48].mxu1 %vm777_vm2, %v1034_v37 }
 0x2af   : > { %v2565_v42 = vpop.f32.mrb[20].mxu1 }
 0x2b0   : > { %v1158_v43 = vpop.f32.mrb[21].mxu1  ;;  %v3143_v46 = vadd.f32 %v2565_v42, %v3137_v41 }
 0x2b1   : > { %v3140_v44 = vadd.f32 %v3137_v41, %v1158_v43  ;;  %v2566_v45 = vpop.f32.mrb[22].mxu1 }
 0x2b2   : > { %v3146_v47 = vadd.f32 %v2566_v45, %v3137_v41  ;;  %v1161_v48 = vpop.f32.mrb[23].mxu1  ;;  %v1287_v53 = vmax.f32 %v3143_v46, 0.0 }
 0x2b3   : > { %v3149_v49 = vadd.f32 %v3137_v41, %v1161_v48  ;;  %v1285_v30 = vmax.f32 %v3140_v44, 0.0 }
 0x2b4   : > { %v1288_v50 = vmax.f32 %v3146_v47, 0.0 }
 0x2b5   : > { %v1286_v51 = vmax.f32 %v3149_v49, 0.0 }
 0x2b6   : > { %v1318_v56 = vpack.c.bf16 %v1288_v50, %v1287_v53 }
 0x2b7   : > { %v1317_v54 = vpack.c.bf16 %v1286_v51, %v1285_v30  ;;  %v2569_v55 = vpop.f32.mrb[24].mxu1 }
 0x2b8   : > { %v1174_v57 = vpop.f32.mrb[25].mxu1  ;;  %v3168_v60 = vadd.f32 %v2569_v55, %v3137_v41 }
 0x2b9   : > { %v3164_v58 = vadd.f32 %v3137_v41, %v1174_v57  ;;  %v2570_v59 = vpop.f32.mrb[26].mxu1  ;;  %2603 = vmatprep.mubr.msk.bf16.mxu0 %vm777_vm2, %v1317_v54 }
 0x2ba   : > { %v3171_v61 = vadd.f32 %v2570_v59, %v3137_v41  ;;  %v1177_v62 = vpop.f32.mrb[27].mxu1  ;;  %2604 = vmatmul.mubr.msk.bf16.vlgmr.msra.gmra.mrb[44].mxu0 %vm777_vm2, %v1318_v56  ;;  %v1291_v3 = vmax.f32 %v3168_v60, 0.0 }
 0x2bb   : > { %v3175_v63 = vadd.f32 %v3137_v41, %v1177_v62  ;;  %v1289_v1 = vmax.f32 %v3164_v58, 0.0 }
 0x2bc   : > { %v1292_v0 = vmax.f32 %v3171_v61, 0.0 }
 0x2bd   : > { %v1290_v2 = vmax.f32 %v3175_v63, 0.0 }
 0x2be   : > { %v1320_v6 = vpack.c.bf16 %v1292_v0, %v1291_v3 }
 0x2bf   : > { %v1319_v4 = vpack.c.bf16 %v1290_v2, %v1289_v1  ;;  %v2573_v5 = vpop.f32.mrb[28].mxu1 }
 0x2c0   : > { %v1190_v7 = vpop.f32.mrb[29].mxu1  ;;  %v3194_v10 = vadd.f32 %v2573_v5, %v3137_v41 }
 0x2c1   : > { %v3190_v8 = vadd.f32 %v3137_v41, %v1190_v7  ;;  %v2574_v9 = vpop.f32.mrb[30].mxu1  ;;  %2607 = vmatprep.mubr.msk.bf16.mxu0 %vm777_vm2, %v1319_v4 }
 0x2c2   : > { %v3197_v11 = vadd.f32 %v2574_v9, %v3137_v41  ;;  %v1193_v12 = vpop.f32.mrb[31].mxu1  ;;  %2608 = vmatmul.mubr.msk.bf16.gmra.mrb[48].mxu0 %vm777_vm2, %v1320_v6  ;;  %v3611_v17 = vmax.f32 %v3194_v10, 0.0 }
 0x2c3   : > { %v3201_v13 = vadd.f32 %v3137_v41, %v1193_v12  ;;  %v3613_v15 = vmax.f32 %v3190_v8, 0.0 }
 0x2c4   : > { %v3610_v14 = vmax.f32 %v3197_v11, 0.0 }
 0x2c5   : > { %v3612_v16 = vmax.f32 %v3201_v13, 0.0 }
 0x2c6   : > { %v1322_v20 = vpack.c.bf16 %v3610_v14, %v3611_v17 }
 0x2c7   : > { %v1321_v18 = vpack.c.bf16 %v3612_v16, %v3613_v15  ;;  %v2577_v19 = vpop.f32.mrb[32].mxu1 }
 0x2c8   : > { %v1206_v21 = vpop.f32.mrb[33].mxu1  ;;  %v3220_v24 = vadd.f32 %v2577_v19, %v3137_v41 }
 0x2c9   : > { %v3216_v22 = vadd.f32 %v3137_v41, %v1206_v21  ;;  %v2578_v23 = vpop.f32.mrb[34].mxu1  ;;  %2611 = vmatprep.mubr.msk.bf16.mxu0 %vm777_vm2, %v1321_v18 }
 0x2ca   : > { %v3223_v25 = vadd.f32 %v2578_v23, %v3137_v41  ;;  %v1209_v26 = vpop.f32.mrb[35].mxu1  ;;  %2612 = vmatmul.mubr.msk.bf16.gmra.mrb[52].mxu0 %vm777_vm2, %v1322_v20  ;;  %v3607_v32 = vmax.f32 %v3220_v24, 0.0 }
 0x2cb   : > { %v3227_v27 = vadd.f32 %v3137_v41, %v1209_v26  ;;  %v3609_v29 = vmax.f32 %v3216_v22, 0.0 }
 0x2cc   : > { %v3606_v28 = vmax.f32 %v3223_v25, 0.0 }
 0x2cd   : > { %v3608_v31 = vmax.f32 %v3227_v27, 0.0 }
 0x2ce   : > { %v1324_v35 = vpack.c.bf16 %v3606_v28, %v3607_v32 }
 0x2cf   : > { %v1323_v33 = vpack.c.bf16 %v3608_v31, %v3609_v29  ;;  %v2581_v34 = vpop.f32.mrb[36].mxu1 }
 0x2d0   : > { %v1222_v36 = vpop.f32.mrb[37].mxu1  ;;  %v3246_v39 = vadd.f32 %v2581_v34, %v3137_v41 }
 0x2d1   : > { %v3242_v37 = vadd.f32 %v3137_v41, %v1222_v36  ;;  %v2582_v38 = vpop.f32.mrb[38].mxu1  ;;  %2615 = vmatprep.mubr.msk.bf16.mxu0 %vm777_vm2, %v1323_v33 }
 0x2d2   : > { %v3249_v52 = vadd.f32 %v2582_v38, %v3137_v41  ;;  %v1225_v40 = vpop.f32.mrb[39].mxu1  ;;  %2616 = vmatmul.mubr.msk.bf16.gmra.mrb[56].mxu0 %vm777_vm2, %v1324_v35  ;;  %v3605_v54 = vmax.f32 %v3246_v39, 0.0 }
 0x2d3   : > { %v3253_v42 = vadd.f32 %v3137_v41, %v1225_v40  ;;  %v3603_v45 = vmax.f32 %v3242_v37, 0.0 }
 0x2d4   : > { %v3604_v43 = vmax.f32 %v3249_v52, 0.0 }
 0x2d5   : > { %v3602_v48 = vmax.f32 %v3253_v42, 0.0 }
 0x2d6   : > { %v1326_v57 = vpack.c.bf16 %v3604_v43, %v3605_v54 }
 0x2d7   : > { %v1325_v55 = vpack.c.bf16 %v3602_v48, %v3603_v45  ;;  %v2585_v56 = vpop.f32.mrb[40].mxu1 }
 0x2d8   : > { %v1238_v59 = vpop.f32.mrb[41].mxu1  ;;  %v3272_v5 = vadd.f32 %v2585_v56, %v3137_v41 }
 0x2d9   : > { %v3268_v62 = vadd.f32 %v3137_v41, %v1238_v59  ;;  %v2586_v4 = vpop.f32.mrb[42].mxu1  ;;  %2619 = vmatprep.mubr.msk.bf16.mxu0 %vm777_vm2, %v1325_v55 }
 0x2da   : > { %v3275_v6 = vadd.f32 %v2586_v4, %v3137_v41  ;;  %v1241_v7 = vpop.f32.mrb[43].mxu1  ;;  %2620 = vmatmul.mubr.msk.bf16.gmra.mrb[60].mxu0 %vm777_vm2, %v1326_v57  ;;  %v3601_v20 = vmax.f32 %v3272_v5, 0.0 }
 0x2db   : > { %v3279_v9 = vadd.f32 %v3137_v41, %v1241_v7  ;;  %v3599_v18 = vmax.f32 %v3268_v62, 0.0 }
 0x2dc   : > { %v3600_v12 = vmax.f32 %v3275_v6, 0.0 }
 0x2dd   : > { %v3590_v19 = vmax.f32 %v3279_v9, 0.0 }
 0x2de   : > { %v1328_v26 = vpack.c.bf16 %v3600_v12, %v3601_v20 }
 0x2df   : > { %v1327_v21 = vpack.c.bf16 %v3590_v19, %v3599_v18  ;;  %v2589_v23 = vpop.f32.mrb[44].mxu1 }
 0x2e0   : > { %v1254_v33 = vpop.f32.mrb[45].mxu1  ;;  %v3298_v36 = vadd.f32 %v2589_v23, %v3137_v41 }
 0x2e1   : > { %v3294_v34 = vadd.f32 %v3137_v41, %v1254_v33  ;;  %v2590_v35 = vpop.f32.mrb[46].mxu1  ;;  %2623 = vmatprep.mubr.msk.bf16.mxu0 %vm777_vm2, %v1327_v21 }
 0x2e2   : > { %v3301_v38 = vadd.f32 %v2590_v35, %v3137_v41  ;;  %v1257_v40 = vpop.f32.mrb[47].mxu1  ;;  %2624 = vmatmul.mubr.msk.bf16.gmra.mrb[64].mxu0 %vm777_vm2, %v1328_v26  ;;  %v3594_v4 = vmax.f32 %v3298_v36, 0.0 }
 0x2e3   : > { %v3305_v55 = vadd.f32 %v3137_v41, %v1257_v40  ;;  %v3592_v57 = vmax.f32 %v3294_v34, 0.0 }
 0x2e4   : > { %v3593_v56 = vmax.f32 %v3301_v38, 0.0 }
 0x2e5   : > { %v3591_v59 = vmax.f32 %v3305_v55, 0.0 }
 0x2e6   : > { %v1330_v23 = vpack.c.bf16 %v3593_v56, %v3594_v4 }
 0x2e7   : > { %v1329_v7 = vpack.c.bf16 %v3591_v59, %v3592_v57  ;;  %v2593_v21 = vpop.f32.mrb[48].mxu1 }
 0x2e8   : > { %v1270_v26 = vpop.f32.mrb[49].mxu1  ;;  %v3324_v40 = vadd.f32 %v2593_v21, %v3137_v41 }
 0x2e9   : > { %v3320_v33 = vadd.f32 %v3137_v41, %v1270_v26  ;;  %v2594_v35 = vpop.f32.mrb[50].mxu1  ;;  %2627 = vmatprep.mubr.msk.bf16.mxu0 %vm777_vm2, %v1329_v7 }
 0x2ea   : > { %v3327_v19 = vadd.f32 %v2594_v35, %v3137_v41  ;;  %v1273_v59 = vpop.f32.mrb[51].mxu1  ;;  %2628 = vmatmul.mubr.msk.bf16.gmra.mrb[68].mxu0 %vm777_vm2, %v1330_v23  ;;  %v3598_v7 = vmax.f32 %v3324_v40, 0.0  ;;  %v3356_v35 = vld [vmem:[%s3586_s6] ss:$0 sm:$0xff] }
 0x2eb   : > { %v3331_v57 = vadd.f32 %v3137_v41, %v1273_v59  ;;  %v3596_v26 = vmax.f32 %v3320_v33, 0.0  ;;  %v2729_v41 = vld [vmem:[%s3587_s7 + $0x10] sm:$0xff]   ;;  %v2730_v59 = vld [vmem:[%s3587_s7 + $0x18] sm:$0xff]  }
 0x2ec   : > { %v3597_v56 = vmax.f32 %v3327_v19, 0.0  ;;  %2639 = vmatprep.subr.bf16.mxu1 %v2729_v41 }
 0x2ed   : > { %v3595_v4 = vmax.f32 %v3331_v57, 0.0  ;;  %2640 = vmatpush3.bf16.msra.mxu1 %v2729_v41 }
 0x2ee   : > { %v1332_v23 = vpack.c.bf16 %v3597_v56, %v3598_v7  ;;  %2641 = vmatprep.subr.bf16.mxu1 %v2730_v59 }
 0x2ef   : > { %v1331_v21 = vpack.c.bf16 %v3595_v4, %v3596_v26 }
 0x2f1   : > { %2631 = vmatprep.mubr.msk.bf16.mxu0 %vm777_vm2, %v1331_v21  ;;  %2642 = vmatpush3.bf16.msra.mxu1 %v2730_v59 }
 0x2f2   : > { %2632 = vmatmul.mubr.msk.bf16.gmra.mrb[72].mxu0 %vm777_vm2, %v1332_v23 }
 0x38d   : > { %v2605_v21 = vpop.f32.mrb[44].mxu0 }
 0x38e   : > { %v1463_v23 = vadd.f32 %v2605_v21, %v3356_v35  ;;  %v1454_v4 = vpop.f32.mrb[45].mxu0 }
 0x38f   : > { %v1455_v26 = vadd.f32 %v3356_v35, %v1454_v4  ;;  %v2606_v56 = vpop.f32.mrb[46].mxu0 }
 0x390   : > { %v2313_v7 = vclamps-f32 %v1463_v23, 30.0  ;;  %v1466_v41 = vadd.f32 %v2606_v56, %v3356_v35  ;;  %v1457_v18 = vpop.f32.mrb[47].mxu0 }
 0x391   : > { %v2311_v12 = vclamps-f32 %v1455_v26, 30.0  ;;  %v1458_v20 = vadd.f32 %v3356_v35, %v1457_v18 }
 0x392   : > { %v1647_v59 = vsub.f32 0.0, %v2313_v7  ;;  %v2314_v48 = vclamps-f32 %v1466_v41, 30.0 }
 0x393   : > { %v1645_v45 = vsub.f32 0.0, %v2311_v12  ;;  %v2312_v43 = vclamps-f32 %v1458_v20, 30.0 }
 0x394   : > { %v1681_v54 = vmul.f32 1.442695, %v1647_v59  ;;  %v1648_v28 = vsub.f32 0.0, %v2314_v48 }
 0x395   : > { %v1677_v32 = vmul.f32 1.442695, %v1645_v45  ;;  %v1646_v31 = vsub.f32 0.0, %v2312_v43  ;;  %v2609_v21 = vpop.f32.mrb[48].mxu0 }
 0x396   : > { %2731 = vpow2.f32 %v1681_v54  ;;  %v1683_v29 = vmul.f32 1.442695, %v1648_v28  ;;  %v1479_v4 = vadd.f32 %v2609_v21, %v3356_v35  ;;  %v1470_v23 = vpop.f32.mrb[49].mxu0 }
 0x397   : > { %2733 = vpow2.f32 %v1677_v32  ;;  %v1679_v56 = vmul.f32 1.442695, %v1646_v31  ;;  %v1471_v26 = vadd.f32 %v3356_v35, %v1470_v23  ;;  %v2610_v14 = vpop.f32.mrb[50].mxu0 }
 0x398   : > { %2735 = vpow2.f32 %v1683_v29  ;;  %v2317_v18 = vclamps-f32 %v1479_v4, 30.0  ;;  %v1482_v12 = vadd.f32 %v2610_v14, %v3356_v35  ;;  %v1473_v20 = vpop.f32.mrb[51].mxu0 }
 0x399   : > { %2737 = vpow2.f32 %v1679_v56  ;;  %v2315_v48 = vclamps-f32 %v1471_v26, 30.0  ;;  %v1474_v43 = vadd.f32 %v3356_v35, %v1473_v20 }
 0x39a   : > { %v1651_v45 = vsub.f32 0.0, %v2317_v18  ;;  %v2318_v54 = vclamps-f32 %v1482_v12, 30.0 }
 0x39b   : > { %v1649_v28 = vsub.f32 0.0, %v2315_v48  ;;  %v2316_v7 = vclamps-f32 %v1474_v43, 30.0 }
 0x39c   : > { %v1689_v41 = vmul.f32 1.442695, %v1651_v45  ;;  %v1652_v59 = vsub.f32 0.0, %v2318_v54 }
 0x39d   : > { %v1685_v32 = vmul.f32 1.442695, %v1649_v28  ;;  %v1650_v31 = vsub.f32 0.0, %v2316_v7  ;;  %v2613_v21 = vpop.f32.mrb[52].mxu0 }
 0x39e   : > { %2739 = vpow2.f32 %v1689_v41  ;;  %v1691_v23 = vmul.f32 1.442695, %v1652_v59  ;;  %v1495_v29 = vadd.f32 %v2613_v21, %v3356_v35  ;;  %v1486_v4 = vpop.f32.mrb[53].mxu0 }
 0x39f   : > { %2741 = vpow2.f32 %v1685_v32  ;;  %v1687_v14 = vmul.f32 1.442695, %v1650_v31  ;;  %v1487_v56 = vadd.f32 %v3356_v35, %v1486_v4  ;;  %v2614_v26 = vpop.f32.mrb[54].mxu0 }
 0x3a0   : > { %v2732_v20 = vpop.eup %2731  ;;  %2743 = vpow2.f32 %v1691_v23  ;;  %v2321_v18 = vclamps-f32 %v1495_v29, 30.0  ;;  %v1498_v12 = vadd.f32 %v2614_v26, %v3356_v35  ;;  %v1489_v48 = vpop.f32.mrb[55].mxu0 }
 0x3a1   : > { %v2734_v43 = vpop.eup %2733  ;;  %v1743_v45 = vadd.f32 1.0, %v2732_v20  ;;  %2745 = vpow2.f32 %v1687_v14  ;;  %v2319_v54 = vclamps-f32 %v1487_v56, 30.0  ;;  %v1490_v28 = vadd.f32 %v3356_v35, %v1489_v48 }
 0x3a2   : > { %v2736_v7 = vpop.eup %2735  ;;  %v1741_v41 = vadd.f32 1.0, %v2734_v43  ;;  %v1655_v59 = vsub.f32 0.0, %v2321_v18  ;;  %v2322_v32 = vclamps-f32 %v1498_v12, 30.0 }
 0x3a3   : > { %v2738_v31 = vpop.eup %2737  ;;  %2747 = vrcp.f32 %v1743_v45  ;;  %v1744_v21 = vadd.f32 1.0, %v2736_v7  ;;  %v1653_v4 = vsub.f32 0.0, %v2319_v54  ;;  %v2320_v17 = vclamps-f32 %v1490_v28, 30.0 }
 0x3a4   : > { %2749 = vrcp.f32 %v1741_v41  ;;  %v1742_v23 = vadd.f32 1.0, %v2738_v31  ;;  %v1697_v29 = vmul.f32 1.442695, %v1655_v59  ;;  %v1656_v26 = vsub.f32 0.0, %v2322_v32 }
 0x3a5   : > { %2751 = vrcp.f32 %v1744_v21  ;;  %v1693_v16 = vmul.f32 1.442695, %v1653_v4  ;;  %v1654_v20 = vsub.f32 0.0, %v2320_v17  ;;  %v2617_v14 = vpop.f32.mrb[56].mxu0 }
 0x3a6   : > { %2753 = vrcp.f32 %v1742_v23  ;;  %v1699_v56 = vmul.f32 1.442695, %v1656_v26  ;;  %v1511_v48 = vadd.f32 %v2617_v14, %v3356_v35  ;;  %v1502_v43 = vpop.f32.mrb[57].mxu0 }
 0x3a7   : > { %2755 = vpow2.f32 %v1697_v29  ;;  %v1695_v18 = vmul.f32 1.442695, %v1654_v20  ;;  %v1503_v12 = vadd.f32 %v3356_v35, %v1502_v43  ;;  %v2618_v45 = vpop.f32.mrb[58].mxu0 }
 0x3a8   : > { %v2740_v54 = vpop.eup %2739  ;;  %2757 = vpow2.f32 %v1693_v16  ;;  %v2325_v28 = vclamps-f32 %v1511_v48, 30.0  ;;  %v1514_v7 = vadd.f32 %v2618_v45, %v3356_v35  ;;  %v1505_v41 = vpop.f32.mrb[59].mxu0 }
 0x3a9   : > { %v2742_v59 = vpop.eup %2741  ;;  %v1747_v32 = vadd.f32 1.0, %v2740_v54  ;;  %2759 = vpow2.f32 %v1699_v56  ;;  %v2323_v17 = vclamps-f32 %v1503_v12, 30.0  ;;  %v1506_v31 = vadd.f32 %v3356_v35, %v1505_v41 }
 0x3aa   : > { %v2744_v21 = vpop.eup %2743  ;;  %v1745_v4 = vadd.f32 1.0, %v2742_v59  ;;  %2761 = vpow2.f32 %v1695_v18  ;;  %v1659_v23 = vsub.f32 0.0, %v2325_v28  ;;  %v2326_v29 = vclamps-f32 %v1514_v7, 30.0 }
 0x3ab   : > { %v2746_v26 = vpop.eup %2745  ;;  %2763 = vrcp.f32 %v1747_v32  ;;  %v1748_v20 = vadd.f32 1.0, %v2744_v21  ;;  %v1657_v14 = vsub.f32 0.0, %v2323_v17  ;;  %v2324_v16 = vclamps-f32 %v1506_v31, 30.0 }
 0x3ac   : > { %2765 = vrcp.f32 %v1745_v4  ;;  %v1746_v48 = vadd.f32 1.0, %v2746_v26  ;;  %v1705_v43 = vmul.f32 1.442695, %v1659_v23  ;;  %v1660_v45 = vsub.f32 0.0, %v2326_v29 }
 0x3ad   : > { %v2748_v15 = vpop.eup %2747  ;;  %2767 = vrcp.f32 %v1748_v20  ;;  %v1701_v56 = vmul.f32 1.442695, %v1657_v14  ;;  %v1658_v12 = vsub.f32 0.0, %v2324_v16  ;;  %v2621_v54 = vpop.f32.mrb[60].mxu0 }
 0x3ae   : > { %v2750_v41 = vpop.eup %2749  ;;  %v1807_v18 = vmul.f32 %v2748_v15, %v1287_v53  ;;  %2769 = vrcp.f32 %v1746_v48  ;;  %v1707_v28 = vmul.f32 1.442695, %v1660_v45  ;;  %v1527_v7 = vadd.f32 %v2621_v54, %v3356_v35  ;;  %v1518_v59 = vpop.f32.mrb[61].mxu0 }
 0x3af   : > { %v2752_v32 = vpop.eup %2751  ;;  %2771 = vpow2.f32 %v1705_v43  ;;  %v1703_v17 = vmul.f32 1.442695, %v1658_v12  ;;  %v1519_v31 = vadd.f32 %v3356_v35, %v1518_v59  ;;  %v2622_v21 = vpop.f32.mrb[62].mxu0  ;;  %v1805_v4 = vmul.f32 %v2750_v41, %v1285_v30 }
 0x3b0   : > { %v2754_v23 = vpop.eup %2753  ;;  %v1808_v29 = vmul.f32 %v2752_v32, %v1288_v50  ;;  %2773 = vpow2.f32 %v1701_v56  ;;  %v2329_v46 = vclamps-f32 %v1527_v7, 30.0  ;;  %v1530_v53 = vadd.f32 %v2622_v21, %v3356_v35  ;;  %v1521_v15 = vpop.f32.mrb[63].mxu0 }
 0x3b1   : > { %v2756_v26 = vpop.eup %2755  ;;  %2775 = vpow2.f32 %v1707_v28  ;;  %v2327_v20 = vclamps-f32 %v1519_v31, 30.0  ;;  %v1522_v14 = vadd.f32 %v3356_v35, %v1521_v15  ;;  %v1806_v16 = vmul.f32 %v2754_v23, %v1286_v51 }
 0x3b2   : > { %v2758_v48 = vpop.eup %2757  ;;  %v1751_v44 = vadd.f32 1.0, %v2756_v26  ;;  %2777 = vpow2.f32 %v1703_v17  ;;  %v1663_v30 = vsub.f32 0.0, %v2329_v46  ;;  %v2330_v43 = vclamps-f32 %v1530_v53, 30.0 }
 0x3b3   : > { %v2760_v47 = vpop.eup %2759  ;;  %v1749_v50 = vadd.f32 1.0, %v2758_v48  ;;  %v1661_v45 = vsub.f32 0.0, %v2327_v20  ;;  %v2328_v56 = vclamps-f32 %v1522_v14, 30.0  ;;  %v1837_v12 = vpack.c.bf16 %v1806_v16, %v1805_v4 }
 0x3b4   : > { %v2762_v54 = vpop.eup %2761  ;;  %2779 = vrcp.f32 %v1751_v44  ;;  %v1752_v41 = vadd.f32 1.0, %v2760_v47  ;;  %v1713_v28 = vmul.f32 1.442695, %v1663_v30  ;;  %v1664_v7 = vsub.f32 0.0, %v2330_v43 }
 0x3b5   : > { %v2764_v59 = vpop.eup %2763  ;;  %2781 = vrcp.f32 %v1749_v50  ;;  %v1750_v32 = vadd.f32 1.0, %v2762_v54  ;;  %v1709_v49 = vmul.f32 1.442695, %v1661_v45  ;;  %v1662_v51 = vsub.f32 0.0, %v2328_v56  ;;  %v2625_v31 = vpop.f32.mrb[64].mxu0  ;;  %2643 = vmatprep.mubr.msk.bf16.mxu1 %vm777_vm2, %v1837_v12 }
 0x3b6   : > { %v2766_v17 = vpop.eup %2765  ;;  %2783 = vrcp.f32 %v1752_v41  ;;  %v1715_v21 = vmul.f32 1.442695, %v1664_v7  ;;  %v1543_v23 = vadd.f32 %v2625_v31, %v3356_v35  ;;  %v1534_v46 = vpop.f32.mrb[65].mxu0  ;;  %v1838_v4 = vpack.c.bf16 %v1808_v29, %v1807_v18 }
 0x3b7   : > { %v2768_v53 = vpop.eup %2767  ;;  %2785 = vrcp.f32 %v1750_v32  ;;  %v1711_v15 = vmul.f32 1.442695, %v1662_v51  ;;  %v1535_v26 = vadd.f32 %v3356_v35, %v1534_v46  ;;  %v2626_v20 = vpop.f32.mrb[66].mxu0  ;;  %v1809_v14 = vmul.f32 %v2766_v17, %v1289_v1 }
 0x3b8   : > { %v2770_v16 = vpop.eup %2769  ;;  %2787 = vpow2.f32 %v1713_v28  ;;  %v2333_v48 = vclamps-f32 %v1543_v23, 30.0  ;;  %2644 = vmatmul.mubr.msk.bf16.vlgmr.msra.gmra.mrb[52].mxu1 %vm777_vm2, %v1838_v4  ;;  %v1546_v44 = vadd.f32 %v2626_v20, %v3356_v35  ;;  %v1537_v30 = vpop.f32.mrb[67].mxu0  ;;  %v1811_v18 = vmul.f32 %v2764_v59, %v1291_v3 }
 0x3b9   : > { %v2772_v29 = vpop.eup %2771  ;;  %2789 = vpow2.f32 %v1709_v49  ;;  %v2331_v43 = vclamps-f32 %v1535_v26, 30.0  ;;  %v1538_v47 = vadd.f32 %v3356_v35, %v1537_v30  ;;  %v1810_v58 = vmul.f32 %v2770_v16, %v1290_v2 }
 0x3ba   : > { %v2774_v1 = vpop.eup %2773  ;;  %v1755_v50 = vadd.f32 1.0, %v2772_v29  ;;  %2791 = vpow2.f32 %v1715_v21  ;;  %v1667_v45 = vsub.f32 0.0, %v2333_v48  ;;  %v2334_v56 = vclamps-f32 %v1546_v44, 30.0 }
 0x3bb   : > { %v2776_v12 = vpop.eup %2775  ;;  %v1753_v54 = vadd.f32 1.0, %v2774_v1  ;;  %2793 = vpow2.f32 %v1711_v15  ;;  %v1665_v41 = vsub.f32 0.0, %v2331_v43  ;;  %v2332_v28 = vclamps-f32 %v1538_v47, 30.0 }
 0x3bc   : > { %v2778_v60 = vpop.eup %2777  ;;  %2795 = vrcp.f32 %v1755_v50  ;;  %v1756_v3 = vadd.f32 1.0, %v2776_v12  ;;  %v1721_v7 = vmul.f32 1.442695, %v1667_v45  ;;  %v1668_v59 = vsub.f32 0.0, %v2334_v56 }
 0x3bd   : > { %2797 = vrcp.f32 %v1753_v54  ;;  %v1754_v32 = vadd.f32 1.0, %v2778_v60  ;;  %v1717_v49 = vmul.f32 1.442695, %v1665_v41  ;;  %v1666_v63 = vsub.f32 0.0, %v2332_v28  ;;  %v2629_v2 = vpop.f32.mrb[68].mxu0 }
 0x3be   : > { %v2780_v51 = vpop.eup %2779  ;;  %2799 = vrcp.f32 %v1756_v3  ;;  %v1723_v31 = vmul.f32 1.442695, %v1668_v59  ;;  %v1559_v17 = vadd.f32 %v2629_v2, %v3356_v35  ;;  %v1839_v21 = vpack.c.bf16 %v1810_v58, %v1809_v14  ;;  %v1550_v23 = vpop.f32.mrb[69].mxu0 }
 0x3bf   : > { %v2782_v46 = vpop.eup %2781  ;;  %2801 = vrcp.f32 %v1754_v32  ;;  %v1719_v4 = vmul.f32 1.442695, %v1666_v63  ;;  %v1551_v15 = vadd.f32 %v3356_v35, %v1550_v23  ;;  %v1812_v26 = vmul.f32 %v2768_v53, %v1292_v0  ;;  %v2630_v20 = vpop.f32.mrb[70].mxu0 }
 0x3c0   : > { %v2784_v16 = vpop.eup %2783  ;;  %2803 = vpow2.f32 %v1721_v7  ;;  %v2337_v48 = vclamps-f32 %v1559_v17, 30.0  ;;  %2647 = vmatprep.mubr.msk.bf16.mxu1 %vm777_vm2, %v1839_v21  ;;  %v1562_v44 = vadd.f32 %v2630_v20, %v3356_v35  ;;  %v1553_v30 = vpop.f32.mrb[71].mxu0  ;;  %v3614_v14 = vmax.f32 %v3190_v8, 0.0 }
 0x3c1   : > { %v2786_v43 = vpop.eup %2785  ;;  %2805 = vpow2.f32 %v1717_v49  ;;  %v2335_v47 = vclamps-f32 %v1551_v15, 30.0  ;;  %v1840_v58 = vpack.c.bf16 %v1812_v26, %v1811_v18  ;;  %v1554_v1 = vadd.f32 %v3356_v35, %v1553_v30 }
 0x3c2   : > { %v1813_v29 = vmul.f32 %v2782_v46, %v3614_v14  ;;  %v2788_v61 = vpop.eup %2787  ;;  %2807 = vpow2.f32 %v1723_v31  ;;  %v1671_v0 = vsub.f32 0.0, %v2337_v48  ;;  %v2338_v53 = vclamps-f32 %v1562_v44, 30.0 }
 0x3c3   : > { %v3615_v50 = vmax.f32 %v3201_v13, 0.0  ;;  %v2790_v56 = vpop.eup %2789  ;;  %v1759_v12 = vadd.f32 1.0, %v2788_v61  ;;  %2809 = vpow2.f32 %v1719_v4  ;;  %v1669_v54 = vsub.f32 0.0, %v2335_v47  ;;  %2648 = vmatmul.mubr.msk.bf16.gmra.mrb[56].mxu1 %vm777_vm2, %v1840_v58 }
 0x3c4   : > { %v2336_v8 = vclamps-f32 %v1554_v1, 30.0  ;;  %v2792_v41 = vpop.eup %2791  ;;  %v1757_v28 = vadd.f32 1.0, %v2790_v56  ;;  %v1729_v60 = vmul.f32 1.442695, %v1671_v0  ;;  %v1672_v18 = vsub.f32 0.0, %v2338_v53 }
 0x3c5   : > { %v1814_v45 = vmul.f32 %v2786_v43, %v3615_v50  ;;  %v2794_v7 = vpop.eup %2793  ;;  %2811 = vrcp.f32 %v1759_v12  ;;  %v1760_v59 = vadd.f32 1.0, %v2792_v41  ;;  %v1725_v32 = vmul.f32 1.442695, %v1669_v54  ;;  %v2633_v63 = vpop.f32.mrb[72].mxu0 }
 0x3c6   : > { %v1670_v49 = vsub.f32 0.0, %v2336_v8  ;;  %v2796_v13 = vpop.eup %2795  ;;  %2813 = vrcp.f32 %v1757_v28  ;;  %v1758_v2 = vadd.f32 1.0, %v2794_v7  ;;  %v1731_v31 = vmul.f32 1.442695, %v1672_v18  ;;  %v1566_v21 = vpop.f32.mrb[73].mxu0 }
 0x3c7   : > { %v1841_v3 = vpack.c.bf16 %v1814_v45, %v1813_v29  ;;  %v1575_v17 = vadd.f32 %v2633_v63, %v3356_v35  ;;  %v2798_v23 = vpop.eup %2797  ;;  %2815 = vrcp.f32 %v1760_v59  ;;  %v1567_v4 = vadd.f32 %v3356_v35, %v1566_v21  ;;  %v2634_v20 = vpop.f32.mrb[74].mxu0 }
 0x3c8   : > { %v1727_v46 = vmul.f32 1.442695, %v1670_v49  ;;  %v3616_v15 = vmax.f32 %v3194_v10, 0.0  ;;  %v2800_v48 = vpop.eup %2799  ;;  %2817 = vrcp.f32 %v1758_v2  ;;  %v3617_v30 = vmax.f32 %v3197_v11, 0.0  ;;  %v1569_v43 = vpop.f32.mrb[75].mxu0 }
 0x3c9   : > { %2651 = vmatprep.mubr.msk.bf16.mxu1 %vm777_vm2, %v1841_v3  ;;  %v2341_v44 = vclamps-f32 %v1575_v17, 30.0  ;;  %v1578_v29 = vadd.f32 %v2634_v20, %v3356_v35  ;;  %v2802_v47 = vpop.eup %2801  ;;  %2819 = vpow2.f32 %v1729_v60  ;;  %v2339_v58 = vclamps-f32 %v1567_v4, 30.0 }
 0x3ca   : > { %v1815_v26 = vmul.f32 %v2780_v51, %v3616_v15  ;;  %v1816_v14 = vmul.f32 %v2784_v16, %v3617_v30  ;;  %v1570_v1 = vadd.f32 %v3356_v35, %v1569_v43  ;;  %v2804_v61 = vpop.eup %2803  ;;  %2821 = vpow2.f32 %v1725_v32 }
 0x3cb   : > { %v1675_v0 = vsub.f32 0.0, %v2341_v44  ;;  %v2342_v51 = vclamps-f32 %v1578_v29, 30.0  ;;  %v2806_v53 = vpop.eup %2805  ;;  %v1763_v50 = vadd.f32 1.0, %v2804_v61  ;;  %2823 = vpow2.f32 %v1731_v31 }
 0x3cc   : > { %v1842_v10 = vpack.c.bf16 %v1816_v14, %v1815_v26  ;;  %v1673_v45 = vsub.f32 0.0, %v2339_v58  ;;  %v2340_v56 = vclamps-f32 %v1570_v1, 30.0  ;;  %v2808_v11 = vpop.eup %2807  ;;  %v1761_v16 = vadd.f32 1.0, %v2806_v53 }
 0x3cd   : > { %2825 = vpow2.f32 %v1727_v46  ;;  %v1676_v12 = vsub.f32 0.0, %v2342_v51  ;;  %v3618_v54 = vmax.f32 %v3216_v22, 0.0  ;;  %v2810_v35 = vpop.eup %2809  ;;  %v1764_v41 = vadd.f32 1.0, %v2808_v11 }
 0x3ce   : > { %2652 = vmatmul.mubr.msk.bf16.gmra.mrb[60].mxu1 %vm777_vm2, %v1842_v10  ;;  %2827 = vrcp.f32 %v1763_v50  ;;  %v1737_v28 = vmul.f32 1.442695, %v1675_v0  ;;  %v1674_v60 = vsub.f32 0.0, %v2340_v56  ;;  %v1762_v18 = vadd.f32 1.0, %v2810_v35 }
 0x3cf   : > { %v1817_v8 = vmul.f32 %v2798_v23, %v3618_v54  ;;  %2829 = vrcp.f32 %v1761_v16  ;;  %v1733_v3 = vmul.f32 1.442695, %v1673_v45  ;;  %v3619_v7 = vmax.f32 %v3227_v27, 0.0  ;;  %v2812_v32 = vpop.eup %2811 }
 0x3d0   : > { %2831 = vrcp.f32 %v1764_v41  ;;  %v1739_v49 = vmul.f32 1.442695, %v1676_v12  ;;  %v3620_v63 = vmax.f32 %v3220_v24, 0.0  ;;  %v3621_v22 = vmax.f32 %v3223_v25, 0.0  ;;  %v2814_v17 = vpop.eup %2813 }
 0x3d1   : > { %v1818_v59 = vmul.f32 %v2802_v47, %v3619_v7  ;;  %2833 = vrcp.f32 %v1762_v18  ;;  %v1735_v21 = vmul.f32 1.442695, %v1674_v60  ;;  %v2816_v46 = vpop.eup %2815  ;;  %v3622_v27 = vmax.f32 %v3246_v39, 0.0 }
 0x3d2   : > { %v1819_v2 = vmul.f32 %v2796_v13, %v3620_v63  ;;  %v1820_v31 = vmul.f32 %v2800_v48, %v3621_v22  ;;  %2835 = vpow2.f32 %v1737_v28  ;;  %v2818_v15 = vpop.eup %2817  ;;  %v3623_v24 = vmax.f32 %v3249_v52, 0.0 }
 0x3d3   : > { %v1843_v23 = vpack.c.bf16 %v1818_v59, %v1817_v8  ;;  %2837 = vpow2.f32 %v1733_v3  ;;  %v1823_v26 = vmul.f32 %v2812_v32, %v3622_v27  ;;  %v2820_v20 = vpop.eup %2819  ;;  %v3624_v25 = vmax.f32 %v3242_v37, 0.0 }
 0x3d4   : > { %v1844_v4 = vpack.c.bf16 %v1820_v31, %v1819_v2  ;;  %v1824_v13 = vmul.f32 %v2816_v46, %v3623_v24  ;;  %2839 = vpow2.f32 %v1739_v49  ;;  %v3625_v44 = vmax.f32 %v3253_v42, 0.0  ;;  %v2822_v14 = vpop.eup %2821 }
 0x3d5   : > { %2655 = vmatprep.mubr.msk.bf16.mxu1 %vm777_vm2, %v1843_v23  ;;  %v1821_v48 = vmul.f32 %v2814_v17, %v3624_v25  ;;  %v1767_v29 = vadd.f32 1.0, %v2820_v20  ;;  %2841 = vpow2.f32 %v1735_v21  ;;  %v2824_v47 = vpop.eup %2823  ;;  %v1765_v39 = vadd.f32 1.0, %v2822_v14 }
 0x3d6   : > { %v1822_v30 = vmul.f32 %v2818_v15, %v3625_v44  ;;  %2656 = vmatmul.mubr.msk.bf16.gmra.mrb[64].mxu1 %vm777_vm2, %v1844_v4  ;;  %v1846_v43 = vpack.c.bf16 %v1824_v13, %v1823_v26  ;;  %v1768_v52 = vadd.f32 1.0, %v2824_v47  ;;  %v3626_v51 = vmax.f32 %v3272_v5, 0.0 }
 0x3d7   : > { %v2826_v1 = vpop.eup %2825  ;;  %2843 = vrcp.f32 %v1767_v29  ;;  %v3627_v50 = vmax.f32 %v3275_v6, 0.0  ;;  %v3628_v11 = vmax.f32 %v3268_v62, 0.0  ;;  %v3629_v12 = vmax.f32 %v3279_v9, 0.0 }
 0x3d8   : > { %v1845_v58 = vpack.c.bf16 %v1822_v30, %v1821_v48  ;;  %v2828_v61 = vpop.eup %2827  ;;  %2845 = vrcp.f32 %v1765_v39  ;;  %v1766_v0 = vadd.f32 1.0, %v2826_v1  ;;  %v3630_v32 = vmax.f32 %v3298_v36, 0.0 }
 0x3d9   : > { %v2830_v37 = vpop.eup %2829  ;;  %2847 = vrcp.f32 %v1768_v52  ;;  %v1827_v53 = vmul.f32 %v2828_v61, %v3626_v51  ;;  %v3631_v63 = vmax.f32 %v3301_v38, 0.0  ;;  %v3632_v22 = vmax.f32 %v3294_v34, 0.0 }
 0x3da   : > { %2659 = vmatprep.mubr.msk.bf16.mxu1 %vm777_vm2, %v1845_v58  ;;  %v2832_v42 = vpop.eup %2831  ;;  %2849 = vrcp.f32 %v1766_v0  ;;  %v1825_v16 = vmul.f32 %v2830_v37, %v3628_v11  ;;  %v3633_v17 = vmax.f32 %v3305_v55, 0.0  ;;  %v3634_v38 = vmax.f32 %v3324_v40, 0.0 }
 0x3db   : > { %v2834_v10 = vpop.eup %2833  ;;  %v1828_v45 = vmul.f32 %v2832_v42, %v3627_v50  ;;  %v3635_v24 = vmax.f32 %v3327_v19, 0.0  ;;  %v3636_v34 = vmax.f32 %v3320_v33, 0.0  ;;  %v3637_v20 = vmax.f32 %v3331_v57, 0.0  ;;  %v3474_v19 = vld [vmem:[%s3588_s8] ss:$0 sm:$0xff] }
 0x3dc   : > { %v2836_v56 = vpop.eup %2835  ;;  %v1826_v54 = vmul.f32 %v2834_v10, %v3629_v12 }
 0x3dd   : > { %v2838_v8 = vpop.eup %2837  ;;  %v1771_v35 = vadd.f32 1.0, %v2836_v56  ;;  %v1848_v41 = vpack.c.bf16 %v1828_v45, %v1827_v53 }
 0x3de   : > { %2660 = vmatmul.mubr.msk.bf16.gmra.mrb[68].mxu1 %vm777_vm2, %v1846_v43  ;;  %v2840_v28 = vpop.eup %2839  ;;  %v1769_v60 = vadd.f32 1.0, %v2838_v8  ;;  %v1847_v18 = vpack.c.bf16 %v1826_v54, %v1825_v16 }
 0x3df   : > { %v2842_v5 = vpop.eup %2841  ;;  %2851 = vrcp.f32 %v1771_v35  ;;  %v1772_v3 = vadd.f32 1.0, %v2840_v28 }
 0x3e0   : > { %2853 = vrcp.f32 %v1769_v60  ;;  %v1770_v6 = vadd.f32 1.0, %v2842_v5  ;;  %2663 = vmatprep.mubr.msk.bf16.mxu1 %vm777_vm2, %v1847_v18 }
 0x3e1   : > { %v2844_v62 = vpop.eup %2843  ;;  %2855 = vrcp.f32 %v1772_v3 }
 0x3e2   : > { %v2846_v7 = vpop.eup %2845  ;;  %2857 = vrcp.f32 %v1770_v6  ;;  %v1831_v49 = vmul.f32 %v2844_v62, %v3630_v32 }
 0x3e3   : > { %v2848_v9 = vpop.eup %2847  ;;  %v1829_v31 = vmul.f32 %v2846_v7, %v3632_v22 }
 0x3e4   : > { %v2850_v59 = vpop.eup %2849  ;;  %v1832_v2 = vmul.f32 %v2848_v9, %v3631_v63 }
 0x3e5   : > { %v1830_v21 = vmul.f32 %v2850_v59, %v3633_v17 }
 0x3e6   : > { %2664 = vmatmul.mubr.msk.bf16.gmra.mrb[72].mxu1 %vm777_vm2, %v1848_v41  ;;  %v1850_v23 = vpack.c.bf16 %v1832_v2, %v1831_v49 }
 0x3e7   : > { %v1849_v46 = vpack.c.bf16 %v1830_v21, %v1829_v31 }
 0x3e9   : > { %v2852_v4 = vpop.eup %2851  ;;  %2667 = vmatprep.mubr.msk.bf16.mxu1 %vm777_vm2, %v1849_v46 }
 0x3ea   : > { %v2854_v15 = vpop.eup %2853  ;;  %v1835_v26 = vmul.f32 %v2852_v4, %v3634_v38 }
 0x3eb   : > { %v2856_v36 = vpop.eup %2855  ;;  %v1833_v55 = vmul.f32 %v2854_v15, %v3636_v34 }
 0x3ec   : > { %v2858_v27 = vpop.eup %2857  ;;  %v1836_v13 = vmul.f32 %v2856_v36, %v3635_v24 }
 0x3ed   : > { %v1834_v25 = vmul.f32 %v2858_v27, %v3637_v20 }
 0x3ee   : > { %2668 = vmatmul.mubr.msk.bf16.gmra.mrb[76].mxu1 %vm777_vm2, %v1850_v23  ;;  %v1852_v48 = vpack.c.bf16 %v1836_v13, %v1835_v26 }
 0x3ef   : > { %v1851_v44 = vpack.c.bf16 %v1834_v25, %v1833_v55 }
 0x3f1   : > { %2671 = vmatprep.mubr.msk.bf16.mxu1 %vm777_vm2, %v1851_v44 }
 0x3f6   : > { %2672 = vmatmul.mubr.msk.bf16.gmra.mrb[80].mxu1 %vm777_vm2, %v1852_v48 }
 0x48b   : > { %v2645_v57 = vpop.f32.mrb[52].mxu1 }
 0x48c   : > { %v1983_v33 = vadd.f32 %v2645_v57, %v3474_v19  ;;  %v1974_v40 = vpop.f32.mrb[53].mxu1 }
 0x48d   : > { %v1975_v30 = vadd.f32 %v3474_v19, %v1974_v40  ;;  %v2646_v14 = vpop.f32.mrb[54].mxu1 }
 0x48e   : > { %2104 = vst.msk [vmem:[%s3479_s18 + $0x10] sm:$0xff] %vm2101_vm3, %v1983_v33  ;;  %v1986_v29 = vadd.f32 %v2646_v14, %v3474_v19  ;;  %v1977_v43 = vpop.f32.mrb[55].mxu1 }
 0x48f   : > { %2102 = vst.msk [vmem:[%s3479_s18] sm:$0xff] %vm2101_vm3, %v1975_v30  ;;  %v1978_v47 = vadd.f32 %v3474_v19, %v1977_v43 }
 0x490   : > { %2105 = vst.msk [vmem:[%s3479_s18 + $0x18] sm:$0xff] %vm2101_vm3, %v1986_v29 }
 0x491   : > { %2103 = vst.msk [vmem:[%s3479_s18 + $0x8] sm:$0xff] %vm2101_vm3, %v1978_v47 }
 0x496   : > { %v2649_v39 = vpop.f32.mrb[56].mxu1 }
 0x497   : > { %v1999_v58 = vadd.f32 %v2649_v39, %v3474_v19  ;;  %v1990_v1 = vpop.f32.mrb[57].mxu1 }
 0x498   : > { %v1991_v52 = vadd.f32 %v3474_v19, %v1990_v1  ;;  %v2650_v61 = vpop.f32.mrb[58].mxu1 }
 0x499   : > { %2108 = vst.msk [vmem:[%s3479_s18 + $0x30] sm:$0xff] %vm2101_vm3, %v1999_v58  ;;  %v2002_v0 = vadd.f32 %v2650_v61, %v3474_v19  ;;  %v1993_v37 = vpop.f32.mrb[59].mxu1 }
 0x49a   : > { %2106 = vst.msk [vmem:[%s3479_s18 + $0x20] sm:$0xff] %vm2101_vm3, %v1991_v52  ;;  %v1994_v42 = vadd.f32 %v3474_v19, %v1993_v37 }
 0x49b   : > { %2109 = vst.msk [vmem:[%s3479_s18 + $0x38] sm:$0xff] %vm2101_vm3, %v2002_v0 }
 0x49c   : > { %2107 = vst.msk [vmem:[%s3479_s18 + $0x28] sm:$0xff] %vm2101_vm3, %v1994_v42 }
 0x4a1   : > { %v2653_v10 = vpop.f32.mrb[60].mxu1 }
 0x4a2   : > { %v2015_v51 = vadd.f32 %v2653_v10, %v3474_v19  ;;  %v2006_v53 = vpop.f32.mrb[61].mxu1 }
 0x4a3   : > { %v2007_v50 = vadd.f32 %v3474_v19, %v2006_v53  ;;  %v2654_v45 = vpop.f32.mrb[62].mxu1 }
 0x4a4   : > { %2112 = vst.msk [vmem:[%s3479_s18 + $0x50] sm:$0xff] %vm2101_vm3, %v2015_v51  ;;  %v2018_v56 = vadd.f32 %v2654_v45, %v3474_v19  ;;  %v2009_v11 = vpop.f32.mrb[63].mxu1 }
 0x4a5   : > { %2110 = vst.msk [vmem:[%s3479_s18 + $0x40] sm:$0xff] %vm2101_vm3, %v2007_v50  ;;  %v2010_v16 = vadd.f32 %v3474_v19, %v2009_v11 }
 0x4a6   : > { %2113 = vst.msk [vmem:[%s3479_s18 + $0x58] sm:$0xff] %vm2101_vm3, %v2018_v56 }
 0x4a7   : > { %2111 = vst.msk [vmem:[%s3479_s18 + $0x48] sm:$0xff] %vm2101_vm3, %v2010_v16 }
 0x4a9   : > { %v2657_v12 = vpop.f32.mrb[64].mxu1 }
 0x4aa   : > { %v2031_v54 = vadd.f32 %v2657_v12, %v3474_v19  ;;  %v2022_v8 = vpop.f32.mrb[65].mxu1 }
 0x4ab   : > { %v2023_v35 = vadd.f32 %v3474_v19, %v2022_v8  ;;  %v2658_v41 = vpop.f32.mrb[66].mxu1 }
 0x4ac   : > { %2116 = vst.msk [vmem:[%s3479_s18 + $0x70] sm:$0xff] %vm2101_vm3, %v2031_v54  ;;  %v2034_v28 = vadd.f32 %v2658_v41, %v3474_v19  ;;  %v2025_v60 = vpop.f32.mrb[67].mxu1 }
 0x4ad   : > { %2114 = vst.msk [vmem:[%s3479_s18 + $0x60] sm:$0xff] %vm2101_vm3, %v2023_v35  ;;  %v2026_v18 = vadd.f32 %v3474_v19, %v2025_v60 }
 0x4ae   : > { %2117 = vst.msk [vmem:[%s3479_s18 + $0x78] sm:$0xff] %vm2101_vm3, %v2034_v28 }
 0x4af   : > { %2115 = vst.msk [vmem:[%s3479_s18 + $0x68] sm:$0xff] %vm2101_vm3, %v2026_v18 }
 0x4b1   : > { %v2661_v5 = vpop.f32.mrb[68].mxu1 }
 0x4b2   : > { %v2047_v3 = vadd.f32 %v2661_v5, %v3474_v19  ;;  %v2038_v6 = vpop.f32.mrb[69].mxu1 }
 0x4b3   : > { %v2039_v62 = vadd.f32 %v3474_v19, %v2038_v6  ;;  %v2662_v7 = vpop.f32.mrb[70].mxu1 }
 0x4b4   : > { %2120 = vst.msk [vmem:[%s3479_s18 + $0x90] sm:$0xff] %vm2101_vm3, %v2047_v3  ;;  %v2050_v9 = vadd.f32 %v2662_v7, %v3474_v19  ;;  %v2041_v59 = vpop.f32.mrb[71].mxu1 }
 0x4b5   : > { %2118 = vst.msk [vmem:[%s3479_s18 + $0x80] sm:$0xff] %vm2101_vm3, %v2039_v62  ;;  %v2042_v32 = vadd.f32 %v3474_v19, %v2041_v59 }
 0x4b6   : > { %2121 = vst.msk [vmem:[%s3479_s18 + $0x98] sm:$0xff] %vm2101_vm3, %v2050_v9 }
 0x4b7   : > { %2119 = vst.msk [vmem:[%s3479_s18 + $0x88] sm:$0xff] %vm2101_vm3, %v2042_v32 }
 0x4b9   : > { %v2665_v49 = vpop.f32.mrb[72].mxu1 }
 0x4ba   : > { %v2063_v63 = vadd.f32 %v2665_v49, %v3474_v19  ;;  %v2054_v2 = vpop.f32.mrb[73].mxu1 }
 0x4bb   : > { %v2055_v22 = vadd.f32 %v3474_v19, %v2054_v2  ;;  %v2666_v31 = vpop.f32.mrb[74].mxu1 }
 0x4bc   : > { %2124 = vst.msk [vmem:[%s3479_s18 + $0xb0] sm:$0xff] %vm2101_vm3, %v2063_v63  ;;  %v2066_v17 = vadd.f32 %v2666_v31, %v3474_v19  ;;  %v2057_v21 = vpop.f32.mrb[75].mxu1 }
 0x4bd   : > { %2122 = vst.msk [vmem:[%s3479_s18 + $0xa0] sm:$0xff] %vm2101_vm3, %v2055_v22  ;;  %v2058_v23 = vadd.f32 %v3474_v19, %v2057_v21 }
 0x4be   : > { %2125 = vst.msk [vmem:[%s3479_s18 + $0xb8] sm:$0xff] %vm2101_vm3, %v2066_v17 }
 0x4bf   : > { %2123 = vst.msk [vmem:[%s3479_s18 + $0xa8] sm:$0xff] %vm2101_vm3, %v2058_v23 }
 0x4c1   : > { %v2669_v46 = vpop.f32.mrb[76].mxu1 }
 0x4c2   : > { %v2079_v4 = vadd.f32 %v2669_v46, %v3474_v19  ;;  %v2070_v15 = vpop.f32.mrb[77].mxu1 }
 0x4c3   : > { %v2071_v36 = vadd.f32 %v3474_v19, %v2070_v15  ;;  %v2670_v27 = vpop.f32.mrb[78].mxu1 }
 0x4c4   : > { %2128 = vst.msk [vmem:[%s3479_s18 + $0xd0] sm:$0xff] %vm2101_vm3, %v2079_v4  ;;  %v2082_v38 = vadd.f32 %v2670_v27, %v3474_v19  ;;  %v2073_v26 = vpop.f32.mrb[79].mxu1 }
 0x4c5   : > { %2126 = vst.msk [vmem:[%s3479_s18 + $0xc0] sm:$0xff] %vm2101_vm3, %v2071_v36  ;;  %v2074_v24 = vadd.f32 %v3474_v19, %v2073_v26 }
 0x4c6   : > { %2129 = vst.msk [vmem:[%s3479_s18 + $0xd8] sm:$0xff] %vm2101_vm3, %v2082_v38 }
 0x4c7   : > { %2127 = vst.msk [vmem:[%s3479_s18 + $0xc8] sm:$0xff] %vm2101_vm3, %v2074_v24 }
 0x4c9   : > { %v2673_v13 = vpop.f32.mrb[80].mxu1 }
 0x4ca   : > { %v2095_v34 = vadd.f32 %v2673_v13, %v3474_v19  ;;  %v2086_v55 = vpop.f32.mrb[81].mxu1 }
 0x4cb   : > { %v2087_v20 = vadd.f32 %v3474_v19, %v2086_v55  ;;  %v2674_v25 = vpop.f32.mrb[82].mxu1 }
 0x4cc   : > { %2132 = vst.msk [vmem:[%s3479_s18 + $0xf0] sm:$0xff] %vm2101_vm3, %v2095_v34  ;;  %v2098_v48 = vadd.f32 %v2674_v25, %v3474_v19  ;;  %v2089_v44 = vpop.f32.mrb[83].mxu1 }
 0x4cd   : > { %2130 = vst.msk [vmem:[%s3479_s18 + $0xe0] sm:$0xff] %vm2101_vm3, %v2087_v20  ;;  %v2090_v57 = vadd.f32 %v3474_v19, %v2089_v44 }
 0x4ce   : > { %2133 = vst.msk [vmem:[%s3479_s18 + $0xf8] sm:$0xff] %vm2101_vm3, %v2098_v48 }
 0x4cf   : > { %2131 = vst.msk [vmem:[%s3479_s18 + $0xe8] sm:$0xff] %vm2101_vm3, %v2090_v57 }
 0x4d0 PF: > { %s19_s30 = sadd.s32 1, %s2865_s30  }
 0x4d1   : > { %p16_p4 = scmp.ge.s32.totalorder %s19_s30, 4  }
 0x4d3   :  { %18 = sbr.rel (!%p16_p4) target bundleno = 1 (0x1), region = 88 }

// kernel: tpu_custom_call.1
= control target key start
LH: loop header
LB: loop body
LE: loop exit
PB: predicated region body
PF: predicated region fallthrough
CT: control target
= control target key end

     0   :  { %s2917_s30 = smov 0   ;;  %s3580_s0 = inlined_call_operand.vmem [shape: bf16[512,100], index: 0, kind: input, shape index: {}]   ;;  %s3581_s1 = inlined_call_operand.vmem [shape: bf16[100,64], index: 1, kind: input, shape index: {}]   ;;  %s3582_s2 = inlined_call_operand.vmem [shape: f32[1,64], index: 2, kind: input, shape index: {}]   ;;  %s3583_s3 = inlined_call_operand.vmem [shape: bf16[2,64,64], index: 3, kind: input, shape index: {}]   ;;  %s3584_s4 = inlined_call_operand.vmem [shape: f32[2,1,64], index: 4, kind: input, shape index: {}]   ;;  %s3585_s5 = inlined_call_operand.vmem [shape: bf16[64,64], index: 5, kind: input, shape index: {}]   ;;  %s3586_s6 = inlined_call_operand.vmem [shape: f32[1,64], index: 6, kind: input, shape index: {}]   ;;  %s3587_s7 = inlined_call_operand.vmem [shape: bf16[64,8], index: 7, kind: input, shape index: {}]   ;;  %s3588_s8 = inlined_call_operand.vmem [shape: f32[1,8], index: 8, kind: input, shape index: {}]   ;;  %s3589_s9 = inlined_call_operand.vmem [shape: f32[512,8], index: 9, kind: output, shape index: {}]  }
   0x1 LB: > { %s2190_s10 = sadd.s32 4294967295, %s2865_s30   ;;  %p2194_p0 = scmp.ge.s32.totalorder %s2865_s30, 1  ;;  %s2865_s30 = sphi %s2917_s30, %s19_s30  }
   0x2   : > { %p288_p1 = scmp.lt.s32.totalorder %s2865_s30, 3 }
   0x4   : > { %p289_p2 = pnand %p2194_p0, %p288_p1 }
   0x5   : > { %v2692_v0 = vld [vmem:[%s3581_s1] sm:$0xff] (!%p289_p2)   ;;  %v2693_v1 = vld [vmem:[%s3581_s1 + $0x8] sm:$0xff] (!%p289_p2)   ;;  %s2195_s15 = sshll.u32 (!%p289_p2), %s2190_s10, 5  ;;  %v2694_v2 = vld [vmem:[%s3581_s1 + $0x10] sm:$0xff] (!%p289_p2)   ;;  %vm508_vm0 = vcmask (!%p289_p2), 818176   ;;  %vm557_vm1 = vcmask (!%p289_p2), 1041408  }
   0x6   : > { %292 = sbr.rel (%p289_p2) target bundleno = 1232 (0x4d0), region = 56  ;;  %2469 = vmatprep.subr.bf16.mxu0 (!%p289_p2), %v2692_v0  ;;  %p325_p3 = scmp.lt.s32.totalorder (!%p289_p2), %s2195_s15, 63  ;;  %v2695_v3 = vld [vmem:[%s3581_s1 + $0x18] sm:$0xff] (!%p289_p2)   ;;  %v2715_v4 = vld [vmem:[%s3583_s3] sm:$0xff] (!%p289_p2)   ;;  %v2697_v7 = vld [vmem:[%s3581_s1 + $0x28] sm:$0xff] (!%p289_p2)   ;;  %vm777_vm2 = vcmask (!%p289_p2), 523264  }
   0x7   : > { %2470 = vmatpush3.bf16.msra.mxu0 (!%p289_p2), %v2692_v0  ;;  %2675 = vmatprep.subr.bf16.mxu1 (!%p289_p2), %v2715_v4  ;;  %v2696_v6 = vld [vmem:[%s3581_s1 + $0x20] sm:$0xff] (!%p289_p2)   ;;  %v2698_v8 = vld [vmem:[%s3581_s1 + $0x30] ss:$0 sps:$4 sm:$0x33] (!%p289_p2)   ;;  %v2716_v11 = vld [vmem:[%s3583_s3 + $0x8] sm:$0xff] (!%p289_p2)   ;;  %vm2101_vm3 = vcmask (!%p289_p2), 64512  }
   0x8   : > { %2471 = vmatprep.subr.bf16.mxu0 (!%p289_p2), %v2693_v1  ;;  %2679 = vmatpush3.bf16.msra.mxu1 (!%p289_p2), %v2715_v4  ;;  %v559_v9 = vsel (!%p289_p2), %vm557_vm1, %v2698_v8, 0  ;;  %v2717_v13 = vld [vmem:[%s3583_s3 + $0x10] sm:$0xff] (!%p289_p2)   ;;  %v2718_v14 = vld [vmem:[%s3583_s3 + $0x18] sm:$0xff] (!%p289_p2)   ;;  %v2719_v28 = vld [vmem:[%s3583_s3 + $0x20] sm:$0xff] (!%p289_p2)  }
   0x9   : > { %2676 = vmatprep.subr.bf16.mxu1 (!%p289_p2), %v2716_v11  ;;  %v3004_v30 = vld [vmem:[%s3582_s2] ss:$0 sm:$0xff] (!%p289_p2) }
   0xb   : > { %2472 = vmatpush3.bf16.msra.mxu0 (!%p289_p2), %v2693_v1 }
   0xc   : > { %2473 = vmatprep.subr.bf16.mxu0 (!%p289_p2), %v2694_v2  ;;  %2680 = vmatpush3.bf16.msra.mxu1 (!%p289_p2), %v2716_v11 }
   0xd   : > { %s3639_s15 = smov (!%p325_p3, %s2195_s15), 63  ;;  %2677 = vmatprep.subr.bf16.mxu1 %v2717_v13 }
   0xe   : > { %s2196_s20 = sshll.u32 %s3639_s15, 2  ;;  %s2198_s12 = sshll.u32 %s3639_s15, 3 }
   0xf   : > { %s2943_s23 = scalar_lea.vmem %s3580_s0, %s2196_s20  ;;  %2474 = vmatpush3.bf16.msra.mxu0 %v2694_v2  ;;  %s3479_s18 = scalar_lea.vmem %s3589_s9, %s2198_s12 }
  0x10   : > { %v2699_v5 = vld [vmem:[%s2943_s23] sm:$0xff]   ;;  %2475 = vmatprep.subr.bf16.mxu0 %v2695_v3  ;;  %v2700_v10 = vld [vmem:[%s2943_s23 + $0x8] sm:$0xff]   ;;  %v2701_v12 = vld [vmem:[%s2943_s23 + $0x10] sm:$0xff]   ;;  %2681 = vmatpush3.bf16.msra.mxu1 %v2717_v13 }
  0x11   : > { %2483 = vmatprep.mubr.msk.bf16.mxu0 %vm508_vm0, %v2699_v5  ;;  %v2702_v15 = vld [vmem:[%s2943_s23 + $0x18] sm:$0xff]   ;;  %2678 = vmatprep.subr.bf16.mxu1 %v2718_v14  ;;  %v2703_v16 = vld [vmem:[%s2943_s23 + $0x20] sm:$0xff]   ;;  %v2704_v17 = vld [vmem:[%s2943_s23 + $0x28] sm:$0xff]  }
  0x12   : > { %v2705_v18 = vld [vmem:[%s2943_s23 + $0x30] sm:$0xff]   ;;  %v2706_v19 = vld [vmem:[%s2943_s23 + $0x38] sm:$0xff]   ;;  %v2707_v20 = vld [vmem:[%s2943_s23 + $0x40] sm:$0xff]  }
  0x13   : > { %2476 = vmatpush3.bf16.msra.mxu0 %v2695_v3  ;;  %v2708_v21 = vld [vmem:[%s2943_s23 + $0x48] sm:$0xff]   ;;  %v2709_v22 = vld [vmem:[%s2943_s23 + $0x50] sm:$0xff]   ;;  %v2710_v23 = vld [vmem:[%s2943_s23 + $0x58] sm:$0xff]  }
  0x14   : > { %2477 = vmatprep.subr.bf16.mxu0 %v2696_v6  ;;  %2682 = vmatpush3.bf16.msra.mxu1 %v2718_v14  ;;  %v2711_v24 = vld [vmem:[%s2943_s23 + $0x60] sm:$0xff]   ;;  %v2712_v25 = vld [vmem:[%s2943_s23 + $0x68] sm:$0xff]   ;;  %v2713_v26 = vld [vmem:[%s2943_s23 + $0x70] sm:$0xff]  }
  0x15   : > { %v2714_v27 = vld [vmem:[%s2943_s23 + $0x78] sm:$0xff]   ;;  %2555 = vmatprep.subr.bf16.mxu1 %v2719_v28 }
  0x17   : > { %2478 = vmatpush3.bf16.msra.mxu0 %v2696_v6  ;;  %v2720_v6 = vld [vmem:[%s3583_s3 + $0x28] sm:$0xff]  }
  0x18   : > { %2479 = vmatprep.subr.bf16.mxu0 %v2697_v7 }
  0x1b   : > { %2480 = vmatpush3.bf16.msra.mxu0 %v2697_v7 }
  0x1c   : > { %2683 = vmatprep.subr.msk.bf16.mxu0 %vm557_vm1, %v2698_v8 }
  0x1f   : > { %2482 = vmatpush3.bf16.msra.mxu0 %v559_v9 }
  0x20   : > { %2515 = vmatprep.subr.bf16.mxu0 %v2715_v4 }
  0x22   : > { %2484 = vmatmul.mubr.msk.bf16.vlgmr.msra.gmra.mrb[0].mxu0 %vm508_vm0, %v2700_v10 }
  0x23   : > { %2487 = vmatprep.mubr.msk.bf16.mxu0 %vm508_vm0, %v2701_v12  ;;  %2516 = vmatpush3.bf16.msra.mxu0 %v2715_v4 }
  0x24   : > { %2517 = vmatprep.subr.bf16.mxu0 %v2716_v11 }
  0x27   : > { %2518 = vmatpush3.bf16.msra.mxu0 %v2716_v11 }
  0x28   : > { %2519 = vmatprep.subr.bf16.mxu0 %v2717_v13 }
  0x2a   : > { %2488 = vmatmul.mubr.msk.bf16.gmra.mrb[4].mxu0 %vm508_vm0, %v2702_v15 }
  0x2b   : > { %2491 = vmatprep.mubr.msk.bf16.mxu0 %vm508_vm0, %v2703_v16  ;;  %2520 = vmatpush3.bf16.msra.mxu0 %v2717_v13  ;;  %v2721_v13 = vld [vmem:[%s3583_s3 + $0x30] sm:$0xff]  }
  0x2c   : > { %2521 = vmatprep.subr.bf16.mxu0 %v2718_v14 }
  0x2f   : > { %2522 = vmatpush3.bf16.msra.mxu0 %v2718_v14 }
  0x32   : > { %2492 = vmatmul.mubr.msk.bf16.gmra.mrb[8].mxu0 %vm508_vm0, %v2704_v17 }
  0x33   : > { %2495 = vmatprep.mubr.msk.bf16.mxu0 %vm508_vm0, %v2705_v18 }
  0x3a   : > { %2496 = vmatmul.mubr.msk.bf16.gmra.mrb[12].mxu0 %vm508_vm0, %v2706_v19 }
  0x3b   : > { %2499 = vmatprep.mubr.msk.bf16.mxu0 %vm508_vm0, %v2707_v20 }
  0x42   : > { %2500 = vmatmul.mubr.msk.bf16.gmra.mrb[16].mxu0 %vm508_vm0, %v2708_v21 }
  0x43   : > { %2503 = vmatprep.mubr.msk.bf16.mxu0 %vm508_vm0, %v2709_v22 }
  0x4a   : > { %2504 = vmatmul.mubr.msk.bf16.gmra.mrb[20].mxu0 %vm508_vm0, %v2710_v23 }
  0x4b   : > { %2507 = vmatprep.mubr.msk.bf16.mxu0 %vm508_vm0, %v2711_v24 }
  0x52   : > { %2508 = vmatmul.mubr.msk.bf16.gmra.mrb[24].mxu0 %vm508_vm0, %v2712_v25 }
  0x53   : > { %2511 = vmatprep.mubr.msk.bf16.mxu0 %vm508_vm0, %v2713_v26 }
  0x5a   : > { %2512 = vmatmul.mubr.msk.bf16.gmra.mrb[28].mxu0 %vm508_vm0, %v2714_v27 }
  0xf5   : > { %v2485_v29 = vpop.f32.mrb[0].mxu0 }
  0xf6   : > { %v595_v31 = vpop.f32.mrb[1].mxu0  ;;  %v604_v33 = vadd.f32 %v2485_v29, %v3004_v30 }
  0xf7   : > { %v2486_v32 = vpop.f32.mrb[2].mxu0  ;;  %v596_v36 = vadd.f32 %v3004_v30, %v595_v31 }
  0xf8   : > { %v607_v34 = vadd.f32 %v2486_v32, %v3004_v30  ;;  %v598_v35 = vpop.f32.mrb[3].mxu0 }
  0xf9   : > { %v599_v37 = vadd.f32 %v3004_v30, %v598_v35 }
  0xfa   : > { %v723_v38 = vpack.c.bf16 %v607_v34, %v604_v33 }
  0xfb   : > { %v722_v39 = vpack.c.bf16 %v599_v37, %v596_v36 }
  0xfd   : > { %v2489_v40 = vpop.f32.mrb[4].mxu0  ;;  %2523 = vmatprep.mubr.msk.bf16.mxu0 %vm777_vm2, %v722_v39 }
  0xfe   : > { %v611_v41 = vpop.f32.mrb[5].mxu0  ;;  %2524 = vmatmul.mubr.msk.bf16.vlgmr.msra.gmra.mrb[32].mxu0 %vm777_vm2, %v723_v38  ;;  %v620_v43 = vadd.f32 %v2489_v40, %v3004_v30 }
  0xff   : > { %v2490_v42 = vpop.f32.mrb[6].mxu0  ;;  %v612_v46 = vadd.f32 %v3004_v30, %v611_v41 }
 0x100   : > { %v623_v44 = vadd.f32 %v2490_v42, %v3004_v30  ;;  %v614_v45 = vpop.f32.mrb[7].mxu0 }
 0x101   : > { %v615_v47 = vadd.f32 %v3004_v30, %v614_v45 }
 0x102   : > { %v725_v48 = vpack.c.bf16 %v623_v44, %v620_v43 }
 0x103   : > { %v724_v49 = vpack.c.bf16 %v615_v47, %v612_v46 }
 0x105   : > { %v2493_v50 = vpop.f32.mrb[8].mxu0  ;;  %2527 = vmatprep.mubr.msk.bf16.mxu0 %vm777_vm2, %v724_v49  ;;  %v2722_v49 = vld [vmem:[%s3583_s3 + $0x38] sm:$0xff]  }
 0x106   : > { %v627_v51 = vpop.f32.mrb[9].mxu0  ;;  %2528 = vmatmul.mubr.msk.bf16.gmra.mrb[36].mxu0 %vm777_vm2, %v725_v48  ;;  %v636_v53 = vadd.f32 %v2493_v50, %v3004_v30  ;;  %v2723_v50 = vld [vmem:[%s3585_s5] sm:$0xff]  }
 0x107   : > { %v2494_v52 = vpop.f32.mrb[10].mxu0  ;;  %v628_v56 = vadd.f32 %v3004_v30, %v627_v51  ;;  %2595 = vmatprep.subr.bf16.mxu0 %v2723_v50  ;;  %v2725_v51 = vld [vmem:[%s3585_s5 + $0x10] sm:$0xff]  }
 0x108   : > { %v639_v54 = vadd.f32 %v2494_v52, %v3004_v30  ;;  %v630_v55 = vpop.f32.mrb[11].mxu0  ;;  %2596 = vmatpush3.bf16.msra.mxu0 %v2723_v50  ;;  %v3075_v52 = vld [vmem:[%s3584_s4] ss:$0 sm:$0xff] }
 0x109   : > { %v631_v57 = vadd.f32 %v3004_v30, %v630_v55 }
 0x10a   : > { %v727_v58 = vpack.c.bf16 %v639_v54, %v636_v53 }
 0x10b   : > { %v726_v59 = vpack.c.bf16 %v631_v57, %v628_v56 }
 0x10d   : > { %v2497_v60 = vpop.f32.mrb[12].mxu0  ;;  %2531 = vmatprep.mubr.msk.bf16.mxu0 %vm777_vm2, %v726_v59 }
 0x10e   : > { %v643_v61 = vpop.f32.mrb[13].mxu0  ;;  %2532 = vmatmul.mubr.msk.bf16.gmra.mrb[40].mxu0 %vm777_vm2, %v727_v58  ;;  %v652_v63 = vadd.f32 %v2497_v60, %v3004_v30 }
 0x10f   : > { %v2498_v62 = vpop.f32.mrb[14].mxu0  ;;  %v644_v2 = vadd.f32 %v3004_v30, %v643_v61 }
 0x110   : > { %v655_v0 = vadd.f32 %v2498_v62, %v3004_v30  ;;  %v646_v1 = vpop.f32.mrb[15].mxu0 }
 0x111   : > { %v647_v3 = vadd.f32 %v3004_v30, %v646_v1 }
 0x112   : > { %v729_v4 = vpack.c.bf16 %v655_v0, %v652_v63 }
 0x113   : > { %v728_v5 = vpack.c.bf16 %v647_v3, %v644_v2 }
 0x115   : > { %v2501_v7 = vpop.f32.mrb[16].mxu0  ;;  %2535 = vmatprep.mubr.msk.bf16.mxu1 %vm777_vm2, %v728_v5 }
 0x116   : > { %v659_v8 = vpop.f32.mrb[17].mxu0  ;;  %2536 = vmatmul.mubr.msk.bf16.vlgmr.msra.gmra.mrb[0].mxu1 %vm777_vm2, %v729_v4  ;;  %v668_v10 = vadd.f32 %v2501_v7, %v3004_v30 }
 0x117   : > { %v2502_v9 = vpop.f32.mrb[18].mxu0  ;;  %2556 = vmatpush3.bf16.msra.mxu1 %v2719_v28  ;;  %v660_v14 = vadd.f32 %v3004_v30, %v659_v8 }
 0x118   : > { %v671_v11 = vadd.f32 %v2502_v9, %v3004_v30  ;;  %v662_v12 = vpop.f32.mrb[19].mxu0  ;;  %2557 = vmatprep.subr.bf16.mxu1 %v2720_v6 }
 0x119   : > { %v663_v15 = vadd.f32 %v3004_v30, %v662_v12 }
 0x11a   : > { %v731_v16 = vpack.c.bf16 %v671_v11, %v668_v10 }
 0x11b   : > { %v730_v17 = vpack.c.bf16 %v663_v15, %v660_v14  ;;  %2558 = vmatpush3.bf16.msra.mxu1 %v2720_v6 }
 0x11c   : > { %2559 = vmatprep.subr.bf16.mxu1 %v2721_v13 }
 0x11d   : > { %v2505_v18 = vpop.f32.mrb[20].mxu0  ;;  %2539 = vmatprep.mubr.msk.bf16.mxu1 %vm777_vm2, %v730_v17 }
 0x11e   : > { %v675_v19 = vpop.f32.mrb[21].mxu0  ;;  %2540 = vmatmul.mubr.msk.bf16.gmra.mrb[4].mxu1 %vm777_vm2, %v731_v16  ;;  %v684_v21 = vadd.f32 %v2505_v18, %v3004_v30 }
 0x11f   : > { %v2506_v20 = vpop.f32.mrb[22].mxu0  ;;  %2560 = vmatpush3.bf16.msra.mxu1 %v2721_v13  ;;  %v676_v24 = vadd.f32 %v3004_v30, %v675_v19 }
 0x120   : > { %v687_v22 = vadd.f32 %v2506_v20, %v3004_v30  ;;  %v678_v23 = vpop.f32.mrb[23].mxu0  ;;  %2561 = vmatprep.subr.bf16.mxu1 %v2722_v49 }
 0x121   : > { %v679_v25 = vadd.f32 %v3004_v30, %v678_v23 }
 0x122   : > { %v733_v26 = vpack.c.bf16 %v687_v22, %v684_v21 }
 0x123   : > { %v732_v27 = vpack.c.bf16 %v679_v25, %v676_v24  ;;  %2562 = vmatpush3.bf16.msra.mxu1 %v2722_v49 }
 0x125   : > { %v2509_v28 = vpop.f32.mrb[24].mxu0  ;;  %2543 = vmatprep.mubr.msk.bf16.mxu1 %vm777_vm2, %v732_v27 }
 0x126   : > { %v691_v29 = vpop.f32.mrb[25].mxu0  ;;  %2544 = vmatmul.mubr.msk.bf16.gmra.mrb[8].mxu1 %vm777_vm2, %v733_v26  ;;  %v700_v32 = vadd.f32 %v2509_v28, %v3004_v30 }
 0x127   : > { %v2510_v31 = vpop.f32.mrb[26].mxu0  ;;  %v692_v35 = vadd.f32 %v3004_v30, %v691_v29 }
 0x128   : > { %v703_v33 = vadd.f32 %v2510_v31, %v3004_v30  ;;  %v694_v34 = vpop.f32.mrb[27].mxu0 }
 0x129   : > { %v695_v36 = vadd.f32 %v3004_v30, %v694_v34 }
 0x12a   : > { %v735_v37 = vpack.c.bf16 %v703_v33, %v700_v32 }
 0x12b   : > { %v734_v38 = vpack.c.bf16 %v695_v36, %v692_v35 }
 0x12d   : > { %v2513_v39 = vpop.f32.mrb[28].mxu0  ;;  %2547 = vmatprep.mubr.msk.bf16.mxu1 %vm777_vm2, %v734_v38 }
 0x12e   : > { %v707_v40 = vpop.f32.mrb[29].mxu0  ;;  %2548 = vmatmul.mubr.msk.bf16.gmra.mrb[12].mxu1 %vm777_vm2, %v735_v37  ;;  %v716_v42 = vadd.f32 %v2513_v39, %v3004_v30 }
 0x12f   : > { %v2514_v41 = vpop.f32.mrb[30].mxu0  ;;  %v708_v45 = vadd.f32 %v3004_v30, %v707_v40 }
 0x130   : > { %v719_v43 = vadd.f32 %v2514_v41, %v3004_v30  ;;  %v710_v44 = vpop.f32.mrb[31].mxu0 }
 0x131   : > { %v711_v46 = vadd.f32 %v3004_v30, %v710_v44  ;;  %v2724_v30 = vld [vmem:[%s3585_s5 + $0x8] sm:$0xff]  }
 0x132   : > { %v737_v47 = vpack.c.bf16 %v719_v43, %v716_v42  ;;  %2597 = vmatprep.subr.bf16.mxu0 %v2724_v30 }
 0x133   : > { %v736_v48 = vpack.c.bf16 %v711_v46, %v708_v45  ;;  %2598 = vmatpush3.bf16.msra.mxu0 %v2724_v30 }
 0x134   : > { %2599 = vmatprep.subr.bf16.mxu0 %v2725_v51 }
 0x135   : > { %2551 = vmatprep.mubr.msk.bf16.mxu1 %vm777_vm2, %v736_v48 }
 0x136   : > { %2552 = vmatmul.mubr.msk.bf16.gmra.mrb[16].mxu1 %vm777_vm2, %v737_v47 }
 0x137   : > { %2600 = vmatpush3.bf16.msra.mxu0 %v2725_v51 }
 0x1d1   : > { %v2525_v53 = vpop.f32.mrb[32].mxu0 }
 0x1d2   : > { %v869_v54 = vadd.f32 %v2525_v53, %v3075_v52  ;;  %v860_v55 = vpop.f32.mrb[33].mxu0 }
 0x1d3   : > { %v861_v56 = vadd.f32 %v3075_v52, %v860_v55  ;;  %v2526_v57 = vpop.f32.mrb[34].mxu0 }
 0x1d4   : > { %v872_v58 = vadd.f32 %v2526_v57, %v3075_v52  ;;  %v863_v59 = vpop.f32.mrb[35].mxu0  ;;  %v989_v61 = vmax.f32 %v869_v54, 0.0 }
 0x1d5   : > { %v864_v60 = vadd.f32 %v3075_v52, %v863_v59  ;;  %v987_v63 = vmax.f32 %v861_v56, 0.0 }
 0x1d6   : > { %v990_v62 = vmax.f32 %v872_v58, 0.0 }
 0x1d7   : > { %v988_v0 = vmax.f32 %v864_v60, 0.0 }
 0x1d8   : > { %v1020_v1 = vpack.c.bf16 %v990_v62, %v989_v61 }
 0x1d9   : > { %v1019_v2 = vpack.c.bf16 %v988_v0, %v987_v63  ;;  %v2529_v3 = vpop.f32.mrb[36].mxu0 }
 0x1da   : > { %v885_v4 = vadd.f32 %v2529_v3, %v3075_v52  ;;  %v876_v5 = vpop.f32.mrb[37].mxu0 }
 0x1db   : > { %v877_v6 = vadd.f32 %v3075_v52, %v876_v5  ;;  %v2530_v7 = vpop.f32.mrb[38].mxu0  ;;  %2563 = vmatprep.mubr.msk.bf16.mxu1 %vm777_vm2, %v1019_v2 }
 0x1dc   : > { %v888_v8 = vadd.f32 %v2530_v7, %v3075_v52  ;;  %v879_v9 = vpop.f32.mrb[39].mxu0  ;;  %2564 = vmatmul.mubr.msk.bf16.vlgmr.msra.gmra.mrb[20].mxu1 %vm777_vm2, %v1020_v1  ;;  %v993_v11 = vmax.f32 %v885_v4, 0.0 }
 0x1dd   : > { %v880_v10 = vadd.f32 %v3075_v52, %v879_v9  ;;  %v991_v13 = vmax.f32 %v877_v6, 0.0 }
 0x1de   : > { %v994_v12 = vmax.f32 %v888_v8, 0.0 }
 0x1df   : > { %v992_v14 = vmax.f32 %v880_v10, 0.0 }
 0x1e0   : > { %v1022_v15 = vpack.c.bf16 %v994_v12, %v993_v11 }
 0x1e1   : > { %v1021_v16 = vpack.c.bf16 %v992_v14, %v991_v13  ;;  %v2533_v17 = vpop.f32.mrb[40].mxu0 }
 0x1e2   : > { %v901_v18 = vadd.f32 %v2533_v17, %v3075_v52  ;;  %v892_v19 = vpop.f32.mrb[41].mxu0 }
 0x1e3   : > { %v893_v20 = vadd.f32 %v3075_v52, %v892_v19  ;;  %v2534_v21 = vpop.f32.mrb[42].mxu0  ;;  %2567 = vmatprep.mubr.msk.bf16.mxu1 %vm777_vm2, %v1021_v16 }
 0x1e4   : > { %v904_v22 = vadd.f32 %v2534_v21, %v3075_v52  ;;  %v895_v23 = vpop.f32.mrb[43].mxu0  ;;  %2568 = vmatmul.mubr.msk.bf16.gmra.mrb[24].mxu1 %vm777_vm2, %v1022_v15  ;;  %v997_v25 = vmax.f32 %v901_v18, 0.0 }
 0x1e5   : > { %v896_v24 = vadd.f32 %v3075_v52, %v895_v23  ;;  %v995_v27 = vmax.f32 %v893_v20, 0.0 }
 0x1e6   : > { %v998_v26 = vmax.f32 %v904_v22, 0.0 }
 0x1e7   : > { %v996_v28 = vmax.f32 %v896_v24, 0.0 }
 0x1e8   : > { %v1024_v29 = vpack.c.bf16 %v998_v26, %v997_v25 }
 0x1e9   : > { %v1023_v31 = vpack.c.bf16 %v996_v28, %v995_v27  ;;  %v2537_v32 = vpop.f32.mrb[0].mxu1 }
 0x1ea   : > { %v917_v33 = vadd.f32 %v2537_v32, %v3075_v52  ;;  %v908_v34 = vpop.f32.mrb[1].mxu1 }
 0x1eb   : > { %v909_v35 = vadd.f32 %v3075_v52, %v908_v34  ;;  %v2538_v36 = vpop.f32.mrb[2].mxu1  ;;  %2571 = vmatprep.mubr.msk.bf16.mxu1 %vm777_vm2, %v1023_v31 }
 0x1ec   : > { %v920_v37 = vadd.f32 %v2538_v36, %v3075_v52  ;;  %v911_v38 = vpop.f32.mrb[3].mxu1  ;;  %2572 = vmatmul.mubr.msk.bf16.gmra.mrb[28].mxu1 %vm777_vm2, %v1024_v29  ;;  %v1001_v40 = vmax.f32 %v917_v33, 0.0 }
 0x1ed   : > { %v912_v39 = vadd.f32 %v3075_v52, %v911_v38  ;;  %v999_v42 = vmax.f32 %v909_v35, 0.0 }
 0x1ee   : > { %v1002_v41 = vmax.f32 %v920_v37, 0.0 }
 0x1ef   : > { %v1000_v43 = vmax.f32 %v912_v39, 0.0  ;;  %v2726_v39 = vld [vmem:[%s3585_s5 + $0x18] sm:$0xff]  }
 0x1f0   : > { %v1026_v44 = vpack.c.bf16 %v1002_v41, %v1001_v40  ;;  %2601 = vmatprep.subr.bf16.mxu0 %v2726_v39  ;;  %v2728_v40 = vld [vmem:[%s3587_s7 + $0x8] sm:$0xff]   ;;  %v3137_v41 = vld [vmem:[%s3584_s4 + $0x1] ss:$0 sm:$0xff] }
 0x1f1   : > { %v1025_v45 = vpack.c.bf16 %v1000_v43, %v999_v42  ;;  %v2541_v46 = vpop.f32.mrb[4].mxu1  ;;  %2602 = vmatpush3.bf16.msra.mxu0 %v2726_v39 }
 0x1f2   : > { %v933_v47 = vadd.f32 %v2541_v46, %v3075_v52  ;;  %v924_v48 = vpop.f32.mrb[5].mxu1 }
 0x1f3   : > { %v925_v49 = vadd.f32 %v3075_v52, %v924_v48  ;;  %v2542_v50 = vpop.f32.mrb[6].mxu1  ;;  %2575 = vmatprep.mubr.msk.bf16.mxu1 %vm777_vm2, %v1025_v45 }
 0x1f4   : > { %v936_v30 = vadd.f32 %v2542_v50, %v3075_v52  ;;  %v927_v51 = vpop.f32.mrb[7].mxu1  ;;  %2576 = vmatmul.mubr.msk.bf16.gmra.mrb[32].mxu1 %vm777_vm2, %v1026_v44  ;;  %v1005_v54 = vmax.f32 %v933_v47, 0.0 }
 0x1f5   : > { %v928_v53 = vadd.f32 %v3075_v52, %v927_v51  ;;  %v1003_v56 = vmax.f32 %v925_v49, 0.0 }
 0x1f6   : > { %v1006_v55 = vmax.f32 %v936_v30, 0.0 }
 0x1f7   : > { %v1004_v57 = vmax.f32 %v928_v53, 0.0 }
 0x1f8   : > { %v1028_v58 = vpack.c.bf16 %v1006_v55, %v1005_v54 }
 0x1f9   : > { %v1027_v59 = vpack.c.bf16 %v1004_v57, %v1003_v56  ;;  %v2545_v60 = vpop.f32.mrb[8].mxu1 }
 0x1fa   : > { %v949_v61 = vadd.f32 %v2545_v60, %v3075_v52  ;;  %v940_v62 = vpop.f32.mrb[9].mxu1 }
 0x1fb   : > { %v941_v63 = vadd.f32 %v3075_v52, %v940_v62  ;;  %v2546_v0 = vpop.f32.mrb[10].mxu1  ;;  %2579 = vmatprep.mubr.msk.bf16.mxu1 %vm777_vm2, %v1027_v59 }
 0x1fc   : > { %v952_v1 = vadd.f32 %v2546_v0, %v3075_v52  ;;  %v943_v2 = vpop.f32.mrb[11].mxu1  ;;  %2580 = vmatmul.mubr.msk.bf16.gmra.mrb[36].mxu1 %vm777_vm2, %v1028_v58  ;;  %v1009_v4 = vmax.f32 %v949_v61, 0.0 }
 0x1fd   : > { %v944_v3 = vadd.f32 %v3075_v52, %v943_v2  ;;  %v1007_v6 = vmax.f32 %v941_v63, 0.0 }
 0x1fe   : > { %v1010_v5 = vmax.f32 %v952_v1, 0.0 }
 0x1ff   : > { %v1008_v7 = vmax.f32 %v944_v3, 0.0 }
 0x200   : > { %v1030_v8 = vpack.c.bf16 %v1010_v5, %v1009_v4 }
 0x201   : > { %v1029_v9 = vpack.c.bf16 %v1008_v7, %v1007_v6  ;;  %v2549_v10 = vpop.f32.mrb[12].mxu1 }
 0x202   : > { %v965_v11 = vadd.f32 %v2549_v10, %v3075_v52  ;;  %v956_v12 = vpop.f32.mrb[13].mxu1 }
 0x203   : > { %v957_v13 = vadd.f32 %v3075_v52, %v956_v12  ;;  %v2550_v14 = vpop.f32.mrb[14].mxu1  ;;  %2583 = vmatprep.mubr.msk.bf16.mxu1 %vm777_vm2, %v1029_v9 }
 0x204   : > { %v968_v15 = vadd.f32 %v2550_v14, %v3075_v52  ;;  %v959_v16 = vpop.f32.mrb[15].mxu1  ;;  %2584 = vmatmul.mubr.msk.bf16.gmra.mrb[40].mxu1 %vm777_vm2, %v1030_v8  ;;  %v1013_v18 = vmax.f32 %v965_v11, 0.0 }
 0x205   : > { %v960_v17 = vadd.f32 %v3075_v52, %v959_v16  ;;  %v1011_v20 = vmax.f32 %v957_v13, 0.0 }
 0x206   : > { %v1014_v19 = vmax.f32 %v968_v15, 0.0 }
 0x207   : > { %v1012_v21 = vmax.f32 %v960_v17, 0.0 }
 0x208   : > { %v1032_v22 = vpack.c.bf16 %v1014_v19, %v1013_v18 }
 0x209   : > { %v1031_v23 = vpack.c.bf16 %v1012_v21, %v1011_v20  ;;  %v2553_v24 = vpop.f32.mrb[16].mxu1 }
 0x20a   : > { %v981_v25 = vadd.f32 %v2553_v24, %v3075_v52  ;;  %v972_v26 = vpop.f32.mrb[17].mxu1 }
 0x20b   : > { %v973_v27 = vadd.f32 %v3075_v52, %v972_v26  ;;  %v2554_v28 = vpop.f32.mrb[18].mxu1  ;;  %2587 = vmatprep.mubr.msk.bf16.mxu1 %vm777_vm2, %v1031_v23 }
 0x20c   : > { %v984_v29 = vadd.f32 %v2554_v28, %v3075_v52  ;;  %v975_v31 = vpop.f32.mrb[19].mxu1  ;;  %2588 = vmatmul.mubr.msk.bf16.gmra.mrb[44].mxu1 %vm777_vm2, %v1032_v22  ;;  %v1017_v33 = vmax.f32 %v981_v25, 0.0 }
 0x20d   : > { %v976_v32 = vadd.f32 %v3075_v52, %v975_v31  ;;  %v1015_v35 = vmax.f32 %v973_v27, 0.0  ;;  %v2727_v52 = vld [vmem:[%s3587_s7] sm:$0xff]  }
 0x20e   : > { %v1018_v34 = vmax.f32 %v984_v29, 0.0  ;;  %2635 = vmatprep.subr.bf16.mxu1 %v2727_v52 }
 0x20f   : > { %v1016_v36 = vmax.f32 %v976_v32, 0.0  ;;  %2636 = vmatpush3.bf16.msra.mxu1 %v2727_v52 }
 0x210   : > { %v1034_v37 = vpack.c.bf16 %v1018_v34, %v1017_v33  ;;  %2637 = vmatprep.subr.bf16.mxu1 %v2728_v40 }
 0x211   : > { %v1033_v38 = vpack.c.bf16 %v1016_v36, %v1015_v35 }
 0x213   : > { %2591 = vmatprep.mubr.msk.bf16.mxu1 %vm777_vm2, %v1033_v38  ;;  %2638 = vmatpush3.bf16.msra.mxu1 %v2728_v40 }
 0x214   : > { %2592 = vmatmul.mubr.msk.bf16.gmra.mrb[48].mxu1 %vm777_vm2, %v1034_v37 }
 0x2af   : > { %v2565_v42 = vpop.f32.mrb[20].mxu1 }
 0x2b0   : > { %v1158_v43 = vpop.f32.mrb[21].mxu1  ;;  %v3143_v46 = vadd.f32 %v2565_v42, %v3137_v41 }
 0x2b1   : > { %v3140_v44 = vadd.f32 %v3137_v41, %v1158_v43  ;;  %v2566_v45 = vpop.f32.mrb[22].mxu1 }
 0x2b2   : > { %v3146_v47 = vadd.f32 %v2566_v45, %v3137_v41  ;;  %v1161_v48 = vpop.f32.mrb[23].mxu1  ;;  %v1287_v53 = vmax.f32 %v3143_v46, 0.0 }
 0x2b3   : > { %v3149_v49 = vadd.f32 %v3137_v41, %v1161_v48  ;;  %v1285_v30 = vmax.f32 %v3140_v44, 0.0 }
 0x2b4   : > { %v1288_v50 = vmax.f32 %v3146_v47, 0.0 }
 0x2b5   : > { %v1286_v51 = vmax.f32 %v3149_v49, 0.0 }
 0x2b6   : > { %v1318_v56 = vpack.c.bf16 %v1288_v50, %v1287_v53 }
 0x2b7   : > { %v1317_v54 = vpack.c.bf16 %v1286_v51, %v1285_v30  ;;  %v2569_v55 = vpop.f32.mrb[24].mxu1 }
 0x2b8   : > { %v1174_v57 = vpop.f32.mrb[25].mxu1  ;;  %v3168_v60 = vadd.f32 %v2569_v55, %v3137_v41 }
 0x2b9   : > { %v3164_v58 = vadd.f32 %v3137_v41, %v1174_v57  ;;  %v2570_v59 = vpop.f32.mrb[26].mxu1  ;;  %2603 = vmatprep.mubr.msk.bf16.mxu0 %vm777_vm2, %v1317_v54 }
 0x2ba   : > { %v3171_v61 = vadd.f32 %v2570_v59, %v3137_v41  ;;  %v1177_v62 = vpop.f32.mrb[27].mxu1  ;;  %2604 = vmatmul.mubr.msk.bf16.vlgmr.msra.gmra.mrb[44].mxu0 %vm777_vm2, %v1318_v56  ;;  %v1291_v3 = vmax.f32 %v3168_v60, 0.0 }
 0x2bb   : > { %v3175_v63 = vadd.f32 %v3137_v41, %v1177_v62  ;;  %v1289_v1 = vmax.f32 %v3164_v58, 0.0 }
 0x2bc   : > { %v1292_v0 = vmax.f32 %v3171_v61, 0.0 }
 0x2bd   : > { %v1290_v2 = vmax.f32 %v3175_v63, 0.0 }
 0x2be   : > { %v1320_v6 = vpack.c.bf16 %v1292_v0, %v1291_v3 }
 0x2bf   : > { %v1319_v4 = vpack.c.bf16 %v1290_v2, %v1289_v1  ;;  %v2573_v5 = vpop.f32.mrb[28].mxu1 }
 0x2c0   : > { %v1190_v7 = vpop.f32.mrb[29].mxu1  ;;  %v3194_v10 = vadd.f32 %v2573_v5, %v3137_v41 }
 0x2c1   : > { %v3190_v8 = vadd.f32 %v3137_v41, %v1190_v7  ;;  %v2574_v9 = vpop.f32.mrb[30].mxu1  ;;  %2607 = vmatprep.mubr.msk.bf16.mxu0 %vm777_vm2, %v1319_v4 }
 0x2c2   : > { %v3197_v11 = vadd.f32 %v2574_v9, %v3137_v41  ;;  %v1193_v12 = vpop.f32.mrb[31].mxu1  ;;  %2608 = vmatmul.mubr.msk.bf16.gmra.mrb[48].mxu0 %vm777_vm2, %v1320_v6  ;;  %v3611_v17 = vmax.f32 %v3194_v10, 0.0 }
 0x2c3   : > { %v3201_v13 = vadd.f32 %v3137_v41, %v1193_v12  ;;  %v3613_v15 = vmax.f32 %v3190_v8, 0.0 }
 0x2c4   : > { %v3610_v14 = vmax.f32 %v3197_v11, 0.0 }
 0x2c5   : > { %v3612_v16 = vmax.f32 %v3201_v13, 0.0 }
 0x2c6   : > { %v1322_v20 = vpack.c.bf16 %v3610_v14, %v3611_v17 }
 0x2c7   : > { %v1321_v18 = vpack.c.bf16 %v3612_v16, %v3613_v15  ;;  %v2577_v19 = vpop.f32.mrb[32].mxu1 }
 0x2c8   : > { %v1206_v21 = vpop.f32.mrb[33].mxu1  ;;  %v3220_v24 = vadd.f32 %v2577_v19, %v3137_v41 }
 0x2c9   : > { %v3216_v22 = vadd.f32 %v3137_v41, %v1206_v21  ;;  %v2578_v23 = vpop.f32.mrb[34].mxu1  ;;  %2611 = vmatprep.mubr.msk.bf16.mxu0 %vm777_vm2, %v1321_v18 }
 0x2ca   : > { %v3223_v25 = vadd.f32 %v2578_v23, %v3137_v41  ;;  %v1209_v26 = vpop.f32.mrb[35].mxu1  ;;  %2612 = vmatmul.mubr.msk.bf16.gmra.mrb[52].mxu0 %vm777_vm2, %v1322_v20  ;;  %v3607_v32 = vmax.f32 %v3220_v24, 0.0 }
 0x2cb   : > { %v3227_v27 = vadd.f32 %v3137_v41, %v1209_v26  ;;  %v3609_v29 = vmax.f32 %v3216_v22, 0.0 }
 0x2cc   : > { %v3606_v28 = vmax.f32 %v3223_v25, 0.0 }
 0x2cd   : > { %v3608_v31 = vmax.f32 %v3227_v27, 0.0 }
 0x2ce   : > { %v1324_v35 = vpack.c.bf16 %v3606_v28, %v3607_v32 }
 0x2cf   : > { %v1323_v33 = vpack.c.bf16 %v3608_v31, %v3609_v29  ;;  %v2581_v34 = vpop.f32.mrb[36].mxu1 }
 0x2d0   : > { %v1222_v36 = vpop.f32.mrb[37].mxu1  ;;  %v3246_v39 = vadd.f32 %v2581_v34, %v3137_v41 }
 0x2d1   : > { %v3242_v37 = vadd.f32 %v3137_v41, %v1222_v36  ;;  %v2582_v38 = vpop.f32.mrb[38].mxu1  ;;  %2615 = vmatprep.mubr.msk.bf16.mxu0 %vm777_vm2, %v1323_v33 }
 0x2d2   : > { %v3249_v52 = vadd.f32 %v2582_v38, %v3137_v41  ;;  %v1225_v40 = vpop.f32.mrb[39].mxu1  ;;  %2616 = vmatmul.mubr.msk.bf16.gmra.mrb[56].mxu0 %vm777_vm2, %v1324_v35  ;;  %v3605_v54 = vmax.f32 %v3246_v39, 0.0 }
 0x2d3   : > { %v3253_v42 = vadd.f32 %v3137_v41, %v1225_v40  ;;  %v3603_v45 = vmax.f32 %v3242_v37, 0.0 }
 0x2d4   : > { %v3604_v43 = vmax.f32 %v3249_v52, 0.0 }
 0x2d5   : > { %v3602_v48 = vmax.f32 %v3253_v42, 0.0 }
 0x2d6   : > { %v1326_v57 = vpack.c.bf16 %v3604_v43, %v3605_v54 }
 0x2d7   : > { %v1325_v55 = vpack.c.bf16 %v3602_v48, %v3603_v45  ;;  %v2585_v56 = vpop.f32.mrb[40].mxu1 }
 0x2d8   : > { %v1238_v59 = vpop.f32.mrb[41].mxu1  ;;  %v3272_v5 = vadd.f32 %v2585_v56, %v3137_v41 }
 0x2d9   : > { %v3268_v62 = vadd.f32 %v3137_v41, %v1238_v59  ;;  %v2586_v4 = vpop.f32.mrb[42].mxu1  ;;  %2619 = vmatprep.mubr.msk.bf16.mxu0 %vm777_vm2, %v1325_v55 }
 0x2da   : > { %v3275_v6 = vadd.f32 %v2586_v4, %v3137_v41  ;;  %v1241_v7 = vpop.f32.mrb[43].mxu1  ;;  %2620 = vmatmul.mubr.msk.bf16.gmra.mrb[60].mxu0 %vm777_vm2, %v1326_v57  ;;  %v3601_v20 = vmax.f32 %v3272_v5, 0.0 }
 0x2db   : > { %v3279_v9 = vadd.f32 %v3137_v41, %v1241_v7  ;;  %v3599_v18 = vmax.f32 %v3268_v62, 0.0 }
 0x2dc   : > { %v3600_v12 = vmax.f32 %v3275_v6, 0.0 }
 0x2dd   : > { %v3590_v19 = vmax.f32 %v3279_v9, 0.0 }
 0x2de   : > { %v1328_v26 = vpack.c.bf16 %v3600_v12, %v3601_v20 }
 0x2df   : > { %v1327_v21 = vpack.c.bf16 %v3590_v19, %v3599_v18  ;;  %v2589_v23 = vpop.f32.mrb[44].mxu1 }
 0x2e0   : > { %v1254_v33 = vpop.f32.mrb[45].mxu1  ;;  %v3298_v36 = vadd.f32 %v2589_v23, %v3137_v41 }
 0x2e1   : > { %v3294_v34 = vadd.f32 %v3137_v41, %v1254_v33  ;;  %v2590_v35 = vpop.f32.mrb[46].mxu1  ;;  %2623 = vmatprep.mubr.msk.bf16.mxu0 %vm777_vm2, %v1327_v21 }
 0x2e2   : > { %v3301_v38 = vadd.f32 %v2590_v35, %v3137_v41  ;;  %v1257_v40 = vpop.f32.mrb[47].mxu1  ;;  %2624 = vmatmul.mubr.msk.bf16.gmra.mrb[64].mxu0 %vm777_vm2, %v1328_v26  ;;  %v3594_v4 = vmax.f32 %v3298_v36, 0.0 }
 0x2e3   : > { %v3305_v55 = vadd.f32 %v3137_v41, %v1257_v40  ;;  %v3592_v57 = vmax.f32 %v3294_v34, 0.0 }
 0x2e4   : > { %v3593_v56 = vmax.f32 %v3301_v38, 0.0 }
 0x2e5   : > { %v3591_v59 = vmax.f32 %v3305_v55, 0.0 }
 0x2e6   : > { %v1330_v23 = vpack.c.bf16 %v3593_v56, %v3594_v4 }
 0x2e7   : > { %v1329_v7 = vpack.c.bf16 %v3591_v59, %v3592_v57  ;;  %v2593_v21 = vpop.f32.mrb[48].mxu1 }
 0x2e8   : > { %v1270_v26 = vpop.f32.mrb[49].mxu1  ;;  %v3324_v40 = vadd.f32 %v2593_v21, %v3137_v41 }
 0x2e9   : > { %v3320_v33 = vadd.f32 %v3137_v41, %v1270_v26  ;;  %v2594_v35 = vpop.f32.mrb[50].mxu1  ;;  %2627 = vmatprep.mubr.msk.bf16.mxu0 %vm777_vm2, %v1329_v7 }
 0x2ea   : > { %v3327_v19 = vadd.f32 %v2594_v35, %v3137_v41  ;;  %v1273_v59 = vpop.f32.mrb[51].mxu1  ;;  %2628 = vmatmul.mubr.msk.bf16.gmra.mrb[68].mxu0 %vm777_vm2, %v1330_v23  ;;  %v3598_v7 = vmax.f32 %v3324_v40, 0.0  ;;  %v3356_v35 = vld [vmem:[%s3586_s6] ss:$0 sm:$0xff] }
 0x2eb   : > { %v3331_v57 = vadd.f32 %v3137_v41, %v1273_v59  ;;  %v3596_v26 = vmax.f32 %v3320_v33, 0.0  ;;  %v2729_v41 = vld [vmem:[%s3587_s7 + $0x10] sm:$0xff]   ;;  %v2730_v59 = vld [vmem:[%s3587_s7 + $0x18] sm:$0xff]  }
 0x2ec   : > { %v3597_v56 = vmax.f32 %v3327_v19, 0.0  ;;  %2639 = vmatprep.subr.bf16.mxu1 %v2729_v41 }
 0x2ed   : > { %v3595_v4 = vmax.f32 %v3331_v57, 0.0  ;;  %2640 = vmatpush3.bf16.msra.mxu1 %v2729_v41 }
 0x2ee   : > { %v1332_v23 = vpack.c.bf16 %v3597_v56, %v3598_v7  ;;  %2641 = vmatprep.subr.bf16.mxu1 %v2730_v59 }
 0x2ef   : > { %v1331_v21 = vpack.c.bf16 %v3595_v4, %v3596_v26 }
 0x2f1   : > { %2631 = vmatprep.mubr.msk.bf16.mxu0 %vm777_vm2, %v1331_v21  ;;  %2642 = vmatpush3.bf16.msra.mxu1 %v2730_v59 }
 0x2f2   : > { %2632 = vmatmul.mubr.msk.bf16.gmra.mrb[72].mxu0 %vm777_vm2, %v1332_v23 }
 0x38d   : > { %v2605_v21 = vpop.f32.mrb[44].mxu0 }
 0x38e   : > { %v1463_v23 = vadd.f32 %v2605_v21, %v3356_v35  ;;  %v1454_v4 = vpop.f32.mrb[45].mxu0 }
 0x38f   : > { %v1455_v26 = vadd.f32 %v3356_v35, %v1454_v4  ;;  %v2606_v56 = vpop.f32.mrb[46].mxu0 }
 0x390   : > { %v2313_v7 = vclamps-f32 %v1463_v23, 30.0  ;;  %v1466_v41 = vadd.f32 %v2606_v56, %v3356_v35  ;;  %v1457_v18 = vpop.f32.mrb[47].mxu0 }
 0x391   : > { %v2311_v12 = vclamps-f32 %v1455_v26, 30.0  ;;  %v1458_v20 = vadd.f32 %v3356_v35, %v1457_v18 }
 0x392   : > { %v1647_v59 = vsub.f32 0.0, %v2313_v7  ;;  %v2314_v48 = vclamps-f32 %v1466_v41, 30.0 }
 0x393   : > { %v1645_v45 = vsub.f32 0.0, %v2311_v12  ;;  %v2312_v43 = vclamps-f32 %v1458_v20, 30.0 }
 0x394   : > { %v1681_v54 = vmul.f32 1.442695, %v1647_v59  ;;  %v1648_v28 = vsub.f32 0.0, %v2314_v48 }
 0x395   : > { %v1677_v32 = vmul.f32 1.442695, %v1645_v45  ;;  %v1646_v31 = vsub.f32 0.0, %v2312_v43  ;;  %v2609_v21 = vpop.f32.mrb[48].mxu0 }
 0x396   : > { %2731 = vpow2.f32 %v1681_v54  ;;  %v1683_v29 = vmul.f32 1.442695, %v1648_v28  ;;  %v1479_v4 = vadd.f32 %v2609_v21, %v3356_v35  ;;  %v1470_v23 = vpop.f32.mrb[49].mxu0 }
 0x397   : > { %2733 = vpow2.f32 %v1677_v32  ;;  %v1679_v56 = vmul.f32 1.442695, %v1646_v31  ;;  %v1471_v26 = vadd.f32 %v3356_v35, %v1470_v23  ;;  %v2610_v14 = vpop.f32.mrb[50].mxu0 }
 0x398   : > { %2735 = vpow2.f32 %v1683_v29  ;;  %v2317_v18 = vclamps-f32 %v1479_v4, 30.0  ;;  %v1482_v12 = vadd.f32 %v2610_v14, %v3356_v35  ;;  %v1473_v20 = vpop.f32.mrb[51].mxu0 }
 0x399   : > { %2737 = vpow2.f32 %v1679_v56  ;;  %v2315_v48 = vclamps-f32 %v1471_v26, 30.0  ;;  %v1474_v43 = vadd.f32 %v3356_v35, %v1473_v20 }
 0x39a   : > { %v1651_v45 = vsub.f32 0.0, %v2317_v18  ;;  %v2318_v54 = vclamps-f32 %v1482_v12, 30.0 }
 0x39b   : > { %v1649_v28 = vsub.f32 0.0, %v2315_v48  ;;  %v2316_v7 = vclamps-f32 %v1474_v43, 30.0 }
 0x39c   : > { %v1689_v41 = vmul.f32 1.442695, %v1651_v45  ;;  %v1652_v59 = vsub.f32 0.0, %v2318_v54 }
 0x39d   : > { %v1685_v32 = vmul.f32 1.442695, %v1649_v28  ;;  %v1650_v31 = vsub.f32 0.0, %v2316_v7  ;;  %v2613_v21 = vpop.f32.mrb[52].mxu0 }
 0x39e   : > { %2739 = vpow2.f32 %v1689_v41  ;;  %v1691_v23 = vmul.f32 1.442695, %v1652_v59  ;;  %v1495_v29 = vadd.f32 %v2613_v21, %v3356_v35  ;;  %v1486_v4 = vpop.f32.mrb[53].mxu0 }
 0x39f   : > { %2741 = vpow2.f32 %v1685_v32  ;;  %v1687_v14 = vmul.f32 1.442695, %v1650_v31  ;;  %v1487_v56 = vadd.f32 %v3356_v35, %v1486_v4  ;;  %v2614_v26 = vpop.f32.mrb[54].mxu0 }
 0x3a0   : > { %v2732_v20 = vpop.eup %2731  ;;  %2743 = vpow2.f32 %v1691_v23  ;;  %v2321_v18 = vclamps-f32 %v1495_v29, 30.0  ;;  %v1498_v12 = vadd.f32 %v2614_v26, %v3356_v35  ;;  %v1489_v48 = vpop.f32.mrb[55].mxu0 }
 0x3a1   : > { %v2734_v43 = vpop.eup %2733  ;;  %v1743_v45 = vadd.f32 1.0, %v2732_v20  ;;  %2745 = vpow2.f32 %v1687_v14  ;;  %v2319_v54 = vclamps-f32 %v1487_v56, 30.0  ;;  %v1490_v28 = vadd.f32 %v3356_v35, %v1489_v48 }
 0x3a2   : > { %v2736_v7 = vpop.eup %2735  ;;  %v1741_v41 = vadd.f32 1.0, %v2734_v43  ;;  %v1655_v59 = vsub.f32 0.0, %v2321_v18  ;;  %v2322_v32 = vclamps-f32 %v1498_v12, 30.0 }
 0x3a3   : > { %v2738_v31 = vpop.eup %2737  ;;  %2747 = vrcp.f32 %v1743_v45  ;;  %v1744_v21 = vadd.f32 1.0, %v2736_v7  ;;  %v1653_v4 = vsub.f32 0.0, %v2319_v54  ;;  %v2320_v17 = vclamps-f32 %v1490_v28, 30.0 }
 0x3a4   : > { %2749 = vrcp.f32 %v1741_v41  ;;  %v1742_v23 = vadd.f32 1.0, %v2738_v31  ;;  %v1697_v29 = vmul.f32 1.442695, %v1655_v59  ;;  %v1656_v26 = vsub.f32 0.0, %v2322_v32 }
 0x3a5   : > { %2751 = vrcp.f32 %v1744_v21  ;;  %v1693_v16 = vmul.f32 1.442695, %v1653_v4  ;;  %v1654_v20 = vsub.f32 0.0, %v2320_v17  ;;  %v2617_v14 = vpop.f32.mrb[56].mxu0 }
 0x3a6   : > { %2753 = vrcp.f32 %v1742_v23  ;;  %v1699_v56 = vmul.f32 1.442695, %v1656_v26  ;;  %v1511_v48 = vadd.f32 %v2617_v14, %v3356_v35  ;;  %v1502_v43 = vpop.f32.mrb[57].mxu0 }
 0x3a7   : > { %2755 = vpow2.f32 %v1697_v29  ;;  %v1695_v18 = vmul.f32 1.442695, %v1654_v20  ;;  %v1503_v12 = vadd.f32 %v3356_v35, %v1502_v43  ;;  %v2618_v45 = vpop.f32.mrb[58].mxu0 }
 0x3a8   : > { %v2740_v54 = vpop.eup %2739  ;;  %2757 = vpow2.f32 %v1693_v16  ;;  %v2325_v28 = vclamps-f32 %v1511_v48, 30.0  ;;  %v1514_v7 = vadd.f32 %v2618_v45, %v3356_v35  ;;  %v1505_v41 = vpop.f32.mrb[59].mxu0 }
 0x3a9   : > { %v2742_v59 = vpop.eup %2741  ;;  %v1747_v32 = vadd.f32 1.0, %v2740_v54  ;;  %2759 = vpow2.f32 %v1699_v56  ;;  %v2323_v17 = vclamps-f32 %v1503_v12, 30.0  ;;  %v1506_v31 = vadd.f32 %v3356_v35, %v1505_v41 }
 0x3aa   : > { %v2744_v21 = vpop.eup %2743  ;;  %v1745_v4 = vadd.f32 1.0, %v2742_v59  ;;  %2761 = vpow2.f32 %v1695_v18  ;;  %v1659_v23 = vsub.f32 0.0, %v2325_v28  ;;  %v2326_v29 = vclamps-f32 %v1514_v7, 30.0 }
 0x3ab   : > { %v2746_v26 = vpop.eup %2745  ;;  %2763 = vrcp.f32 %v1747_v32  ;;  %v1748_v20 = vadd.f32 1.0, %v2744_v21  ;;  %v1657_v14 = vsub.f32 0.0, %v2323_v17  ;;  %v2324_v16 = vclamps-f32 %v1506_v31, 30.0 }
 0x3ac   : > { %2765 = vrcp.f32 %v1745_v4  ;;  %v1746_v48 = vadd.f32 1.0, %v2746_v26  ;;  %v1705_v43 = vmul.f32 1.442695, %v1659_v23  ;;  %v1660_v45 = vsub.f32 0.0, %v2326_v29 }
 0x3ad   : > { %v2748_v15 = vpop.eup %2747  ;;  %2767 = vrcp.f32 %v1748_v20  ;;  %v1701_v56 = vmul.f32 1.442695, %v1657_v14  ;;  %v1658_v12 = vsub.f32 0.0, %v2324_v16  ;;  %v2621_v54 = vpop.f32.mrb[60].mxu0 }
 0x3ae   : > { %v2750_v41 = vpop.eup %2749  ;;  %v1807_v18 = vmul.f32 %v2748_v15, %v1287_v53  ;;  %2769 = vrcp.f32 %v1746_v48  ;;  %v1707_v28 = vmul.f32 1.442695, %v1660_v45  ;;  %v1527_v7 = vadd.f32 %v2621_v54, %v3356_v35  ;;  %v1518_v59 = vpop.f32.mrb[61].mxu0 }
 0x3af   : > { %v2752_v32 = vpop.eup %2751  ;;  %2771 = vpow2.f32 %v1705_v43  ;;  %v1703_v17 = vmul.f32 1.442695, %v1658_v12  ;;  %v1519_v31 = vadd.f32 %v3356_v35, %v1518_v59  ;;  %v2622_v21 = vpop.f32.mrb[62].mxu0  ;;  %v1805_v4 = vmul.f32 %v2750_v41, %v1285_v30 }
 0x3b0   : > { %v2754_v23 = vpop.eup %2753  ;;  %v1808_v29 = vmul.f32 %v2752_v32, %v1288_v50  ;;  %2773 = vpow2.f32 %v1701_v56  ;;  %v2329_v46 = vclamps-f32 %v1527_v7, 30.0  ;;  %v1530_v53 = vadd.f32 %v2622_v21, %v3356_v35  ;;  %v1521_v15 = vpop.f32.mrb[63].mxu0 }
 0x3b1   : > { %v2756_v26 = vpop.eup %2755  ;;  %2775 = vpow2.f32 %v1707_v28  ;;  %v2327_v20 = vclamps-f32 %v1519_v31, 30.0  ;;  %v1522_v14 = vadd.f32 %v3356_v35, %v1521_v15  ;;  %v1806_v16 = vmul.f32 %v2754_v23, %v1286_v51 }
 0x3b2   : > { %v2758_v48 = vpop.eup %2757  ;;  %v1751_v44 = vadd.f32 1.0, %v2756_v26  ;;  %2777 = vpow2.f32 %v1703_v17  ;;  %v1663_v30 = vsub.f32 0.0, %v2329_v46  ;;  %v2330_v43 = vclamps-f32 %v1530_v53, 30.0 }
 0x3b3   : > { %v2760_v47 = vpop.eup %2759  ;;  %v1749_v50 = vadd.f32 1.0, %v2758_v48  ;;  %v1661_v45 = vsub.f32 0.0, %v2327_v20  ;;  %v2328_v56 = vclamps-f32 %v1522_v14, 30.0  ;;  %v1837_v12 = vpack.c.bf16 %v1806_v16, %v1805_v4 }
 0x3b4   : > { %v2762_v54 = vpop.eup %2761  ;;  %2779 = vrcp.f32 %v1751_v44  ;;  %v1752_v41 = vadd.f32 1.0, %v2760_v47  ;;  %v1713_v28 = vmul.f32 1.442695, %v1663_v30  ;;  %v1664_v7 = vsub.f32 0.0, %v2330_v43 }
 0x3b5   : > { %v2764_v59 = vpop.eup %2763  ;;  %2781 = vrcp.f32 %v1749_v50  ;;  %v1750_v32 = vadd.f32 1.0, %v2762_v54  ;;  %v1709_v49 = vmul.f32 1.442695, %v1661_v45  ;;  %v1662_v51 = vsub.f32 0.0, %v2328_v56  ;;  %v2625_v31 = vpop.f32.mrb[64].mxu0  ;;  %2643 = vmatprep.mubr.msk.bf16.mxu1 %vm777_vm2, %v1837_v12 }
 0x3b6   : > { %v2766_v17 = vpop.eup %2765  ;;  %2783 = vrcp.f32 %v1752_v41  ;;  %v1715_v21 = vmul.f32 1.442695, %v1664_v7  ;;  %v1543_v23 = vadd.f32 %v2625_v31, %v3356_v35  ;;  %v1534_v46 = vpop.f32.mrb[65].mxu0  ;;  %v1838_v4 = vpack.c.bf16 %v1808_v29, %v1807_v18 }
 0x3b7   : > { %v2768_v53 = vpop.eup %2767  ;;  %2785 = vrcp.f32 %v1750_v32  ;;  %v1711_v15 = vmul.f32 1.442695, %v1662_v51  ;;  %v1535_v26 = vadd.f32 %v3356_v35, %v1534_v46  ;;  %v2626_v20 = vpop.f32.mrb[66].mxu0  ;;  %v1809_v14 = vmul.f32 %v2766_v17, %v1289_v1 }
 0x3b8   : > { %v2770_v16 = vpop.eup %2769  ;;  %2787 = vpow2.f32 %v1713_v28  ;;  %v2333_v48 = vclamps-f32 %v1543_v23, 30.0  ;;  %2644 = vmatmul.mubr.msk.bf16.vlgmr.msra.gmra.mrb[52].mxu1 %vm777_vm2, %v1838_v4  ;;  %v1546_v44 = vadd.f32 %v2626_v20, %v3356_v35  ;;  %v1537_v30 = vpop.f32.mrb[67].mxu0  ;;  %v1811_v18 = vmul.f32 %v2764_v59, %v1291_v3 }
 0x3b9   : > { %v2772_v29 = vpop.eup %2771  ;;  %2789 = vpow2.f32 %v1709_v49  ;;  %v2331_v43 = vclamps-f32 %v1535_v26, 30.0  ;;  %v1538_v47 = vadd.f32 %v3356_v35, %v1537_v30  ;;  %v1810_v58 = vmul.f32 %v2770_v16, %v1290_v2 }
 0x3ba   : > { %v2774_v1 = vpop.eup %2773  ;;  %v1755_v50 = vadd.f32 1.0, %v2772_v29  ;;  %2791 = vpow2.f32 %v1715_v21  ;;  %v1667_v45 = vsub.f32 0.0, %v2333_v48  ;;  %v2334_v56 = vclamps-f32 %v1546_v44, 30.0 }
 0x3bb   : > { %v2776_v12 = vpop.eup %2775  ;;  %v1753_v54 = vadd.f32 1.0, %v2774_v1  ;;  %2793 = vpow2.f32 %v1711_v15  ;;  %v1665_v41 = vsub.f32 0.0, %v2331_v43  ;;  %v2332_v28 = vclamps-f32 %v1538_v47, 30.0 }
 0x3bc   : > { %v2778_v60 = vpop.eup %2777  ;;  %2795 = vrcp.f32 %v1755_v50  ;;  %v1756_v3 = vadd.f32 1.0, %v2776_v12  ;;  %v1721_v7 = vmul.f32 1.442695, %v1667_v45  ;;  %v1668_v59 = vsub.f32 0.0, %v2334_v56 }
 0x3bd   : > { %2797 = vrcp.f32 %v1753_v54  ;;  %v1754_v32 = vadd.f32 1.0, %v2778_v60  ;;  %v1717_v49 = vmul.f32 1.442695, %v1665_v41  ;;  %v1666_v63 = vsub.f32 0.0, %v2332_v28  ;;  %v2629_v2 = vpop.f32.mrb[68].mxu0 }
 0x3be   : > { %v2780_v51 = vpop.eup %2779  ;;  %2799 = vrcp.f32 %v1756_v3  ;;  %v1723_v31 = vmul.f32 1.442695, %v1668_v59  ;;  %v1559_v17 = vadd.f32 %v2629_v2, %v3356_v35  ;;  %v1839_v21 = vpack.c.bf16 %v1810_v58, %v1809_v14  ;;  %v1550_v23 = vpop.f32.mrb[69].mxu0 }
 0x3bf   : > { %v2782_v46 = vpop.eup %2781  ;;  %2801 = vrcp.f32 %v1754_v32  ;;  %v1719_v4 = vmul.f32 1.442695, %v1666_v63  ;;  %v1551_v15 = vadd.f32 %v3356_v35, %v1550_v23  ;;  %v1812_v26 = vmul.f32 %v2768_v53, %v1292_v0  ;;  %v2630_v20 = vpop.f32.mrb[70].mxu0 }
 0x3c0   : > { %v2784_v16 = vpop.eup %2783  ;;  %2803 = vpow2.f32 %v1721_v7  ;;  %v2337_v48 = vclamps-f32 %v1559_v17, 30.0  ;;  %2647 = vmatprep.mubr.msk.bf16.mxu1 %vm777_vm2, %v1839_v21  ;;  %v1562_v44 = vadd.f32 %v2630_v20, %v3356_v35  ;;  %v1553_v30 = vpop.f32.mrb[71].mxu0  ;;  %v3614_v14 = vmax.f32 %v3190_v8, 0.0 }
 0x3c1   : > { %v2786_v43 = vpop.eup %2785  ;;  %2805 = vpow2.f32 %v1717_v49  ;;  %v2335_v47 = vclamps-f32 %v1551_v15, 30.0  ;;  %v1840_v58 = vpack.c.bf16 %v1812_v26, %v1811_v18  ;;  %v1554_v1 = vadd.f32 %v3356_v35, %v1553_v30 }
 0x3c2   : > { %v1813_v29 = vmul.f32 %v2782_v46, %v3614_v14  ;;  %v2788_v61 = vpop.eup %2787  ;;  %2807 = vpow2.f32 %v1723_v31  ;;  %v1671_v0 = vsub.f32 0.0, %v2337_v48  ;;  %v2338_v53 = vclamps-f32 %v1562_v44, 30.0 }
 0x3c3   : > { %v3615_v50 = vmax.f32 %v3201_v13, 0.0  ;;  %v2790_v56 = vpop.eup %2789  ;;  %v1759_v12 = vadd.f32 1.0, %v2788_v61  ;;  %2809 = vpow2.f32 %v1719_v4  ;;  %v1669_v54 = vsub.f32 0.0, %v2335_v47  ;;  %2648 = vmatmul.mubr.msk.bf16.gmra.mrb[56].mxu1 %vm777_vm2, %v1840_v58 }
 0x3c4   : > { %v2336_v8 = vclamps-f32 %v1554_v1, 30.0  ;;  %v2792_v41 = vpop.eup %2791  ;;  %v1757_v28 = vadd.f32 1.0, %v2790_v56  ;;  %v1729_v60 = vmul.f32 1.442695, %v1671_v0  ;;  %v1672_v18 = vsub.f32 0.0, %v2338_v53 }
 0x3c5   : > { %v1814_v45 = vmul.f32 %v2786_v43, %v3615_v50  ;;  %v2794_v7 = vpop.eup %2793  ;;  %2811 = vrcp.f32 %v1759_v12  ;;  %v1760_v59 = vadd.f32 1.0, %v2792_v41  ;;  %v1725_v32 = vmul.f32 1.442695, %v1669_v54  ;;  %v2633_v63 = vpop.f32.mrb[72].mxu0 }
 0x3c6   : > { %v1670_v49 = vsub.f32 0.0, %v2336_v8  ;;  %v2796_v13 = vpop.eup %2795  ;;  %2813 = vrcp.f32 %v1757_v28  ;;  %v1758_v2 = vadd.f32 1.0, %v2794_v7  ;;  %v1731_v31 = vmul.f32 1.442695, %v1672_v18  ;;  %v1566_v21 = vpop.f32.mrb[73].mxu0 }
 0x3c7   : > { %v1841_v3 = vpack.c.bf16 %v1814_v45, %v1813_v29  ;;  %v1575_v17 = vadd.f32 %v2633_v63, %v3356_v35  ;;  %v2798_v23 = vpop.eup %2797  ;;  %2815 = vrcp.f32 %v1760_v59  ;;  %v1567_v4 = vadd.f32 %v3356_v35, %v1566_v21  ;;  %v2634_v20 = vpop.f32.mrb[74].mxu0 }
 0x3c8   : > { %v1727_v46 = vmul.f32 1.442695, %v1670_v49  ;;  %v3616_v15 = vmax.f32 %v3194_v10, 0.0  ;;  %v2800_v48 = vpop.eup %2799  ;;  %2817 = vrcp.f32 %v1758_v2  ;;  %v3617_v30 = vmax.f32 %v3197_v11, 0.0  ;;  %v1569_v43 = vpop.f32.mrb[75].mxu0 }
 0x3c9   : > { %2651 = vmatprep.mubr.msk.bf16.mxu1 %vm777_vm2, %v1841_v3  ;;  %v2341_v44 = vclamps-f32 %v1575_v17, 30.0  ;;  %v1578_v29 = vadd.f32 %v2634_v20, %v3356_v35  ;;  %v2802_v47 = vpop.eup %2801  ;;  %2819 = vpow2.f32 %v1729_v60  ;;  %v2339_v58 = vclamps-f32 %v1567_v4, 30.0 }
 0x3ca   : > { %v1815_v26 = vmul.f32 %v2780_v51, %v3616_v15  ;;  %v1816_v14 = vmul.f32 %v2784_v16, %v3617_v30  ;;  %v1570_v1 = vadd.f32 %v3356_v35, %v1569_v43  ;;  %v2804_v61 = vpop.eup %2803  ;;  %2821 = vpow2.f32 %v1725_v32 }
 0x3cb   : > { %v1675_v0 = vsub.f32 0.0, %v2341_v44  ;;  %v2342_v51 = vclamps-f32 %v1578_v29, 30.0  ;;  %v2806_v53 = vpop.eup %2805  ;;  %v1763_v50 = vadd.f32 1.0, %v2804_v61  ;;  %2823 = vpow2.f32 %v1731_v31 }
 0x3cc   : > { %v1842_v10 = vpack.c.bf16 %v1816_v14, %v1815_v26  ;;  %v1673_v45 = vsub.f32 0.0, %v2339_v58  ;;  %v2340_v56 = vclamps-f32 %v1570_v1, 30.0  ;;  %v2808_v11 = vpop.eup %2807  ;;  %v1761_v16 = vadd.f32 1.0, %v2806_v53 }
 0x3cd   : > { %2825 = vpow2.f32 %v1727_v46  ;;  %v1676_v12 = vsub.f32 0.0, %v2342_v51  ;;  %v3618_v54 = vmax.f32 %v3216_v22, 0.0  ;;  %v2810_v35 = vpop.eup %2809  ;;  %v1764_v41 = vadd.f32 1.0, %v2808_v11 }
 0x3ce   : > { %2652 = vmatmul.mubr.msk.bf16.gmra.mrb[60].mxu1 %vm777_vm2, %v1842_v10  ;;  %2827 = vrcp.f32 %v1763_v50  ;;  %v1737_v28 = vmul.f32 1.442695, %v1675_v0  ;;  %v1674_v60 = vsub.f32 0.0, %v2340_v56  ;;  %v1762_v18 = vadd.f32 1.0, %v2810_v35 }
 0x3cf   : > { %v1817_v8 = vmul.f32 %v2798_v23, %v3618_v54  ;;  %2829 = vrcp.f32 %v1761_v16  ;;  %v1733_v3 = vmul.f32 1.442695, %v1673_v45  ;;  %v3619_v7 = vmax.f32 %v3227_v27, 0.0  ;;  %v2812_v32 = vpop.eup %2811 }
 0x3d0   : > { %2831 = vrcp.f32 %v1764_v41  ;;  %v1739_v49 = vmul.f32 1.442695, %v1676_v12  ;;  %v3620_v63 = vmax.f32 %v3220_v24, 0.0  ;;  %v3621_v22 = vmax.f32 %v3223_v25, 0.0  ;;  %v2814_v17 = vpop.eup %2813 }
 0x3d1   : > { %v1818_v59 = vmul.f32 %v2802_v47, %v3619_v7  ;;  %2833 = vrcp.f32 %v1762_v18  ;;  %v1735_v21 = vmul.f32 1.442695, %v1674_v60  ;;  %v2816_v46 = vpop.eup %2815  ;;  %v3622_v27 = vmax.f32 %v3246_v39, 0.0 }
 0x3d2   : > { %v1819_v2 = vmul.f32 %v2796_v13, %v3620_v63  ;;  %v1820_v31 = vmul.f32 %v2800_v48, %v3621_v22  ;;  %2835 = vpow2.f32 %v1737_v28  ;;  %v2818_v15 = vpop.eup %2817  ;;  %v3623_v24 = vmax.f32 %v3249_v52, 0.0 }
 0x3d3   : > { %v1843_v23 = vpack.c.bf16 %v1818_v59, %v1817_v8  ;;  %2837 = vpow2.f32 %v1733_v3  ;;  %v1823_v26 = vmul.f32 %v2812_v32, %v3622_v27  ;;  %v2820_v20 = vpop.eup %2819  ;;  %v3624_v25 = vmax.f32 %v3242_v37, 0.0 }
 0x3d4   : > { %v1844_v4 = vpack.c.bf16 %v1820_v31, %v1819_v2  ;;  %v1824_v13 = vmul.f32 %v2816_v46, %v3623_v24  ;;  %2839 = vpow2.f32 %v1739_v49  ;;  %v3625_v44 = vmax.f32 %v3253_v42, 0.0  ;;  %v2822_v14 = vpop.eup %2821 }
 0x3d5   : > { %2655 = vmatprep.mubr.msk.bf16.mxu1 %vm777_vm2, %v1843_v23  ;;  %v1821_v48 = vmul.f32 %v2814_v17, %v3624_v25  ;;  %v1767_v29 = vadd.f32 1.0, %v2820_v20  ;;  %2841 = vpow2.f32 %v1735_v21  ;;  %v2824_v47 = vpop.eup %2823  ;;  %v1765_v39 = vadd.f32 1.0, %v2822_v14 }
 0x3d6   : > { %v1822_v30 = vmul.f32 %v2818_v15, %v3625_v44  ;;  %2656 = vmatmul.mubr.msk.bf16.gmra.mrb[64].mxu1 %vm777_vm2, %v1844_v4  ;;  %v1846_v43 = vpack.c.bf16 %v1824_v13, %v1823_v26  ;;  %v1768_v52 = vadd.f32 1.0, %v2824_v47  ;;  %v3626_v51 = vmax.f32 %v3272_v5, 0.0 }
 0x3d7   : > { %v2826_v1 = vpop.eup %2825  ;;  %2843 = vrcp.f32 %v1767_v29  ;;  %v3627_v50 = vmax.f32 %v3275_v6, 0.0  ;;  %v3628_v11 = vmax.f32 %v3268_v62, 0.0  ;;  %v3629_v12 = vmax.f32 %v3279_v9, 0.0 }
 0x3d8   : > { %v1845_v58 = vpack.c.bf16 %v1822_v30, %v1821_v48  ;;  %v2828_v61 = vpop.eup %2827  ;;  %2845 = vrcp.f32 %v1765_v39  ;;  %v1766_v0 = vadd.f32 1.0, %v2826_v1  ;;  %v3630_v32 = vmax.f32 %v3298_v36, 0.0 }
 0x3d9   : > { %v2830_v37 = vpop.eup %2829  ;;  %2847 = vrcp.f32 %v1768_v52  ;;  %v1827_v53 = vmul.f32 %v2828_v61, %v3626_v51  ;;  %v3631_v63 = vmax.f32 %v3301_v38, 0.0  ;;  %v3632_v22 = vmax.f32 %v3294_v34, 0.0 }
 0x3da   : > { %2659 = vmatprep.mubr.msk.bf16.mxu1 %vm777_vm2, %v1845_v58  ;;  %v2832_v42 = vpop.eup %2831  ;;  %2849 = vrcp.f32 %v1766_v0  ;;  %v1825_v16 = vmul.f32 %v2830_v37, %v3628_v11  ;;  %v3633_v17 = vmax.f32 %v3305_v55, 0.0  ;;  %v3634_v38 = vmax.f32 %v3324_v40, 0.0 }
 0x3db   : > { %v2834_v10 = vpop.eup %2833  ;;  %v1828_v45 = vmul.f32 %v2832_v42, %v3627_v50  ;;  %v3635_v24 = vmax.f32 %v3327_v19, 0.0  ;;  %v3636_v34 = vmax.f32 %v3320_v33, 0.0  ;;  %v3637_v20 = vmax.f32 %v3331_v57, 0.0  ;;  %v3474_v19 = vld [vmem:[%s3588_s8] ss:$0 sm:$0xff] }
 0x3dc   : > { %v2836_v56 = vpop.eup %2835  ;;  %v1826_v54 = vmul.f32 %v2834_v10, %v3629_v12 }
 0x3dd   : > { %v2838_v8 = vpop.eup %2837  ;;  %v1771_v35 = vadd.f32 1.0, %v2836_v56  ;;  %v1848_v41 = vpack.c.bf16 %v1828_v45, %v1827_v53 }
 0x3de   : > { %2660 = vmatmul.mubr.msk.bf16.gmra.mrb[68].mxu1 %vm777_vm2, %v1846_v43  ;;  %v2840_v28 = vpop.eup %2839  ;;  %v1769_v60 = vadd.f32 1.0, %v2838_v8  ;;  %v1847_v18 = vpack.c.bf16 %v1826_v54, %v1825_v16 }
 0x3df   : > { %v2842_v5 = vpop.eup %2841  ;;  %2851 = vrcp.f32 %v1771_v35  ;;  %v1772_v3 = vadd.f32 1.0, %v2840_v28 }
 0x3e0   : > { %2853 = vrcp.f32 %v1769_v60  ;;  %v1770_v6 = vadd.f32 1.0, %v2842_v5  ;;  %2663 = vmatprep.mubr.msk.bf16.mxu1 %vm777_vm2, %v1847_v18 }
 0x3e1   : > { %v2844_v62 = vpop.eup %2843  ;;  %2855 = vrcp.f32 %v1772_v3 }
 0x3e2   : > { %v2846_v7 = vpop.eup %2845  ;;  %2857 = vrcp.f32 %v1770_v6  ;;  %v1831_v49 = vmul.f32 %v2844_v62, %v3630_v32 }
 0x3e3   : > { %v2848_v9 = vpop.eup %2847  ;;  %v1829_v31 = vmul.f32 %v2846_v7, %v3632_v22 }
 0x3e4   : > { %v2850_v59 = vpop.eup %2849  ;;  %v1832_v2 = vmul.f32 %v2848_v9, %v3631_v63 }
 0x3e5   : > { %v1830_v21 = vmul.f32 %v2850_v59, %v3633_v17 }
 0x3e6   : > { %2664 = vmatmul.mubr.msk.bf16.gmra.mrb[72].mxu1 %vm777_vm2, %v1848_v41  ;;  %v1850_v23 = vpack.c.bf16 %v1832_v2, %v1831_v49 }
 0x3e7   : > { %v1849_v46 = vpack.c.bf16 %v1830_v21, %v1829_v31 }
 0x3e9   : > { %v2852_v4 = vpop.eup %2851  ;;  %2667 = vmatprep.mubr.msk.bf16.mxu1 %vm777_vm2, %v1849_v46 }
 0x3ea   : > { %v2854_v15 = vpop.eup %2853  ;;  %v1835_v26 = vmul.f32 %v2852_v4, %v3634_v38 }
 0x3eb   : > { %v2856_v36 = vpop.eup %2855  ;;  %v1833_v55 = vmul.f32 %v2854_v15, %v3636_v34 }
 0x3ec   : > { %v2858_v27 = vpop.eup %2857  ;;  %v1836_v13 = vmul.f32 %v2856_v36, %v3635_v24 }
 0x3ed   : > { %v1834_v25 = vmul.f32 %v2858_v27, %v3637_v20 }
 0x3ee   : > { %2668 = vmatmul.mubr.msk.bf16.gmra.mrb[76].mxu1 %vm777_vm2, %v1850_v23  ;;  %v1852_v48 = vpack.c.bf16 %v1836_v13, %v1835_v26 }
 0x3ef   : > { %v1851_v44 = vpack.c.bf16 %v1834_v25, %v1833_v55 }
 0x3f1   : > { %2671 = vmatprep.mubr.msk.bf16.mxu1 %vm777_vm2, %v1851_v44 }
 0x3f6   : > { %2672 = vmatmul.mubr.msk.bf16.gmra.mrb[80].mxu1 %vm777_vm2, %v1852_v48 }
 0x48b   : > { %v2645_v57 = vpop.f32.mrb[52].mxu1 }
 0x48c   : > { %v1983_v33 = vadd.f32 %v2645_v57, %v3474_v19  ;;  %v1974_v40 = vpop.f32.mrb[53].mxu1 }
 0x48d   : > { %v1975_v30 = vadd.f32 %v3474_v19, %v1974_v40  ;;  %v2646_v14 = vpop.f32.mrb[54].mxu1 }
 0x48e   : > { %2104 = vst.msk [vmem:[%s3479_s18 + $0x10] sm:$0xff] %vm2101_vm3, %v1983_v33  ;;  %v1986_v29 = vadd.f32 %v2646_v14, %v3474_v19  ;;  %v1977_v43 = vpop.f32.mrb[55].mxu1 }
 0x48f   : > { %2102 = vst.msk [vmem:[%s3479_s18] sm:$0xff] %vm2101_vm3, %v1975_v30  ;;  %v1978_v47 = vadd.f32 %v3474_v19, %v1977_v43 }
 0x490   : > { %2105 = vst.msk [vmem:[%s3479_s18 + $0x18] sm:$0xff] %vm2101_vm3, %v1986_v29 }
 0x491   : > { %2103 = vst.msk [vmem:[%s3479_s18 + $0x8] sm:$0xff] %vm2101_vm3, %v1978_v47 }
 0x496   : > { %v2649_v39 = vpop.f32.mrb[56].mxu1 }
 0x497   : > { %v1999_v58 = vadd.f32 %v2649_v39, %v3474_v19  ;;  %v1990_v1 = vpop.f32.mrb[57].mxu1 }
 0x498   : > { %v1991_v52 = vadd.f32 %v3474_v19, %v1990_v1  ;;  %v2650_v61 = vpop.f32.mrb[58].mxu1 }
 0x499   : > { %2108 = vst.msk [vmem:[%s3479_s18 + $0x30] sm:$0xff] %vm2101_vm3, %v1999_v58  ;;  %v2002_v0 = vadd.f32 %v2650_v61, %v3474_v19  ;;  %v1993_v37 = vpop.f32.mrb[59].mxu1 }
 0x49a   : > { %2106 = vst.msk [vmem:[%s3479_s18 + $0x20] sm:$0xff] %vm2101_vm3, %v1991_v52  ;;  %v1994_v42 = vadd.f32 %v3474_v19, %v1993_v37 }
 0x49b   : > { %2109 = vst.msk [vmem:[%s3479_s18 + $0x38] sm:$0xff] %vm2101_vm3, %v2002_v0 }
 0x49c   : > { %2107 = vst.msk [vmem:[%s3479_s18 + $0x28] sm:$0xff] %vm2101_vm3, %v1994_v42 }
 0x4a1   : > { %v2653_v10 = vpop.f32.mrb[60].mxu1 }
 0x4a2   : > { %v2015_v51 = vadd.f32 %v2653_v10, %v3474_v19  ;;  %v2006_v53 = vpop.f32.mrb[61].mxu1 }
 0x4a3   : > { %v2007_v50 = vadd.f32 %v3474_v19, %v2006_v53  ;;  %v2654_v45 = vpop.f32.mrb[62].mxu1 }
 0x4a4   : > { %2112 = vst.msk [vmem:[%s3479_s18 + $0x50] sm:$0xff] %vm2101_vm3, %v2015_v51  ;;  %v2018_v56 = vadd.f32 %v2654_v45, %v3474_v19  ;;  %v2009_v11 = vpop.f32.mrb[63].mxu1 }
 0x4a5   : > { %2110 = vst.msk [vmem:[%s3479_s18 + $0x40] sm:$0xff] %vm2101_vm3, %v2007_v50  ;;  %v2010_v16 = vadd.f32 %v3474_v19, %v2009_v11 }
 0x4a6   : > { %2113 = vst.msk [vmem:[%s3479_s18 + $0x58] sm:$0xff] %vm2101_vm3, %v2018_v56 }
 0x4a7   : > { %2111 = vst.msk [vmem:[%s3479_s18 + $0x48] sm:$0xff] %vm2101_vm3, %v2010_v16 }
 0x4a9   : > { %v2657_v12 = vpop.f32.mrb[64].mxu1 }
 0x4aa   : > { %v2031_v54 = vadd.f32 %v2657_v12, %v3474_v19  ;;  %v2022_v8 = vpop.f32.mrb[65].mxu1 }
 0x4ab   : > { %v2023_v35 = vadd.f32 %v3474_v19, %v2022_v8  ;;  %v2658_v41 = vpop.f32.mrb[66].mxu1 }
 0x4ac   : > { %2116 = vst.msk [vmem:[%s3479_s18 + $0x70] sm:$0xff] %vm2101_vm3, %v2031_v54  ;;  %v2034_v28 = vadd.f32 %v2658_v41, %v3474_v19  ;;  %v2025_v60 = vpop.f32.mrb[67].mxu1 }
 0x4ad   : > { %2114 = vst.msk [vmem:[%s3479_s18 + $0x60] sm:$0xff] %vm2101_vm3, %v2023_v35  ;;  %v2026_v18 = vadd.f32 %v3474_v19, %v2025_v60 }
 0x4ae   : > { %2117 = vst.msk [vmem:[%s3479_s18 + $0x78] sm:$0xff] %vm2101_vm3, %v2034_v28 }
 0x4af   : > { %2115 = vst.msk [vmem:[%s3479_s18 + $0x68] sm:$0xff] %vm2101_vm3, %v2026_v18 }
 0x4b1   : > { %v2661_v5 = vpop.f32.mrb[68].mxu1 }
 0x4b2   : > { %v2047_v3 = vadd.f32 %v2661_v5, %v3474_v19  ;;  %v2038_v6 = vpop.f32.mrb[69].mxu1 }
 0x4b3   : > { %v2039_v62 = vadd.f32 %v3474_v19, %v2038_v6  ;;  %v2662_v7 = vpop.f32.mrb[70].mxu1 }
 0x4b4   : > { %2120 = vst.msk [vmem:[%s3479_s18 + $0x90] sm:$0xff] %vm2101_vm3, %v2047_v3  ;;  %v2050_v9 = vadd.f32 %v2662_v7, %v3474_v19  ;;  %v2041_v59 = vpop.f32.mrb[71].mxu1 }
 0x4b5   : > { %2118 = vst.msk [vmem:[%s3479_s18 + $0x80] sm:$0xff] %vm2101_vm3, %v2039_v62  ;;  %v2042_v32 = vadd.f32 %v3474_v19, %v2041_v59 }
 0x4b6   : > { %2121 = vst.msk [vmem:[%s3479_s18 + $0x98] sm:$0xff] %vm2101_vm3, %v2050_v9 }
 0x4b7   : > { %2119 = vst.msk [vmem:[%s3479_s18 + $0x88] sm:$0xff] %vm2101_vm3, %v2042_v32 }
 0x4b9   : > { %v2665_v49 = vpop.f32.mrb[72].mxu1 }
 0x4ba   : > { %v2063_v63 = vadd.f32 %v2665_v49, %v3474_v19  ;;  %v2054_v2 = vpop.f32.mrb[73].mxu1 }
 0x4bb   : > { %v2055_v22 = vadd.f32 %v3474_v19, %v2054_v2  ;;  %v2666_v31 = vpop.f32.mrb[74].mxu1 }
 0x4bc   : > { %2124 = vst.msk [vmem:[%s3479_s18 + $0xb0] sm:$0xff] %vm2101_vm3, %v2063_v63  ;;  %v2066_v17 = vadd.f32 %v2666_v31, %v3474_v19  ;;  %v2057_v21 = vpop.f32.mrb[75].mxu1 }
 0x4bd   : > { %2122 = vst.msk [vmem:[%s3479_s18 + $0xa0] sm:$0xff] %vm2101_vm3, %v2055_v22  ;;  %v2058_v23 = vadd.f32 %v3474_v19, %v2057_v21 }
 0x4be   : > { %2125 = vst.msk [vmem:[%s3479_s18 + $0xb8] sm:$0xff] %vm2101_vm3, %v2066_v17 }
 0x4bf   : > { %2123 = vst.msk [vmem:[%s3479_s18 + $0xa8] sm:$0xff] %vm2101_vm3, %v2058_v23 }
 0x4c1   : > { %v2669_v46 = vpop.f32.mrb[76].mxu1 }
 0x4c2   : > { %v2079_v4 = vadd.f32 %v2669_v46, %v3474_v19  ;;  %v2070_v15 = vpop.f32.mrb[77].mxu1 }
 0x4c3   : > { %v2071_v36 = vadd.f32 %v3474_v19, %v2070_v15  ;;  %v2670_v27 = vpop.f32.mrb[78].mxu1 }
 0x4c4   : > { %2128 = vst.msk [vmem:[%s3479_s18 + $0xd0] sm:$0xff] %vm2101_vm3, %v2079_v4  ;;  %v2082_v38 = vadd.f32 %v2670_v27, %v3474_v19  ;;  %v2073_v26 = vpop.f32.mrb[79].mxu1 }
 0x4c5   : > { %2126 = vst.msk [vmem:[%s3479_s18 + $0xc0] sm:$0xff] %vm2101_vm3, %v2071_v36  ;;  %v2074_v24 = vadd.f32 %v3474_v19, %v2073_v26 }
 0x4c6   : > { %2129 = vst.msk [vmem:[%s3479_s18 + $0xd8] sm:$0xff] %vm2101_vm3, %v2082_v38 }
 0x4c7   : > { %2127 = vst.msk [vmem:[%s3479_s18 + $0xc8] sm:$0xff] %vm2101_vm3, %v2074_v24 }
 0x4c9   : > { %v2673_v13 = vpop.f32.mrb[80].mxu1 }
 0x4ca   : > { %v2095_v34 = vadd.f32 %v2673_v13, %v3474_v19  ;;  %v2086_v55 = vpop.f32.mrb[81].mxu1 }
 0x4cb   : > { %v2087_v20 = vadd.f32 %v3474_v19, %v2086_v55  ;;  %v2674_v25 = vpop.f32.mrb[82].mxu1 }
 0x4cc   : > { %2132 = vst.msk [vmem:[%s3479_s18 + $0xf0] sm:$0xff] %vm2101_vm3, %v2095_v34  ;;  %v2098_v48 = vadd.f32 %v2674_v25, %v3474_v19  ;;  %v2089_v44 = vpop.f32.mrb[83].mxu1 }
 0x4cd   : > { %2130 = vst.msk [vmem:[%s3479_s18 + $0xe0] sm:$0xff] %vm2101_vm3, %v2087_v20  ;;  %v2090_v57 = vadd.f32 %v3474_v19, %v2089_v44 }
 0x4ce   : > { %2133 = vst.msk [vmem:[%s3479_s18 + $0xf8] sm:$0xff] %vm2101_vm3, %v2098_v48 }
 0x4cf   : > { %2131 = vst.msk [vmem:[%s3479_s18 + $0xe8] sm:$0xff] %vm2101_vm3, %v2090_v57 }
 0x4d0 PF: > { %s19_s30 = sadd.s32 1, %s2865_s30  }
 0x4d1   : > { %p16_p4 = scmp.ge.s32.totalorder %s19_s30, 4  }
 0x4d3   :  { %18 = sbr.rel (!%p16_p4) target bundleno = 1 (0x1), region = 88 }

</bundles_post_ra>
